<compile_context>
chip_gen: v7x
topology: tpu7x:2x2x1
jax: 0.10.0
libtpu: 0.0.40
codegen_flags: <defaults>
</compile_context>

<pallas_src>
import math

import jax
import jax.numpy as jnp
import numpy as np
from jax.experimental import pallas as pl
from jax.experimental.pallas import tpu as pltpu

_BN_EPS = 1e-5


# ----------------------------- in-kernel helpers (traced inside the kernel) -

def _bn_relu_ld(y, gamma, beta, *, ow, c, n_pos, out_dtype):
    # Training-mode BatchNorm2d (batch stats, biased variance) folded to one
    # per-channel scale/shift, fused with ReLU, on a lane-dense (rows, ow*c)
    # conv output.  The conv bias cancels exactly under mean subtraction and
    # is never added.  One fused sum/sumsq reduction; result emitted directly
    # in out_dtype (bf16 for layers feeding the next conv).
    s = jnp.sum(jnp.concatenate([y, y * y], axis=-1), axis=0, keepdims=True)

    def fold(v):                     # (1, ow*c) -> (1, c): sum the ow lane groups
        acc = v[:, :c]
        for g in range(1, ow):
            acc = acc + v[:, g * c:(g + 1) * c]
        return acc

    inv = 1.0 / n_pos
    mean = fold(s[:, :ow * c]) * inv
    var = fold(s[:, ow * c:]) * inv - mean * mean          # biased batch variance
    scale = gamma * jax.lax.rsqrt(var + _BN_EPS)           # (1, c)
    shift = beta - mean * scale
    scale_t = jnp.concatenate([scale] * ow, axis=-1)       # tile to lane-dense width
    shift_t = jnp.concatenate([shift] * ow, axis=-1)
    return jnp.maximum(y * scale_t + shift_t, 0.0).astype(out_dtype)


def _maxpool2x2_ld(h, n, c):
    # h: lane-dense (N*H, W*C) -> (N, H//2, (W//2)*C).
    # H-half: full-lane-width pairwise max; W-half: adjacent 32-lane-block max
    # (pure lane slicing, no padded (2, C) minor-dim repack).
    rows, lanes = h.shape
    h_out = rows // n // 2
    z = h.reshape(n, h_out, 2, lanes)
    z = jnp.max(z, axis=2)                                  # (N, H//2, W*C)
    w_out = lanes // c // 2
    cols = [jnp.maximum(z[..., (2 * j) * c:(2 * j + 1) * c],
                        z[..., (2 * j + 1) * c:(2 * j + 2) * c])
            for j in range(w_out)]
    return jnp.concatenate(cols, axis=-1)                   # (N, H//2, (W//2)*C)


def _pad_taps_ld(h3, c, kh_n):
    # h3: lane-dense (N, H, W*C) bf16.  Zero-pad H and W by 1 and build the kh
    # row-window taps; the kw taps are folded into the banded conv weight, so
    # no per-kw slicing/concat happens in-kernel.
    n, hh, lanes = h3.shape
    zl = jnp.zeros((n, hh, c), h3.dtype)
    hp = jnp.concatenate([zl, h3, zl], axis=-1)             # W pad (lane concat)
    zr = jnp.zeros((n, 1, lanes + 2 * c), h3.dtype)
    hp = jnp.concatenate([zr, hp, zr], axis=1)              # H pad (row concat)
    taps = jnp.concatenate([hp[:, kh:kh + hh, :] for kh in range(kh_n)], axis=-1)
    return taps.reshape(n * hh, kh_n * (lanes + 2 * c))


# ----------------------------------- the Pallas kernel ----------------------

def _disc_fwd_kernel(p1_ref,
                     w1_ref, g1_ref, be1_ref,
                     w2_ref, g2_ref, be2_ref,
                     w3_ref, g3_ref, be3_ref,
                     fcw_ref, fcb_ref,
                     out_ref):
    n = out_ref.shape[0]

    # Conv2d(3,32,k=2,s=1,p=0) on 17x17: ONE banded matmul (K=102) whose output
    # is already lane-dense (N*16 rows, 16*32 lanes).
    y = jnp.dot(p1_ref[...], w1_ref[...], preferred_element_type=jnp.float32)
    h = _bn_relu_ld(y, g1_ref[...], be1_ref[...], ow=16, c=32,
                    n_pos=n * 256, out_dtype=jnp.bfloat16)
    h = _maxpool2x2_ld(h, n, 32)                            # (N, 8, 8*32)

    # Conv2d(32,32,k=3,s=1,p=1) on 8x8: banded matmul K=960 -> (N*8, 8*32).
    p = _pad_taps_ld(h, 32, 3)
    y = jnp.dot(p, w2_ref[...], preferred_element_type=jnp.float32)
    h = _bn_relu_ld(y, g2_ref[...], be2_ref[...], ow=8, c=32,
                    n_pos=n * 64, out_dtype=jnp.bfloat16)
    h = _maxpool2x2_ld(h, n, 32)                            # (N, 4, 4*32)

    # Conv2d(32,32,k=3,s=1,p=1) on 4x4: banded matmul K=576 -> (N*4, 4*32).
    p = _pad_taps_ld(h, 32, 3)
    y = jnp.dot(p, w3_ref[...], preferred_element_type=jnp.float32)
    h = _bn_relu_ld(y, g3_ref[...], be3_ref[...], ow=4, c=32,
                    n_pos=n * 16, out_dtype=jnp.float32)    # keep f32 into the FC

    # Linear(512,1) + EXACT sigmoid (negligible cost at (N,1); safe for BCE).
    feat = h.reshape(n, 512)                                # (h, w, c) flatten order
    logits = jnp.dot(feat, fcw_ref[...], preferred_element_type=jnp.float32)
    logits = logits + fcb_ref[...]
    out_ref[...] = 1.0 / (1.0 + jnp.exp(-logits))


# ----------------------------------- wrappers (plain-JAX glue) --------------

def _banded_conv_weight(w_oihw, *, w_in, ow):
    """PyTorch OIHW conv weight -> (KH*w_in*I, ow*O) bf16 banded matrix.

    Row k = kh*(w_in*I) + w_pad*I + ci (lane-dense padded-input row window),
    col j = ow_idx*O + co.  Entry = w[co, ci, kh, w_pad-ow_idx] when
    0 <= w_pad-ow_idx < KW else 0.  Folding the kw taps into the weight makes
    each conv a single MXU matmul with a lane-dense (W_out*C_out) output.
    One-time host-side prep; zeros cost MXU slack, not VPU/relayout time.
    """
    w = np.asarray(w_oihw, dtype=np.float32)
    o, i, kh_n, kw_n = w.shape
    out = np.zeros((kh_n * w_in * i, ow * o), dtype=np.float32)
    for kh in range(kh_n):
        for kw in range(kw_n):
            blk = w[:, :, kh, kw].T                          # (I, O)
            for j in range(ow):
                r0 = kh * (w_in * i) + (j + kw) * i
                out[r0:r0 + i, j * o:(j + 1) * o] = blk
    return jnp.asarray(out, dtype=jnp.bfloat16)


def prepare_params(p):
    """One-time weight layout / dtype preparation (hoisted out of the forward).

    Conv biases b1/b2/b3 are intentionally dropped: they cancel exactly under
    training-mode BatchNorm's mean subtraction.  (If eval mode / running stats
    were ever used, the biases must be reinstated.)
    """
    def row(v):
        return jnp.asarray(v, jnp.float32).reshape(1, -1)

    # FC weight permuted from PyTorch's NCHW (c,h,w) flatten order to the
    # kernel's lane-dense (h,w,c) feature order.
    fcw = jnp.transpose(jnp.asarray(p["fcw"], jnp.float32).reshape(1, 32, 4, 4),
                        (0, 2, 3, 1)).reshape(1, 512).T
    return {
        "w1": _banded_conv_weight(p["w1"], w_in=17, ow=16),   # (102, 512)
        "g1": row(p["g1"]), "be1": row(p["be1"]),
        "w2": _banded_conv_weight(p["w2"], w_in=10, ow=8),    # (960, 256)
        "g2": row(p["g2"]), "be2": row(p["be2"]),
        "w3": _banded_conv_weight(p["w3"], w_in=6, ow=4),     # (576, 128)
        "g3": row(p["g3"]), "be3": row(p["be3"]),
        "fcw": fcw.astype(jnp.float32),                       # (512, 1)
        "fcb": jnp.asarray(p["fcb"], jnp.float32).reshape(1, 1),
    }


def _conv1_patches(x_nchw, mask_nchw):
    # XLA-side (fused under the same jit): mask-mul, NCHW->NHWC, bf16 cast and
    # conv1 im2col.  Only ONE lane-dense bf16 array (N*16, 102) crosses the
    # HBM->VMEM boundary — no padded (17,3)-minor f32 tensors are DMAed.
    xm = x_nchw.astype(jnp.float32) * mask_nchw.astype(jnp.float32)
    x = jnp.transpose(xm, (0, 2, 3, 1)).astype(jnp.bfloat16)     # (N,17,17,3)
    n = x.shape[0]
    x3 = x.reshape(n, 17, 51)                                    # (w,c) on lanes
    p1 = jnp.concatenate([x3[:, 0:16, :], x3[:, 1:17, :]], axis=-1)  # kh taps
    return p1.reshape(n * 16, 102)


def _vmem_budget_bytes(n):
    # Per-N VMEM budget: ~0.75 MiB/image of live lane-dense activations &
    # patches (with safety margin) + banded weights (<1 MiB) + compiler
    # scratch headroom; clipped to a v5e/v6e-safe ceiling.
    return int(min(96 * 1024 * 1024, 8 * 1024 * 1024 + n * 768 * 1024))


@jax.jit
def discriminator_forward(x_nchw, mask_nchw, q):
    p1 = _conv1_patches(x_nchw, mask_nchw)
    n = x_nchw.shape[0]
    args = (p1,
            q["w1"], q["g1"], q["be1"],
            q["w2"], q["g2"], q["be2"],
            q["w3"], q["g3"], q["be3"],
            q["fcw"], q["fcb"])
    return pl.pallas_call(
        _disc_fwd_kernel,
        out_shape=jax.ShapeDtypeStruct((n, 1), jnp.float32),
        in_specs=[pl.BlockSpec(memory_space=pltpu.MemorySpace.VMEM)] * len(args),
        out_specs=pl.BlockSpec(memory_space=pltpu.MemorySpace.VMEM),
        compiler_params=pltpu.CompilerParams(
            vmem_limit_bytes=_vmem_budget_bytes(n)),
    )(*args)


# ----------------------------------- reference & params ---------------------

def _reference_forward(x_nchw, mask_nchw, p):
    # Independent pure-JAX reference mirroring the PyTorch forward exactly.
    x = (x_nchw * mask_nchw).astype(jnp.float32)
    x = jnp.transpose(x, (0, 2, 3, 1))

    def conv(h, w_oihw, b, padding):
        w = jnp.transpose(w_oihw, (2, 3, 1, 0))  # HWIO
        y = jax.lax.conv_general_dilated(
            h, w, window_strides=(1, 1), padding=padding,
            dimension_numbers=("NHWC", "HWIO", "NHWC"))
        return y + b[None, None, None, :]

    def bn_relu(y, g, b):
        mean = jnp.mean(y, axis=(0, 1, 2), keepdims=True)
        var = jnp.mean((y - mean) ** 2, axis=(0, 1, 2), keepdims=True)
        yn = (y - mean) / jnp.sqrt(var + _BN_EPS)
        return jnp.maximum(yn * g[None, None, None, :] + b[None, None, None, :], 0.0)

    def pool(y):
        return jax.lax.reduce_window(y, -jnp.inf, jax.lax.max,
                                     (1, 2, 2, 1), (1, 2, 2, 1), "VALID")

    h = pool(bn_relu(conv(x, p["w1"], p["b1"], "VALID"), p["g1"], p["be1"]))
    h = pool(bn_relu(conv(h, p["w2"], p["b2"], "SAME"), p["g2"], p["be2"]))
    h = bn_relu(conv(h, p["w3"], p["b3"], "SAME"), p["g3"], p["be3"])
    h_nchw = jnp.transpose(h, (0, 3, 1, 2))        # PyTorch flatten order (c, h, w)
    feat = h_nchw.reshape(h.shape[0], 512)
    logit = feat @ p["fcw"].T + p["fcb"][None, :]
    return jax.nn.sigmoid(logit)


def init_params(key):
    ks = jax.random.split(key, 14)

    def rnd(k, shape, scale):
        return scale * jax.random.normal(k, shape, jnp.float32)

    return {
        "w1": rnd(ks[0], (32, 3, 2, 2), 1.0 / math.sqrt(3 * 2 * 2)),
        "b1": rnd(ks[1], (32,), 0.1),
        "g1": 1.0 + rnd(ks[2], (32,), 0.1),
        "be1": rnd(ks[3], (32,), 0.1),
        "w2": rnd(ks[4], (32, 32, 3, 3), 1.0 / math.sqrt(32 * 9)),
        "b2": rnd(ks[5], (32,), 0.1),
        "g2": 1.0 + rnd(ks[6], (32,), 0.1),
        "be2": rnd(ks[7], (32,), 0.1),
        "w3": rnd(ks[8], (32, 32, 3, 3), 1.0 / math.sqrt(32 * 9)),
        "b3": rnd(ks[9], (32,), 0.1),
        "g3": 1.0 + rnd(ks[10], (32,), 0.1),
        "be3": rnd(ks[11], (32,), 0.1),
        "fcw": rnd(ks[12], (1, 512), 1.0 / math.sqrt(512)),
        "fcb": rnd(ks[13], (1,), 0.1),
    }


if __name__ == "__main__":
    key = jax.random.PRNGKey(0)
    kp, kx, km = jax.random.split(key, 3)
    params = init_params(kp)
    prepped = prepare_params(params)   # one-time layout/dtype prep (hoisted)

    # Inputs (PyTorch NCHW convention), spatial 17x17 as implied by Linear(512, 1).
    x = jax.random.normal(kx, (2, 3, 17, 17), jnp.float32)
    validmask = (jax.random.uniform(km, (2, 3, 17, 17)) > 0.25).astype(jnp.float32)

    out = jax.block_until_ready(discriminator_forward(x, validmask, prepped))
    ref = jax.block_until_ready(_reference_forward(x, validmask, params))

    assert out.shape == (2, 1), out.shape
    # bf16 MXU operands give ~1e-3-level differences on the sigmoid output.
    if not np.allclose(np.asarray(out), np.asarray(ref), atol=2e-2, rtol=2e-2):
        raise AssertionError(f"kernel/reference mismatch:\n{out}\nvs\n{ref}")
    print("KERNEL_OK")
</pallas_src>

<mosaic_0001>
module attributes {stable_mosaic.version = 11 : i64} {
  func.func @_disc_fwd_kernel(%arg0: memref<32x102xbf16, #tpu.memory_space<vmem>>, %arg1: memref<102x512xbf16, #tpu.memory_space<vmem>>, %arg2: memref<1x32xf32, #tpu.memory_space<vmem>>, %arg3: memref<1x32xf32, #tpu.memory_space<vmem>>, %arg4: memref<960x256xbf16, #tpu.memory_space<vmem>>, %arg5: memref<1x32xf32, #tpu.memory_space<vmem>>, %arg6: memref<1x32xf32, #tpu.memory_space<vmem>>, %arg7: memref<576x128xbf16, #tpu.memory_space<vmem>>, %arg8: memref<1x32xf32, #tpu.memory_space<vmem>>, %arg9: memref<1x32xf32, #tpu.memory_space<vmem>>, %arg10: memref<512x1xf32, #tpu.memory_space<vmem>>, %arg11: memref<1x1xf32, #tpu.memory_space<vmem>>, %arg12: memref<2x1xf32, #tpu.memory_space<vmem>>) attributes {dimension_semantics = [], scalar_prefetch = 0 : i64, scratch_operands = 0 : i64, tpu.core_type = #tpu.core_type<tc>} {
    %c0 = arith.constant 0 : index
    %c0_0 = arith.constant 0 : index
    %0 = vector.load %arg0[%c0, %c0_0] : memref<32x102xbf16, #tpu.memory_space<vmem>>, vector<32x102xbf16>
    %c0_1 = arith.constant 0 : index
    %c0_2 = arith.constant 0 : index
    %1 = vector.load %arg1[%c0_1, %c0_2] : memref<102x512xbf16, #tpu.memory_space<vmem>>, vector<102x512xbf16>
    %cst = arith.constant dense<0.000000e+00> : vector<32x512xf32>
    %2 = tpu.matmul %0, %1, %cst {dimension_numbers = #tpu.dot_dimension_numbers<[1], [0], [0], [1], [0, 0, 1, 1], [], []>} : vector<32x102xbf16>, vector<102x512xbf16>, vector<32x512xf32> -> vector<32x512xf32>
    %c0_3 = arith.constant 0 : index
    %c0_4 = arith.constant 0 : index
    %3 = vector.load %arg2[%c0_3, %c0_4] : memref<1x32xf32, #tpu.memory_space<vmem>>, vector<1x32xf32>
    %c0_5 = arith.constant 0 : index
    %c0_6 = arith.constant 0 : index
    %4 = vector.load %arg3[%c0_5, %c0_6] : memref<1x32xf32, #tpu.memory_space<vmem>>, vector<1x32xf32>
    %5 = arith.mulf %2, %2 : vector<32x512xf32>
    %6 = tpu.concatenate %2, %5 in 1 : vector<32x512xf32>, vector<32x512xf32> -> vector<32x1024xf32>
    %cst_7 = arith.constant dense<0.000000e+00> : vector<1024xf32>
    %7 = vector.multi_reduction <add>, %6, %cst_7 [0] : vector<32x1024xf32> to vector<1024xf32>
    %8 = vector.shape_cast %7 : vector<1024xf32> to vector<1x1024xf32>
    %9 = vector.extract_strided_slice %8 {offsets = [0, 0], sizes = [1, 512], strides = [1, 1]} : vector<1x1024xf32> to vector<1x512xf32>
    %10 = vector.extract_strided_slice %9 {offsets = [0, 0], sizes = [1, 32], strides = [1, 1]} : vector<1x512xf32> to vector<1x32xf32>
    %11 = vector.extract_strided_slice %9 {offsets = [0, 32], sizes = [1, 32], strides = [1, 1]} : vector<1x512xf32> to vector<1x32xf32>
    %12 = arith.addf %10, %11 : vector<1x32xf32>
    %13 = vector.extract_strided_slice %9 {offsets = [0, 64], sizes = [1, 32], strides = [1, 1]} : vector<1x512xf32> to vector<1x32xf32>
    %14 = arith.addf %12, %13 : vector<1x32xf32>
    %15 = vector.extract_strided_slice %9 {offsets = [0, 96], sizes = [1, 32], strides = [1, 1]} : vector<1x512xf32> to vector<1x32xf32>
    %16 = arith.addf %14, %15 : vector<1x32xf32>
    %17 = vector.extract_strided_slice %9 {offsets = [0, 128], sizes = [1, 32], strides = [1, 1]} : vector<1x512xf32> to vector<1x32xf32>
    %18 = arith.addf %16, %17 : vector<1x32xf32>
    %19 = vector.extract_strided_slice %9 {offsets = [0, 160], sizes = [1, 32], strides = [1, 1]} : vector<1x512xf32> to vector<1x32xf32>
    %20 = arith.addf %18, %19 : vector<1x32xf32>
    %21 = vector.extract_strided_slice %9 {offsets = [0, 192], sizes = [1, 32], strides = [1, 1]} : vector<1x512xf32> to vector<1x32xf32>
    %22 = arith.addf %20, %21 : vector<1x32xf32>
    %23 = vector.extract_strided_slice %9 {offsets = [0, 224], sizes = [1, 32], strides = [1, 1]} : vector<1x512xf32> to vector<1x32xf32>
    %24 = arith.addf %22, %23 : vector<1x32xf32>
    %25 = vector.extract_strided_slice %9 {offsets = [0, 256], sizes = [1, 32], strides = [1, 1]} : vector<1x512xf32> to vector<1x32xf32>
    %26 = arith.addf %24, %25 : vector<1x32xf32>
    %27 = vector.extract_strided_slice %9 {offsets = [0, 288], sizes = [1, 32], strides = [1, 1]} : vector<1x512xf32> to vector<1x32xf32>
    %28 = arith.addf %26, %27 : vector<1x32xf32>
    %29 = vector.extract_strided_slice %9 {offsets = [0, 320], sizes = [1, 32], strides = [1, 1]} : vector<1x512xf32> to vector<1x32xf32>
    %30 = arith.addf %28, %29 : vector<1x32xf32>
    %31 = vector.extract_strided_slice %9 {offsets = [0, 352], sizes = [1, 32], strides = [1, 1]} : vector<1x512xf32> to vector<1x32xf32>
    %32 = arith.addf %30, %31 : vector<1x32xf32>
    %33 = vector.extract_strided_slice %9 {offsets = [0, 384], sizes = [1, 32], strides = [1, 1]} : vector<1x512xf32> to vector<1x32xf32>
    %34 = arith.addf %32, %33 : vector<1x32xf32>
    %35 = vector.extract_strided_slice %9 {offsets = [0, 416], sizes = [1, 32], strides = [1, 1]} : vector<1x512xf32> to vector<1x32xf32>
    %36 = arith.addf %34, %35 : vector<1x32xf32>
    %37 = vector.extract_strided_slice %9 {offsets = [0, 448], sizes = [1, 32], strides = [1, 1]} : vector<1x512xf32> to vector<1x32xf32>
    %38 = arith.addf %36, %37 : vector<1x32xf32>
    %39 = vector.extract_strided_slice %9 {offsets = [0, 480], sizes = [1, 32], strides = [1, 1]} : vector<1x512xf32> to vector<1x32xf32>
    %40 = arith.addf %38, %39 : vector<1x32xf32>
    %cst_8 = arith.constant 0.001953125 : f32
    %41 = vector.broadcast %cst_8 : f32 to vector<1x32xf32>
    %42 = arith.mulf %40, %41 : vector<1x32xf32>
    %43 = vector.extract_strided_slice %8 {offsets = [0, 512], sizes = [1, 512], strides = [1, 1]} : vector<1x1024xf32> to vector<1x512xf32>
    %44 = vector.extract_strided_slice %43 {offsets = [0, 0], sizes = [1, 32], strides = [1, 1]} : vector<1x512xf32> to vector<1x32xf32>
    %45 = vector.extract_strided_slice %43 {offsets = [0, 32], sizes = [1, 32], strides = [1, 1]} : vector<1x512xf32> to vector<1x32xf32>
    %46 = arith.addf %44, %45 : vector<1x32xf32>
    %47 = vector.extract_strided_slice %43 {offsets = [0, 64], sizes = [1, 32], strides = [1, 1]} : vector<1x512xf32> to vector<1x32xf32>
    %48 = arith.addf %46, %47 : vector<1x32xf32>
    %49 = vector.extract_strided_slice %43 {offsets = [0, 96], sizes = [1, 32], strides = [1, 1]} : vector<1x512xf32> to vector<1x32xf32>
    %50 = arith.addf %48, %49 : vector<1x32xf32>
    %51 = vector.extract_strided_slice %43 {offsets = [0, 128], sizes = [1, 32], strides = [1, 1]} : vector<1x512xf32> to vector<1x32xf32>
    %52 = arith.addf %50, %51 : vector<1x32xf32>
    %53 = vector.extract_strided_slice %43 {offsets = [0, 160], sizes = [1, 32], strides = [1, 1]} : vector<1x512xf32> to vector<1x32xf32>
    %54 = arith.addf %52, %53 : vector<1x32xf32>
    %55 = vector.extract_strided_slice %43 {offsets = [0, 192], sizes = [1, 32], strides = [1, 1]} : vector<1x512xf32> to vector<1x32xf32>
    %56 = arith.addf %54, %55 : vector<1x32xf32>
    %57 = vector.extract_strided_slice %43 {offsets = [0, 224], sizes = [1, 32], strides = [1, 1]} : vector<1x512xf32> to vector<1x32xf32>
    %58 = arith.addf %56, %57 : vector<1x32xf32>
    %59 = vector.extract_strided_slice %43 {offsets = [0, 256], sizes = [1, 32], strides = [1, 1]} : vector<1x512xf32> to vector<1x32xf32>
    %60 = arith.addf %58, %59 : vector<1x32xf32>
    %61 = vector.extract_strided_slice %43 {offsets = [0, 288], sizes = [1, 32], strides = [1, 1]} : vector<1x512xf32> to vector<1x32xf32>
    %62 = arith.addf %60, %61 : vector<1x32xf32>
    %63 = vector.extract_strided_slice %43 {offsets = [0, 320], sizes = [1, 32], strides = [1, 1]} : vector<1x512xf32> to vector<1x32xf32>
    %64 = arith.addf %62, %63 : vector<1x32xf32>
    %65 = vector.extract_strided_slice %43 {offsets = [0, 352], sizes = [1, 32], strides = [1, 1]} : vector<1x512xf32> to vector<1x32xf32>
    %66 = arith.addf %64, %65 : vector<1x32xf32>
    %67 = vector.extract_strided_slice %43 {offsets = [0, 384], sizes = [1, 32], strides = [1, 1]} : vector<1x512xf32> to vector<1x32xf32>
    %68 = arith.addf %66, %67 : vector<1x32xf32>
    %69 = vector.extract_strided_slice %43 {offsets = [0, 416], sizes = [1, 32], strides = [1, 1]} : vector<1x512xf32> to vector<1x32xf32>
    %70 = arith.addf %68, %69 : vector<1x32xf32>
    %71 = vector.extract_strided_slice %43 {offsets = [0, 448], sizes = [1, 32], strides = [1, 1]} : vector<1x512xf32> to vector<1x32xf32>
    %72 = arith.addf %70, %71 : vector<1x32xf32>
    %73 = vector.extract_strided_slice %43 {offsets = [0, 480], sizes = [1, 32], strides = [1, 1]} : vector<1x512xf32> to vector<1x32xf32>
    %74 = arith.addf %72, %73 : vector<1x32xf32>
    %cst_9 = arith.constant 0.001953125 : f32
    %75 = vector.broadcast %cst_9 : f32 to vector<1x32xf32>
    %76 = arith.mulf %74, %75 : vector<1x32xf32>
    %77 = arith.mulf %42, %42 : vector<1x32xf32>
    %78 = arith.subf %76, %77 : vector<1x32xf32>
    %cst_10 = arith.constant 9.99999974E-6 : f32
    %79 = vector.broadcast %cst_10 : f32 to vector<1x32xf32>
    %80 = arith.addf %78, %79 : vector<1x32xf32>
    %81 = math.rsqrt %80 : vector<1x32xf32>
    %82 = arith.mulf %3, %81 : vector<1x32xf32>
    %83 = arith.mulf %42, %82 : vector<1x32xf32>
    %84 = arith.subf %4, %83 : vector<1x32xf32>
    %85 = tpu.concatenate %82, %82, %82, %82, %82, %82, %82, %82, %82, %82, %82, %82, %82, %82, %82, %82 in 1 : vector<1x32xf32>, vector<1x32xf32>, vector<1x32xf32>, vector<1x32xf32>, vector<1x32xf32>, vector<1x32xf32>, vector<1x32xf32>, vector<1x32xf32>, vector<1x32xf32>, vector<1x32xf32>, vector<1x32xf32>, vector<1x32xf32>, vector<1x32xf32>, vector<1x32xf32>, vector<1x32xf32>, vector<1x32xf32> -> vector<1x512xf32>
    %86 = tpu.concatenate %84, %84, %84, %84, %84, %84, %84, %84, %84, %84, %84, %84, %84, %84, %84, %84 in 1 : vector<1x32xf32>, vector<1x32xf32>, vector<1x32xf32>, vector<1x32xf32>, vector<1x32xf32>, vector<1x32xf32>, vector<1x32xf32>, vector<1x32xf32>, vector<1x32xf32>, vector<1x32xf32>, vector<1x32xf32>, vector<1x32xf32>, vector<1x32xf32>, vector<1x32xf32>, vector<1x32xf32>, vector<1x32xf32> -> vector<1x512xf32>
    %87 = vector.broadcast %85 : vector<1x512xf32> to vector<32x512xf32>
    %88 = arith.mulf %2, %87 : vector<32x512xf32>
    %89 = vector.broadcast %86 : vector<1x512xf32> to vector<32x512xf32>
    %90 = arith.addf %88, %89 : vector<32x512xf32>
    %cst_11 = arith.constant 0.000000e+00 : f32
    %91 = vector.broadcast %cst_11 : f32 to vector<32x512xf32>
    %92 = arith.maximumf %90, %91 : vector<32x512xf32>
    %93 = arith.truncf %92 : vector<32x512xf32> to vector<32x512xbf16>
    %94 = vector.shape_cast %93 : vector<32x512xbf16> to vector<2x8x2x512xbf16>
    %cst_12 = arith.constant dense<0xFF80> : vector<2x8x512xbf16>
    %95 = vector.multi_reduction <maximumf>, %94, %cst_12 [2] : vector<2x8x2x512xbf16> to vector<2x8x512xbf16>
    %96 = vector.extract_strided_slice %95 {offsets = [0, 0, 0], sizes = [2, 8, 32], strides = [1, 1, 1]} : vector<2x8x512xbf16> to vector<2x8x32xbf16>
    %97 = vector.extract_strided_slice %95 {offsets = [0, 0, 32], sizes = [2, 8, 32], strides = [1, 1, 1]} : vector<2x8x512xbf16> to vector<2x8x32xbf16>
    %98 = arith.maximumf %96, %97 : vector<2x8x32xbf16>
    %99 = vector.extract_strided_slice %95 {offsets = [0, 0, 64], sizes = [2, 8, 32], strides = [1, 1, 1]} : vector<2x8x512xbf16> to vector<2x8x32xbf16>
    %100 = vector.extract_strided_slice %95 {offsets = [0, 0, 96], sizes = [2, 8, 32], strides = [1, 1, 1]} : vector<2x8x512xbf16> to vector<2x8x32xbf16>
    %101 = arith.maximumf %99, %100 : vector<2x8x32xbf16>
    %102 = vector.extract_strided_slice %95 {offsets = [0, 0, 128], sizes = [2, 8, 32], strides = [1, 1, 1]} : vector<2x8x512xbf16> to vector<2x8x32xbf16>
    %103 = vector.extract_strided_slice %95 {offsets = [0, 0, 160], sizes = [2, 8, 32], strides = [1, 1, 1]} : vector<2x8x512xbf16> to vector<2x8x32xbf16>
    %104 = arith.maximumf %102, %103 : vector<2x8x32xbf16>
    %105 = vector.extract_strided_slice %95 {offsets = [0, 0, 192], sizes = [2, 8, 32], strides = [1, 1, 1]} : vector<2x8x512xbf16> to vector<2x8x32xbf16>
    %106 = vector.extract_strided_slice %95 {offsets = [0, 0, 224], sizes = [2, 8, 32], strides = [1, 1, 1]} : vector<2x8x512xbf16> to vector<2x8x32xbf16>
    %107 = arith.maximumf %105, %106 : vector<2x8x32xbf16>
    %108 = vector.extract_strided_slice %95 {offsets = [0, 0, 256], sizes = [2, 8, 32], strides = [1, 1, 1]} : vector<2x8x512xbf16> to vector<2x8x32xbf16>
    %109 = vector.extract_strided_slice %95 {offsets = [0, 0, 288], sizes = [2, 8, 32], strides = [1, 1, 1]} : vector<2x8x512xbf16> to vector<2x8x32xbf16>
    %110 = arith.maximumf %108, %109 : vector<2x8x32xbf16>
    %111 = vector.extract_strided_slice %95 {offsets = [0, 0, 320], sizes = [2, 8, 32], strides = [1, 1, 1]} : vector<2x8x512xbf16> to vector<2x8x32xbf16>
    %112 = vector.extract_strided_slice %95 {offsets = [0, 0, 352], sizes = [2, 8, 32], strides = [1, 1, 1]} : vector<2x8x512xbf16> to vector<2x8x32xbf16>
    %113 = arith.maximumf %111, %112 : vector<2x8x32xbf16>
    %114 = vector.extract_strided_slice %95 {offsets = [0, 0, 384], sizes = [2, 8, 32], strides = [1, 1, 1]} : vector<2x8x512xbf16> to vector<2x8x32xbf16>
    %115 = vector.extract_strided_slice %95 {offsets = [0, 0, 416], sizes = [2, 8, 32], strides = [1, 1, 1]} : vector<2x8x512xbf16> to vector<2x8x32xbf16>
    %116 = arith.maximumf %114, %115 : vector<2x8x32xbf16>
    %117 = vector.extract_strided_slice %95 {offsets = [0, 0, 448], sizes = [2, 8, 32], strides = [1, 1, 1]} : vector<2x8x512xbf16> to vector<2x8x32xbf16>
    %118 = vector.extract_strided_slice %95 {offsets = [0, 0, 480], sizes = [2, 8, 32], strides = [1, 1, 1]} : vector<2x8x512xbf16> to vector<2x8x32xbf16>
    %119 = arith.maximumf %117, %118 : vector<2x8x32xbf16>
    %120 = tpu.concatenate %98, %101, %104, %107, %110, %113, %116, %119 in 2 : vector<2x8x32xbf16>, vector<2x8x32xbf16>, vector<2x8x32xbf16>, vector<2x8x32xbf16>, vector<2x8x32xbf16>, vector<2x8x32xbf16>, vector<2x8x32xbf16>, vector<2x8x32xbf16> -> vector<2x8x256xbf16>
    %cst_13 = arith.constant 0.000000e+00 : bf16
    %121 = vector.broadcast %cst_13 : bf16 to vector<2x8x32xbf16>
    %122 = tpu.concatenate %121, %120, %121 in 2 : vector<2x8x32xbf16>, vector<2x8x256xbf16>, vector<2x8x32xbf16> -> vector<2x8x320xbf16>
    %cst_14 = arith.constant 0.000000e+00 : bf16
    %123 = vector.broadcast %cst_14 : bf16 to vector<2x1x320xbf16>
    %124 = tpu.concatenate %123, %122, %123 in 1 : vector<2x1x320xbf16>, vector<2x8x320xbf16>, vector<2x1x320xbf16> -> vector<2x10x320xbf16>
    %125 = vector.extract_strided_slice %124 {offsets = [0, 0, 0], sizes = [2, 8, 320], strides = [1, 1, 1]} : vector<2x10x320xbf16> to vector<2x8x320xbf16>
    %126 = vector.extract_strided_slice %124 {offsets = [0, 1, 0], sizes = [2, 8, 320], strides = [1, 1, 1]} : vector<2x10x320xbf16> to vector<2x8x320xbf16>
    %127 = vector.extract_strided_slice %124 {offsets = [0, 2, 0], sizes = [2, 8, 320], strides = [1, 1, 1]} : vector<2x10x320xbf16> to vector<2x8x320xbf16>
    %128 = tpu.concatenate %125, %126, %127 in 2 : vector<2x8x320xbf16>, vector<2x8x320xbf16>, vector<2x8x320xbf16> -> vector<2x8x960xbf16>
    %129 = vector.shape_cast %128 : vector<2x8x960xbf16> to vector<16x960xbf16>
    %c0_15 = arith.constant 0 : index
    %c0_16 = arith.constant 0 : index
    %130 = vector.load %arg4[%c0_15, %c0_16] : memref<960x256xbf16, #tpu.memory_space<vmem>>, vector<960x256xbf16>
    %cst_17 = arith.constant dense<0.000000e+00> : vector<16x256xf32>
    %131 = tpu.matmul %129, %130, %cst_17 {dimension_numbers = #tpu.dot_dimension_numbers<[1], [0], [0], [1], [0, 0, 1, 1], [], []>} : vector<16x960xbf16>, vector<960x256xbf16>, vector<16x256xf32> -> vector<16x256xf32>
    %c0_18 = arith.constant 0 : index
    %c0_19 = arith.constant 0 : index
    %132 = vector.load %arg5[%c0_18, %c0_19] : memref<1x32xf32, #tpu.memory_space<vmem>>, vector<1x32xf32>
    %c0_20 = arith.constant 0 : index
    %c0_21 = arith.constant 0 : index
    %133 = vector.load %arg6[%c0_20, %c0_21] : memref<1x32xf32, #tpu.memory_space<vmem>>, vector<1x32xf32>
    %134 = arith.mulf %131, %131 : vector<16x256xf32>
    %135 = tpu.concatenate %131, %134 in 1 : vector<16x256xf32>, vector<16x256xf32> -> vector<16x512xf32>
    %cst_22 = arith.constant dense<0.000000e+00> : vector<512xf32>
    %136 = vector.multi_reduction <add>, %135, %cst_22 [0] : vector<16x512xf32> to vector<512xf32>
    %137 = vector.shape_cast %136 : vector<512xf32> to vector<1x512xf32>
    %138 = vector.extract_strided_slice %137 {offsets = [0, 0], sizes = [1, 256], strides = [1, 1]} : vector<1x512xf32> to vector<1x256xf32>
    %139 = vector.extract_strided_slice %138 {offsets = [0, 0], sizes = [1, 32], strides = [1, 1]} : vector<1x256xf32> to vector<1x32xf32>
    %140 = vector.extract_strided_slice %138 {offsets = [0, 32], sizes = [1, 32], strides = [1, 1]} : vector<1x256xf32> to vector<1x32xf32>
    %141 = arith.addf %139, %140 : vector<1x32xf32>
    %142 = vector.extract_strided_slice %138 {offsets = [0, 64], sizes = [1, 32], strides = [1, 1]} : vector<1x256xf32> to vector<1x32xf32>
    %143 = arith.addf %141, %142 : vector<1x32xf32>
    %144 = vector.extract_strided_slice %138 {offsets = [0, 96], sizes = [1, 32], strides = [1, 1]} : vector<1x256xf32> to vector<1x32xf32>
    %145 = arith.addf %143, %144 : vector<1x32xf32>
    %146 = vector.extract_strided_slice %138 {offsets = [0, 128], sizes = [1, 32], strides = [1, 1]} : vector<1x256xf32> to vector<1x32xf32>
    %147 = arith.addf %145, %146 : vector<1x32xf32>
    %148 = vector.extract_strided_slice %138 {offsets = [0, 160], sizes = [1, 32], strides = [1, 1]} : vector<1x256xf32> to vector<1x32xf32>
    %149 = arith.addf %147, %148 : vector<1x32xf32>
    %150 = vector.extract_strided_slice %138 {offsets = [0, 192], sizes = [1, 32], strides = [1, 1]} : vector<1x256xf32> to vector<1x32xf32>
    %151 = arith.addf %149, %150 : vector<1x32xf32>
    %152 = vector.extract_strided_slice %138 {offsets = [0, 224], sizes = [1, 32], strides = [1, 1]} : vector<1x256xf32> to vector<1x32xf32>
    %153 = arith.addf %151, %152 : vector<1x32xf32>
    %cst_23 = arith.constant 7.812500e-03 : f32
    %154 = vector.broadcast %cst_23 : f32 to vector<1x32xf32>
    %155 = arith.mulf %153, %154 : vector<1x32xf32>
    %156 = vector.extract_strided_slice %137 {offsets = [0, 256], sizes = [1, 256], strides = [1, 1]} : vector<1x512xf32> to vector<1x256xf32>
    %157 = vector.extract_strided_slice %156 {offsets = [0, 0], sizes = [1, 32], strides = [1, 1]} : vector<1x256xf32> to vector<1x32xf32>
    %158 = vector.extract_strided_slice %156 {offsets = [0, 32], sizes = [1, 32], strides = [1, 1]} : vector<1x256xf32> to vector<1x32xf32>
    %159 = arith.addf %157, %158 : vector<1x32xf32>
    %160 = vector.extract_strided_slice %156 {offsets = [0, 64], sizes = [1, 32], strides = [1, 1]} : vector<1x256xf32> to vector<1x32xf32>
    %161 = arith.addf %159, %160 : vector<1x32xf32>
    %162 = vector.extract_strided_slice %156 {offsets = [0, 96], sizes = [1, 32], strides = [1, 1]} : vector<1x256xf32> to vector<1x32xf32>
    %163 = arith.addf %161, %162 : vector<1x32xf32>
    %164 = vector.extract_strided_slice %156 {offsets = [0, 128], sizes = [1, 32], strides = [1, 1]} : vector<1x256xf32> to vector<1x32xf32>
    %165 = arith.addf %163, %164 : vector<1x32xf32>
    %166 = vector.extract_strided_slice %156 {offsets = [0, 160], sizes = [1, 32], strides = [1, 1]} : vector<1x256xf32> to vector<1x32xf32>
    %167 = arith.addf %165, %166 : vector<1x32xf32>
    %168 = vector.extract_strided_slice %156 {offsets = [0, 192], sizes = [1, 32], strides = [1, 1]} : vector<1x256xf32> to vector<1x32xf32>
    %169 = arith.addf %167, %168 : vector<1x32xf32>
    %170 = vector.extract_strided_slice %156 {offsets = [0, 224], sizes = [1, 32], strides = [1, 1]} : vector<1x256xf32> to vector<1x32xf32>
    %171 = arith.addf %169, %170 : vector<1x32xf32>
    %cst_24 = arith.constant 7.812500e-03 : f32
    %172 = vector.broadcast %cst_24 : f32 to vector<1x32xf32>
    %173 = arith.mulf %171, %172 : vector<1x32xf32>
    %174 = arith.mulf %155, %155 : vector<1x32xf32>
    %175 = arith.subf %173, %174 : vector<1x32xf32>
    %cst_25 = arith.constant 9.99999974E-6 : f32
    %176 = vector.broadcast %cst_25 : f32 to vector<1x32xf32>
    %177 = arith.addf %175, %176 : vector<1x32xf32>
    %178 = math.rsqrt %177 : vector<1x32xf32>
    %179 = arith.mulf %132, %178 : vector<1x32xf32>
    %180 = arith.mulf %155, %179 : vector<1x32xf32>
    %181 = arith.subf %133, %180 : vector<1x32xf32>
    %182 = tpu.concatenate %179, %179, %179, %179, %179, %179, %179, %179 in 1 : vector<1x32xf32>, vector<1x32xf32>, vector<1x32xf32>, vector<1x32xf32>, vector<1x32xf32>, vector<1x32xf32>, vector<1x32xf32>, vector<1x32xf32> -> vector<1x256xf32>
    %183 = tpu.concatenate %181, %181, %181, %181, %181, %181, %181, %181 in 1 : vector<1x32xf32>, vector<1x32xf32>, vector<1x32xf32>, vector<1x32xf32>, vector<1x32xf32>, vector<1x32xf32>, vector<1x32xf32>, vector<1x32xf32> -> vector<1x256xf32>
    %184 = vector.broadcast %182 : vector<1x256xf32> to vector<16x256xf32>
    %185 = arith.mulf %131, %184 : vector<16x256xf32>
    %186 = vector.broadcast %183 : vector<1x256xf32> to vector<16x256xf32>
    %187 = arith.addf %185, %186 : vector<16x256xf32>
    %cst_26 = arith.constant 0.000000e+00 : f32
    %188 = vector.broadcast %cst_26 : f32 to vector<16x256xf32>
    %189 = arith.maximumf %187, %188 : vector<16x256xf32>
    %190 = arith.truncf %189 : vector<16x256xf32> to vector<16x256xbf16>
    %191 = vector.shape_cast %190 : vector<16x256xbf16> to vector<2x4x2x256xbf16>
    %cst_27 = arith.constant dense<0xFF80> : vector<2x4x256xbf16>
    %192 = vector.multi_reduction <maximumf>, %191, %cst_27 [2] : vector<2x4x2x256xbf16> to vector<2x4x256xbf16>
    %193 = vector.extract_strided_slice %192 {offsets = [0, 0, 0], sizes = [2, 4, 32], strides = [1, 1, 1]} : vector<2x4x256xbf16> to vector<2x4x32xbf16>
    %194 = vector.extract_strided_slice %192 {offsets = [0, 0, 32], sizes = [2, 4, 32], strides = [1, 1, 1]} : vector<2x4x256xbf16> to vector<2x4x32xbf16>
    %195 = arith.maximumf %193, %194 : vector<2x4x32xbf16>
    %196 = vector.extract_strided_slice %192 {offsets = [0, 0, 64], sizes = [2, 4, 32], strides = [1, 1, 1]} : vector<2x4x256xbf16> to vector<2x4x32xbf16>
    %197 = vector.extract_strided_slice %192 {offsets = [0, 0, 96], sizes = [2, 4, 32], strides = [1, 1, 1]} : vector<2x4x256xbf16> to vector<2x4x32xbf16>
    %198 = arith.maximumf %196, %197 : vector<2x4x32xbf16>
    %199 = vector.extract_strided_slice %192 {offsets = [0, 0, 128], sizes = [2, 4, 32], strides = [1, 1, 1]} : vector<2x4x256xbf16> to vector<2x4x32xbf16>
    %200 = vector.extract_strided_slice %192 {offsets = [0, 0, 160], sizes = [2, 4, 32], strides = [1, 1, 1]} : vector<2x4x256xbf16> to vector<2x4x32xbf16>
    %201 = arith.maximumf %199, %200 : vector<2x4x32xbf16>
    %202 = vector.extract_strided_slice %192 {offsets = [0, 0, 192], sizes = [2, 4, 32], strides = [1, 1, 1]} : vector<2x4x256xbf16> to vector<2x4x32xbf16>
    %203 = vector.extract_strided_slice %192 {offsets = [0, 0, 224], sizes = [2, 4, 32], strides = [1, 1, 1]} : vector<2x4x256xbf16> to vector<2x4x32xbf16>
    %204 = arith.maximumf %202, %203 : vector<2x4x32xbf16>
    %205 = tpu.concatenate %195, %198, %201, %204 in 2 : vector<2x4x32xbf16>, vector<2x4x32xbf16>, vector<2x4x32xbf16>, vector<2x4x32xbf16> -> vector<2x4x128xbf16>
    %cst_28 = arith.constant 0.000000e+00 : bf16
    %206 = vector.broadcast %cst_28 : bf16 to vector<2x4x32xbf16>
    %207 = tpu.concatenate %206, %205, %206 in 2 : vector<2x4x32xbf16>, vector<2x4x128xbf16>, vector<2x4x32xbf16> -> vector<2x4x192xbf16>
    %cst_29 = arith.constant 0.000000e+00 : bf16
    %208 = vector.broadcast %cst_29 : bf16 to vector<2x1x192xbf16>
    %209 = tpu.concatenate %208, %207, %208 in 1 : vector<2x1x192xbf16>, vector<2x4x192xbf16>, vector<2x1x192xbf16> -> vector<2x6x192xbf16>
    %210 = vector.extract_strided_slice %209 {offsets = [0, 0, 0], sizes = [2, 4, 192], strides = [1, 1, 1]} : vector<2x6x192xbf16> to vector<2x4x192xbf16>
    %211 = vector.extract_strided_slice %209 {offsets = [0, 1, 0], sizes = [2, 4, 192], strides = [1, 1, 1]} : vector<2x6x192xbf16> to vector<2x4x192xbf16>
    %212 = vector.extract_strided_slice %209 {offsets = [0, 2, 0], sizes = [2, 4, 192], strides = [1, 1, 1]} : vector<2x6x192xbf16> to vector<2x4x192xbf16>
    %213 = tpu.concatenate %210, %211, %212 in 2 : vector<2x4x192xbf16>, vector<2x4x192xbf16>, vector<2x4x192xbf16> -> vector<2x4x576xbf16>
    %214 = vector.shape_cast %213 : vector<2x4x576xbf16> to vector<8x576xbf16>
    %c0_30 = arith.constant 0 : index
    %c0_31 = arith.constant 0 : index
    %215 = vector.load %arg7[%c0_30, %c0_31] : memref<576x128xbf16, #tpu.memory_space<vmem>>, vector<576x128xbf16>
    %cst_32 = arith.constant dense<0.000000e+00> : vector<8x128xf32>
    %216 = tpu.matmul %214, %215, %cst_32 {dimension_numbers = #tpu.dot_dimension_numbers<[1], [0], [0], [1], [0, 0, 1, 1], [], []>} : vector<8x576xbf16>, vector<576x128xbf16>, vector<8x128xf32> -> vector<8x128xf32>
    %c0_33 = arith.constant 0 : index
    %c0_34 = arith.constant 0 : index
    %217 = vector.load %arg8[%c0_33, %c0_34] : memref<1x32xf32, #tpu.memory_space<vmem>>, vector<1x32xf32>
    %c0_35 = arith.constant 0 : index
    %c0_36 = arith.constant 0 : index
    %218 = vector.load %arg9[%c0_35, %c0_36] : memref<1x32xf32, #tpu.memory_space<vmem>>, vector<1x32xf32>
    %219 = arith.mulf %216, %216 : vector<8x128xf32>
    %220 = tpu.concatenate %216, %219 in 1 : vector<8x128xf32>, vector<8x128xf32> -> vector<8x256xf32>
    %cst_37 = arith.constant dense<0.000000e+00> : vector<256xf32>
    %221 = vector.multi_reduction <add>, %220, %cst_37 [0] : vector<8x256xf32> to vector<256xf32>
    %222 = vector.shape_cast %221 : vector<256xf32> to vector<1x256xf32>
    %223 = vector.extract_strided_slice %222 {offsets = [0, 0], sizes = [1, 128], strides = [1, 1]} : vector<1x256xf32> to vector<1x128xf32>
    %224 = vector.extract_strided_slice %223 {offsets = [0, 0], sizes = [1, 32], strides = [1, 1]} : vector<1x128xf32> to vector<1x32xf32>
    %225 = vector.extract_strided_slice %223 {offsets = [0, 32], sizes = [1, 32], strides = [1, 1]} : vector<1x128xf32> to vector<1x32xf32>
    %226 = arith.addf %224, %225 : vector<1x32xf32>
    %227 = vector.extract_strided_slice %223 {offsets = [0, 64], sizes = [1, 32], strides = [1, 1]} : vector<1x128xf32> to vector<1x32xf32>
    %228 = arith.addf %226, %227 : vector<1x32xf32>
    %229 = vector.extract_strided_slice %223 {offsets = [0, 96], sizes = [1, 32], strides = [1, 1]} : vector<1x128xf32> to vector<1x32xf32>
    %230 = arith.addf %228, %229 : vector<1x32xf32>
    %cst_38 = arith.constant 3.125000e-02 : f32
    %231 = vector.broadcast %cst_38 : f32 to vector<1x32xf32>
    %232 = arith.mulf %230, %231 : vector<1x32xf32>
    %233 = vector.extract_strided_slice %222 {offsets = [0, 128], sizes = [1, 128], strides = [1, 1]} : vector<1x256xf32> to vector<1x128xf32>
    %234 = vector.extract_strided_slice %233 {offsets = [0, 0], sizes = [1, 32], strides = [1, 1]} : vector<1x128xf32> to vector<1x32xf32>
    %235 = vector.extract_strided_slice %233 {offsets = [0, 32], sizes = [1, 32], strides = [1, 1]} : vector<1x128xf32> to vector<1x32xf32>
    %236 = arith.addf %234, %235 : vector<1x32xf32>
    %237 = vector.extract_strided_slice %233 {offsets = [0, 64], sizes = [1, 32], strides = [1, 1]} : vector<1x128xf32> to vector<1x32xf32>
    %238 = arith.addf %236, %237 : vector<1x32xf32>
    %239 = vector.extract_strided_slice %233 {offsets = [0, 96], sizes = [1, 32], strides = [1, 1]} : vector<1x128xf32> to vector<1x32xf32>
    %240 = arith.addf %238, %239 : vector<1x32xf32>
    %cst_39 = arith.constant 3.125000e-02 : f32
    %241 = vector.broadcast %cst_39 : f32 to vector<1x32xf32>
    %242 = arith.mulf %240, %241 : vector<1x32xf32>
    %243 = arith.mulf %232, %232 : vector<1x32xf32>
    %244 = arith.subf %242, %243 : vector<1x32xf32>
    %cst_40 = arith.constant 9.99999974E-6 : f32
    %245 = vector.broadcast %cst_40 : f32 to vector<1x32xf32>
    %246 = arith.addf %244, %245 : vector<1x32xf32>
    %247 = math.rsqrt %246 : vector<1x32xf32>
    %248 = arith.mulf %217, %247 : vector<1x32xf32>
    %249 = arith.mulf %232, %248 : vector<1x32xf32>
    %250 = arith.subf %218, %249 : vector<1x32xf32>
    %251 = tpu.concatenate %248, %248, %248, %248 in 1 : vector<1x32xf32>, vector<1x32xf32>, vector<1x32xf32>, vector<1x32xf32> -> vector<1x128xf32>
    %252 = tpu.concatenate %250, %250, %250, %250 in 1 : vector<1x32xf32>, vector<1x32xf32>, vector<1x32xf32>, vector<1x32xf32> -> vector<1x128xf32>
    %253 = vector.broadcast %251 : vector<1x128xf32> to vector<8x128xf32>
    %254 = arith.mulf %216, %253 : vector<8x128xf32>
    %255 = vector.broadcast %252 : vector<1x128xf32> to vector<8x128xf32>
    %256 = arith.addf %254, %255 : vector<8x128xf32>
    %cst_41 = arith.constant 0.000000e+00 : f32
    %257 = vector.broadcast %cst_41 : f32 to vector<8x128xf32>
    %258 = arith.maximumf %256, %257 : vector<8x128xf32>
    %259 = vector.shape_cast %258 : vector<8x128xf32> to vector<2x512xf32>
    %c0_42 = arith.constant 0 : index
    %c0_43 = arith.constant 0 : index
    %260 = vector.load %arg10[%c0_42, %c0_43] : memref<512x1xf32, #tpu.memory_space<vmem>>, vector<512x1xf32>
    %cst_44 = arith.constant dense<0.000000e+00> : vector<2x1xf32>
    %261 = tpu.matmul %259, %260, %cst_44 {dimension_numbers = #tpu.dot_dimension_numbers<[1], [0], [0], [1], [0, 0, 1, 1], [], []>} : vector<2x512xf32>, vector<512x1xf32>, vector<2x1xf32> -> vector<2x1xf32>
    %c0_45 = arith.constant 0 : index
    %c0_46 = arith.constant 0 : index
    %262 = vector.load %arg11[%c0_45, %c0_46] : memref<1x1xf32, #tpu.memory_space<vmem>>, vector<1x1xf32>
    %263 = vector.broadcast %262 : vector<1x1xf32> to vector<2x1xf32>
    %264 = arith.addf %261, %263 : vector<2x1xf32>
    %cst_47 = arith.constant 0.000000e+00 : f32
    %265 = vector.broadcast %cst_47 : f32 to vector<2x1xf32>
    %266 = arith.subf %265, %264 : vector<2x1xf32>
    %267 = math.exp %266 : vector<2x1xf32>
    %cst_48 = arith.constant 1.000000e+00 : f32
    %268 = vector.broadcast %cst_48 : f32 to vector<2x1xf32>
    %269 = arith.addf %268, %267 : vector<2x1xf32>
    %cst_49 = arith.constant 1.000000e+00 : f32
    %270 = vector.broadcast %cst_49 : f32 to vector<2x1xf32>
    %271 = arith.divf %270, %269 : vector<2x1xf32>
    %c0_50 = arith.constant 0 : index
    %c0_51 = arith.constant 0 : index
    %272 = vector.load %arg12[%c0_50, %c0_51] : memref<2x1xf32, #tpu.memory_space<vmem>>, vector<2x1xf32>
    tpu.vector_store %arg12[%c0_50, %c0_51], %271 {strides = array<i32>} : memref<2x1xf32, #tpu.memory_space<vmem>>, vector<2x1xf32>,
    return
  }
}

</mosaic_0001>

<bundles_post_ra>
// kernel: discriminator_forward.1
= control target key start
LH: loop header
LB: loop body
LE: loop exit
PB: predicated region body
PF: predicated region fallthrough
CT: control target
= control target key end

     0   :  { %s8478_s0 = inlined_call_operand.vmem [shape: bf16[32,102], index: 0, kind: input, shape index: {}]   ;;  %s8479_s1 = inlined_call_operand.hbm [shape: bf16[102,512], index: 1, kind: input, shape index: {}]   ;;  %s8480_s2 = inlined_call_operand.vmem [shape: f32[1,32], index: 2, kind: input, shape index: {}]   ;;  %s8481_s3 = inlined_call_operand.vmem [shape: f32[1,32], index: 3, kind: input, shape index: {}]   ;;  %s8482_s4 = inlined_call_operand.vmem [shape: bf16[960,256], index: 4, kind: input, shape index: {}]   ;;  %s8483_s5 = inlined_call_operand.vmem [shape: f32[1,32], index: 5, kind: input, shape index: {}]   ;;  %s8484_s6 = inlined_call_operand.vmem [shape: f32[1,32], index: 6, kind: input, shape index: {}]   ;;  %s8485_s7 = inlined_call_operand.vmem [shape: bf16[576,128], index: 7, kind: input, shape index: {}]   ;;  %s8486_s8 = inlined_call_operand.vmem [shape: f32[1,32], index: 8, kind: input, shape index: {}]   ;;  %s8487_s9 = inlined_call_operand.vmem [shape: f32[1,32], index: 9, kind: input, shape index: {}]   ;;  %s8488_s10 = inlined_call_operand.vmem [shape: f32[512,1], index: 10, kind: input, shape index: {}]   ;;  %s8489_s11 = inlined_call_operand.<no memory space> [shape: f32[1,1], index: 11, kind: input, shape index: {}]   ;;  %s8490_s12 = inlined_call_operand.vmem [shape: f32[2,1], index: 12, kind: output, shape index: {}]  }
   0x1   :  { %v17_v0 = vstv %s8489_s11 }
   0x2   :  { %18 = vst [vmem:[#allocation2] sm:$0x1] %v17_v0 }
   0x3   :  { %19 = vsyncpa [#allocation4], 0  ;;  %s6164_s23 = smov [#allocation3]   ;;  %s6140_s27 = scalar_lea.hbm %s8479_s1, 3328 }
   0x4   :  { %s27_s24 = sshll.u32 %s6164_s23, 4  ;;  %p6141_p0 = scmp.ne.s32.totalorder %s8479_s1, %s6140_s27  ;;  %s28_s24 = int_to_ptr.vmem [resolvable:$true] %s27_s24 }
   0x5   :  { %p6144_p1 = scmp.lt.u32.totalorder %s6140_s27, %s8479_s1 }
   0x7   :  { %p6146_p2 = pnand %p6144_p1, %p6141_p0 }
   0x9   :  { %6149 = shalt.err (!%p6146_p2)
}
   0xa   :  { %s6150_s11 = scalar_lea.vmem %s28_s24, 3328  ;;  %p6155_p4 = scmp.lt.s32.totalorder %s28_s24, %s28_s24 }
   0xb   :  { %p6151_p3 = scmp.ne.s32.totalorder %s28_s24, %s6150_s11  ;;  %p6156_p5 = scmp.lt.s32.totalorder %s6150_s11, %s6150_s11 }
   0xd   :  { %p6157_p6 = por %p6156_p5, %p6155_p4 }
   0xf   :  { %p6158_p7 = pnand %p6157_p6, %p6151_p3 }
  0x11   :  { %6161 = shalt.err (!%p6158_p7)
}
  0x12   :  { %s6165_s14 = smov 256   ;;  %s6166_s15 = smov 16  }
  0x13   :  { %33 = dma.hbm_to_vmem [thread:$0]  %s8479_s1, 3328, %s28_s24, [#allocation4], %s6165_s14, %s6165_s14, %s6166_s15  }
  0x14   :  { %6162 = dma.done.wait [#allocation4], 3328  }
  0x15   :  { %6163 = vsyncadd [#allocation4], 4294963968  ;;  %v6167_v1 = vmov 0   ;;  %v5872_v2 = vld [vmem:[#allocation3 + $0x4] ss:$16 sps:$4 sm:$0xff]   ;;  %vm236_vm0 = vcmask 1042432  }
  0x16   :  { %281 = vmatprep.mubr.bf16.mxu0 %v6167_v1  ;;  %334 = vmatprep.mubr.bf16.mxu1 %v6167_v1  ;;  %v5874_v3 = vld [vmem:[#allocation3 + $0xc] ss:$16 sps:$4 sm:$0xff]   ;;  %v5876_v4 = vld [vmem:[#allocation3] ss:$16 sps:$4 sm:$0xff]   ;;  %v5877_v5 = vld [vmem:[#allocation3 + $0x8] ss:$16 sps:$4 sm:$0xff]  }
  0x17   :  { %249 = vmatprep.subr.bf16.mxu0 %v5872_v2  ;;  %302 = vmatprep.subr.bf16.mxu1 %v5874_v3  ;;  %v5878_v6 = vld [vmem:[#allocation3 + $0x24] ss:$16 sps:$4 sm:$0xff]   ;;  %v5880_v7 = vld [vmem:[#allocation3 + $0x2c] ss:$16 sps:$4 sm:$0xff]   ;;  %v5882_v8 = vld [vmem:[#allocation3 + $0x20] ss:$16 sps:$4 sm:$0xff]  }
  0x18   :  { %250 = vmatpush1.bf16.msra.mxu0 %v5876_v4  ;;  %303 = vmatpush1.bf16.msra.mxu1 %v5877_v5  ;;  %v5883_v9 = vld [vmem:[#allocation3 + $0x28] ss:$16 sps:$4 sm:$0xff]   ;;  %v5884_v10 = vld [vmem:[#allocation3 + $0x44] ss:$16 sps:$4 sm:$0xff]   ;;  %v5886_v11 = vld [vmem:[#allocation3 + $0x4c] ss:$16 sps:$4 sm:$0xff]  }
  0x19   :  { %251 = vmatprep.subr.bf16.mxu0 %v5878_v6  ;;  %304 = vmatprep.subr.bf16.mxu1 %v5880_v7  ;;  %v5888_v12 = vld [vmem:[#allocation3 + $0x40] ss:$16 sps:$4 sm:$0xff]   ;;  %v5889_v13 = vld [vmem:[#allocation3 + $0x48] ss:$16 sps:$4 sm:$0xff]   ;;  %v5890_v14 = vld [vmem:[#allocation3 + $0x64] ss:$16 sps:$4 sm:$0xff]  }
  0x1a   :  { %v5892_v15 = vld [vmem:[#allocation3 + $0x6c] ss:$16 sps:$4 sm:$0xff]   ;;  %v5894_v16 = vld [vmem:[#allocation3 + $0x60] ss:$16 sps:$4 sm:$0xff]   ;;  %v5895_v17 = vld [vmem:[#allocation3 + $0x68] ss:$16 sps:$4 sm:$0xff]  }
  0x1b   :  { %v5896_v18 = vld [vmem:[#allocation3 + $0x84] ss:$16 sps:$4 sm:$0xff]   ;;  %v5898_v19 = vld [vmem:[#allocation3 + $0x8c] ss:$16 sps:$4 sm:$0xff]   ;;  %v5900_v20 = vld [vmem:[#allocation3 + $0x80] ss:$16 sps:$4 sm:$0xff]  }
  0x1c   :  { %252 = vmatpush1.bf16.msra.mxu0 %v5882_v8  ;;  %305 = vmatpush1.bf16.msra.mxu1 %v5883_v9  ;;  %v5901_v21 = vld [vmem:[#allocation3 + $0x88] ss:$16 sps:$4 sm:$0xff]   ;;  %v5902_v22 = vld [vmem:[#allocation3 + $0xa4] ss:$16 sps:$4 sm:$0xff]   ;;  %v5904_v23 = vld [vmem:[#allocation3 + $0xac] ss:$16 sps:$4 sm:$0xff]  }
  0x1d   :  { %253 = vmatprep.subr.bf16.mxu0 %v5884_v10  ;;  %306 = vmatprep.subr.bf16.mxu1 %v5886_v11  ;;  %v87_v24 = vld [vmem:[#allocation3 + $0xc0] sm:$0x77]  ;;  %v5907_v26 = vld [vmem:[#allocation3 + $0xa8] ss:$16 sps:$4 sm:$0xff]   ;;  %vm229_vm1 = vcmask 834560   ;;  %s6169_s21 = smov 96  }
  0x1e   :  { %v5906_v25 = vld [vmem:[#allocation3 + $0xa0] ss:$16 sps:$4 sm:$0xff]   ;;  %v88_v27 = vld [vmem:[#allocation3 + $0xc8] sm:$0x77]  ;;  %v5465_v28 = vcombine.high %v87_v24, %v87_v24  ;;  %v5464_v30 = vcombine.low %v87_v24, %v87_v24  ;;  %s6170_s22 = smov 64   ;;  %vm578_vm2 = vcmask 261120  }
  0x1f   :  { %v5467_v29 = vcombine.high %v88_v27, %v88_v27  ;;  %v5466_v31 = vcombine.low %v88_v27, %v88_v27  ;;  %v5912_v34 = vld [vmem:[%s8478_s0] sm:$0xff]   ;;  %v5913_v35 = vld [vmem:[%s8478_s0 + $0x8] sm:$0xff]   ;;  %s6168_s0 = smov 32   ;;  %vm580_vm3 = vcmask 523264   ;;  %vm582_vm4 = vcmask 785408  }
  0x20   :  { %254 = vmatpush1.bf16.msra.mxu0 %v5888_v12  ;;  %307 = vmatpush1.bf16.msra.mxu1 %v5889_v13  ;;  %v238_v32 = vsel %vm236_vm0, %v5464_v30, 0  ;;  %vm1193_vm5 = vcmask 1040384   ;;  %vm2383_vm6 = vcmask 1042434   ;;  %vm2380_vm7 = vcmask 1041409  }
  0x21   :  { %255 = vmatprep.subr.bf16.mxu0 %v5890_v14  ;;  %308 = vmatprep.subr.bf16.mxu1 %v5892_v15  ;;  %v244_v33 = vsel %vm236_vm0, %v5466_v31, 0  ;;  %vm2386_vm8 = vcmask 1043459   ;;  %vm2389_vm9 = vcmask 1044484   ;;  %vm2392_vm10 = vcmask 1045509  }
  0x22   :  { %vm2395_vm11 = vcmask 1046534   ;;  %vm2398_vm12 = vcmask 1047559   ;;  %vm2723_vm13 = vsmask.f32 256  ;;  %vm2731_vm14 = vcmask 1044480  }
  0x23   :  { %vm2732_vm15 = vsmask.f32 4352 }
  0x24   :  { %256 = vmatpush1.bf16.msra.mxu0 %v5894_v16  ;;  %309 = vmatpush1.bf16.msra.mxu1 %v5895_v17 }
  0x25   :  { %257 = vmatprep.subr.bf16.mxu0 %v5896_v18  ;;  %310 = vmatprep.subr.bf16.mxu1 %v5898_v19 }
  0x28   :  { %258 = vmatpush1.bf16.msra.mxu0 %v5900_v20  ;;  %311 = vmatpush1.bf16.msra.mxu1 %v5901_v21 }
  0x29   :  { %259 = vmatprep.subr.bf16.mxu0 %v5902_v22  ;;  %312 = vmatprep.subr.bf16.mxu1 %v5904_v23 }
  0x2c   :  { %260 = vmatpush1.bf16.msra.mxu0 %v5906_v25  ;;  %313 = vmatpush1.bf16.msra.mxu1 %v5907_v26 }
  0x2d   :  { %5468 = vmatprep.subr.msk.bf16.mxu0 %vm236_vm0, %v5465_v28  ;;  %5471 = vmatprep.subr.msk.bf16.mxu1 %vm236_vm0, %v5467_v29 }
  0x30   :  { %262 = vmatpush1.bf16.msra.mxu0 %v238_v32  ;;  %315 = vmatpush1.bf16.msra.mxu1 %v244_v33 }
  0x33   :  { %5469 = vmatmul.mubr.msk.bf16.vlgmr.msra.gmra.mrb[0].mxu0 %vm229_vm1, %v5912_v34  ;;  %5472 = vmatmul.mubr.msk.bf16.vlgmr.msra.gmra.mrb[0].mxu1 %vm229_vm1, %v5912_v34 }
  0x34   :  { %291 = vmatprep.mubr.bf16.mxu0 %v6167_v1  ;;  %344 = vmatprep.mubr.bf16.mxu1 %v6167_v1 }
  0x3b   :  { %5470 = vmatmul.mubr.msk.bf16.gmra.mrb[4].mxu0 %vm229_vm1, %v5913_v35  ;;  %5473 = vmatmul.mubr.msk.bf16.gmra.mrb[4].mxu1 %vm229_vm1, %v5913_v35  ;;  %vm7548_vm1 = vmand %vm1193_vm5, %vm2723_vm13 }
 0x106   :  { %v6270_v36 = vpop.f32.mrb[0].mxu0  ;;  %v6272_v37 = vpop.f32.mrb[0].mxu1 }
 0x107   :  { %v6274_v38 = vpop.f32.mrb[1].mxu0  ;;  %v359_v39 = vmul.f32 %v6272_v37, %v6272_v37  ;;  %v6278_v40 = vpop.f32.mrb[1].mxu1  ;;  %v357_v41 = vmul.f32 %v6270_v36, %v6270_v36 }
 0x108   :  { %v358_v42 = vmul.f32 %v6274_v38, %v6274_v38  ;;  %v6284_v43 = vpop.f32.mrb[2].mxu0  ;;  %v360_v44 = vmul.f32 %v6278_v40, %v6278_v40  ;;  %v6288_v45 = vpop.f32.mrb[2].mxu1 }
 0x109   :  { %v361_v46 = vmul.f32 %v6284_v43, %v6284_v43  ;;  %v373_v47 = vadd.f32 %v6284_v43, %v6270_v36  ;;  %v6294_v48 = vpop.f32.mrb[3].mxu0  ;;  %v363_v49 = vmul.f32 %v6288_v45, %v6288_v45  ;;  %v391_v50 = vadd.f32 %v6288_v45, %v6272_v37  ;;  %v6300_v51 = vpop.f32.mrb[3].mxu1 }
 0x10a   :  { %v362_v52 = vmul.f32 %v6294_v48, %v6294_v48  ;;  %v382_v53 = vadd.f32 %v6294_v48, %v6274_v38  ;;  %v364_v54 = vmul.f32 %v6300_v51, %v6300_v51  ;;  %v400_v55 = vadd.f32 %v6300_v51, %v6278_v40 }
 0x10b   :  { %v409_v56 = vadd.f32 %v361_v46, %v357_v41  ;;  %v427_v57 = vadd.f32 %v363_v49, %v359_v39 }
 0x10c   :  { %v418_v58 = vadd.f32 %v362_v52, %v358_v42  ;;  %v436_v59 = vadd.f32 %v364_v54, %v360_v44 }
 0x10e   :  { %v6310_v60 = vpop.f32.mrb[4].mxu0  ;;  %v6312_v61 = vpop.f32.mrb[4].mxu1 }
 0x10f   :  { %v365_v62 = vmul.f32 %v6310_v60, %v6310_v60  ;;  %v374_v63 = vadd.f32 %v373_v47, %v6310_v60  ;;  %v367_v0 = vmul.f32 %v6312_v61, %v6312_v61  ;;  %v392_v1 = vadd.f32 %v391_v50, %v6312_v61  ;;  %v6320_v2 = vpop.f32.mrb[5].mxu0  ;;  %v6322_v3 = vpop.f32.mrb[5].mxu1 }
 0x110   :  { %v366_v4 = vmul.f32 %v6320_v2, %v6320_v2  ;;  %v383_v5 = vadd.f32 %v382_v53, %v6320_v2  ;;  %v368_v6 = vmul.f32 %v6322_v3, %v6322_v3  ;;  %v401_v7 = vadd.f32 %v400_v55, %v6322_v3  ;;  %v6330_v8 = vpop.f32.mrb[6].mxu0  ;;  %v6332_v9 = vpop.f32.mrb[6].mxu1 }
 0x111   :  { %v410_v10 = vadd.f32 %v409_v56, %v365_v62  ;;  %v428_v11 = vadd.f32 %v427_v57, %v367_v0  ;;  %v369_v12 = vmul.f32 %v6330_v8, %v6330_v8  ;;  %v375_v13 = vadd.f32 %v374_v63, %v6330_v8  ;;  %v6337_v14 = vpop.f32.mrb[7].mxu0  ;;  %v6339_v15 = vpop.f32.mrb[7].mxu1 }
 0x112   :  { %v419_v16 = vadd.f32 %v418_v58, %v366_v4  ;;  %v437_v17 = vadd.f32 %v436_v59, %v368_v6  ;;  %v371_v18 = vmul.f32 %v6332_v9, %v6332_v9  ;;  %v393_v19 = vadd.f32 %v392_v1, %v6332_v9 }
 0x113   :  { %v376_v20 = vrot.slane %v375_v13, 4  ;;  %v411_v21 = vadd.f32 %v410_v10, %v369_v12  ;;  %v370_v22 = vmul.f32 %v6337_v14, %v6337_v14  ;;  %v384_v23 = vadd.f32 %v383_v5, %v6337_v14 }
 0x114   :  { %v394_v24 = vrot.slane %v393_v19, 4  ;;  %v429_v25 = vadd.f32 %v428_v11, %v371_v18  ;;  %v372_v26 = vmul.f32 %v6339_v15, %v6339_v15  ;;  %v402_v27 = vadd.f32 %v401_v7, %v6339_v15 }
 0x115   :  { %v377_v28 = vadd.f32 %v376_v20, %v375_v13  ;;  %v385_v29 = vrot.slane %v384_v23, 4  ;;  %v420_v30 = vadd.f32 %v419_v16, %v370_v22  ;;  %v412_v41 = vrot.slane %v411_v21, 4 }
 0x116   :  { %v395_v31 = vadd.f32 %v394_v24, %v393_v19  ;;  %v438_v32 = vadd.f32 %v437_v17, %v372_v26  ;;  %v430_v47 = vrot.slane %v429_v25, 4  ;;  %v403_v6 = vrot.slane %v402_v27, 4 }
 0x117   :  { %v378_v33 = vrot.slane %v377_v28, 2  ;;  %v386_v34 = vadd.f32 %v385_v29, %v384_v23  ;;  %v413_v49 = vadd.f32 %v412_v41, %v411_v21  ;;  %v421_v54 = vrot.slane %v420_v30, 4 }
 0x118   :  { %v396_v35 = vrot.slane %v395_v31, 2  ;;  %v431_v56 = vadd.f32 %v430_v47, %v429_v25  ;;  %v404_v12 = vadd.f32 %v403_v6, %v402_v27  ;;  %v439_v13 = vrot.slane %v438_v32, 4 }
 0x119   :  { %v379_v39 = vadd.f32 %v378_v33, %v377_v28  ;;  %v387_v42 = vrot.slane %v386_v34, 2  ;;  %v414_v55 = vrot.slane %v413_v49, 2  ;;  %v422_v62 = vadd.f32 %v421_v54, %v420_v30 }
 0x11a   :  { %v397_v44 = vadd.f32 %v396_v35, %v395_v31  ;;  %v432_v59 = vrot.slane %v431_v56, 2  ;;  %v405_v18 = vrot.slane %v404_v12, 2  ;;  %v440_v19 = vadd.f32 %v439_v13, %v438_v32 }
 0x11b   :  { %v380_v46 = vrot.slane %v379_v39, 1  ;;  %v388_v50 = vadd.f32 %v387_v42, %v386_v34  ;;  %v415_v0 = vadd.f32 %v414_v55, %v413_v49  ;;  %v423_v1 = vrot.slane %v422_v62, 2 }
 0x11c   :  { %v398_v53 = vrot.slane %v397_v44, 1  ;;  %v433_v5 = vadd.f32 %v432_v59, %v431_v56  ;;  %v406_v21 = vadd.f32 %v405_v18, %v404_v12  ;;  %v441_v22 = vrot.slane %v440_v19, 2 }
 0x11d   :  { %v381_v52 = vadd.f32 %v380_v46, %v379_v39  ;;  %v389_v58 = vrot.slane %v388_v50, 1  ;;  %v416_v4 = vrot.slane %v415_v0, 1  ;;  %v424_v11 = vadd.f32 %v423_v1, %v422_v62 }
 0x11e   :  { %v6352_v57 = vadd.f32 %v398_v53, %v397_v44  ;;  %v434_v10 = vrot.slane %v433_v5, 1  ;;  %v407_v23 = vrot.slane %v406_v21, 1  ;;  %v442_v24 = vadd.f32 %v441_v22, %v440_v19 }
 0x11f   :  { %454 = vrot.lane.b32.xlu1 %v381_v52, %s6168_s0  ;;  %446 = vrot.lane.b32.xlu0 %v381_v52, %s6169_s21  ;;  %v390_v63 = vadd.f32 %v389_v58, %v388_v50  ;;  %v417_v7 = vadd.f32 %v416_v4, %v415_v0  ;;  %v425_v17 = vrot.slane %v424_v11, 1 }
 0x120   :  { %v435_v16 = vadd.f32 %v434_v10, %v433_v5  ;;  %v408_v25 = vadd.f32 %v407_v23, %v406_v21  ;;  %v443_v26 = vrot.slane %v442_v24, 1 }
 0x121   :  { %v426_v20 = vadd.f32 %v425_v17, %v424_v11 }
 0x122   :  { %v444_v27 = vadd.f32 %v443_v26, %v442_v24 }
 0x123   :  { %478 = vrot.lane.b32.xlu1 %v6352_v57, %s6170_s22  ;;  %450 = vrot.lane.b32.xlu0 %v381_v52, %s6170_s22 }
 0x127   :  { %474 = vrot.lane.b32.xlu0 %v6352_v57, %s6169_s21  ;;  %464 = vrot.lane.b32.xlu1 %v390_v63, %s6170_s22 }
 0x12b   :  { %468 = vrot.lane.b32.xlu1 %v390_v63, %s6168_s0  ;;  %460 = vrot.lane.b32.xlu0 %v390_v63, %s6169_s21 }
 0x12f   :  { %502 = vrot.lane.b32.xlu1 %v417_v7, %s6169_s21  ;;  %506 = vrot.lane.b32.xlu0 %v417_v7, %s6170_s22 }
 0x133   :  { %510 = vrot.lane.b32.xlu1 %v417_v7, %s6168_s0  ;;  %530 = vrot.lane.b32.xlu0 %v435_v16, %s6169_s21 }
 0x137   :  { %482 = vrot.lane.b32.xlu1 %v6352_v57, %s6168_s0  ;;  %516 = vrot.lane.b32.xlu0 %v426_v20, %s6169_s21 }
 0x13b   :  { %524 = vrot.lane.b32.xlu1 %v426_v20, %s6168_s0  ;;  %520 = vrot.lane.b32.xlu0 %v426_v20, %s6170_s22 }
 0x13f   :  { %538 = vrot.lane.b32.xlu1 %v435_v16, %s6168_s0  ;;  %534 = vrot.lane.b32.xlu0 %v435_v16, %s6170_s22 }
 0x143   :  { %492 = vrot.lane.b32.xlu1 %v408_v25, %s6170_s22  ;;  %488 = vrot.lane.b32.xlu0 %v408_v25, %s6169_s21 }
 0x147   :  { %496 = vrot.lane.b32.xlu1 %v408_v25, %s6168_s0  ;;  %544 = vrot.lane.b32.xlu0 %v444_v27, %s6169_s21 }
 0x14b   :  { %552 = vrot.lane.b32.xlu1 %v444_v27, %s6168_s0  ;;  %548 = vrot.lane.b32.xlu0 %v444_v27, %s6170_s22 }
 0x191   :  { %v455_v28 = vpop.permute.xlu1 %454  ;;  %v447_v29 = vpop.permute.xlu0 %446 }
 0x192   :  { %v449_v30 = vadd.f32 %v447_v29, %v381_v52 }
 0x195   :  { %v479_v31 = vpop.permute.xlu1 %478  ;;  %v451_v32 = vpop.permute.xlu0 %450 }
 0x196   :  { %v453_v33 = vadd.f32 %v451_v32, %v449_v30 }
 0x198   :  { %v457_v34 = vadd.f32 %v455_v28, %v453_v33 }
 0x199   :  { %v475_v35 = vpop.permute.xlu0 %474  ;;  %v465_v39 = vpop.permute.xlu1 %464 }
 0x19a   :  { %v458_v41 = vadd.f32 %v457_v34, %v390_v63 }
 0x19d   :  { %v469_v42 = vpop.permute.xlu1 %468  ;;  %v461_v44 = vpop.permute.xlu0 %460 }
 0x19e   :  { %v463_v46 = vadd.f32 %v461_v44, %v458_v41 }
 0x1a0   :  { %v467_v47 = vadd.f32 %v465_v39, %v463_v46  ;;  %v565_v46 = vlaneseq }
 0x1a1   :  { %v503_v49 = vpop.permute.xlu1 %502  ;;  %v507_v50 = vpop.permute.xlu0 %506 }
 0x1a2   :  { %v471_v53 = vadd.f32 %v469_v42, %v467_v47  ;;  %v505_v54 = vadd.f32 %v503_v49, %v417_v7  ;;  %v6380_v47 = vshrl.u32 %v565_v46, 7  ;;  %v355_v49 = vld [vmem:[%s8480_s2] sm:$0x1] }
 0x1a4   :  { %v509_v55 = vadd.f32 %v507_v50, %v505_v54  ;;  %v472_v56 = vadd.f32 %v471_v53, %v6352_v57  ;;  %8534 = vst [vmem:[#allocation6_spill] sm:$0xff] %v6380_v47  ;;  %v356_v54 = vld [vmem:[%s8481_s3] sm:$0x1] }
 0x1a5   :  { %v511_v58 = vpop.permute.xlu1 %510  ;;  %v531_v52 = vpop.permute.xlu0 %530 }
 0x1a6   :  { %v513_v59 = vadd.f32 %v511_v58, %v509_v55  ;;  %v477_v62 = vadd.f32 %v475_v35, %v472_v56 }
 0x1a8   :  { %v514_v0 = vadd.f32 %v513_v59, %v426_v20  ;;  %v481_v5 = vadd.f32 %v479_v31, %v477_v62  ;;  %v6171_v59 = vmov 1966171168  }
 0x1a9   :  { %v483_v1 = vpop.permute.xlu1 %482  ;;  %v517_v4 = vpop.permute.xlu0 %516  ;;  %v678_v62 = vunpack.c.l.s4 %v6171_v59 }
 0x1aa   :  { %v519_v63 = vadd.f32 %v517_v4, %v514_v0  ;;  %v485_v12 = vadd.f32 %v483_v1, %v481_v5 }
 0x1ab   :  { %v679_v5 = vunpack.c.0.s8 %v678_v62 }
 0x1ac   :  { %v486_v21 = vadd.f32 %v485_v12, %v408_v25 }
 0x1ad   :  { %v525_v6 = vpop.permute.xlu1 %524  ;;  %v521_v10 = vpop.permute.xlu0 %520 }
 0x1ae   :  { %v523_v11 = vadd.f32 %v521_v10, %v519_v63 }
 0x1b0   :  { %v527_v13 = vadd.f32 %v525_v6, %v523_v11 }
 0x1b1   :  { %v539_v17 = vpop.permute.xlu1 %538  ;;  %v535_v18 = vpop.permute.xlu0 %534 }
 0x1b2   :  { %v528_v7 = vadd.f32 %v527_v13, %v435_v16  ;;  %v6404_v13 = vsub.s32 %v679_v5, %v6380_v47 }
 0x1b4   :  { %v533_v19 = vadd.f32 %v531_v52, %v528_v7  ;;  %8536 = vst [vmem:[#allocation8_spill] sm:$0xff] %v6404_v13 }
 0x1b5   :  { %v493_v57 = vpop.permute.xlu1 %492  ;;  %v489_v22 = vpop.permute.xlu0 %488 }
 0x1b6   :  { %v537_v23 = vadd.f32 %v535_v18, %v533_v19  ;;  %v491_v24 = vadd.f32 %v489_v22, %v486_v21 }
 0x1b8   :  { %v541_v26 = vadd.f32 %v539_v17, %v537_v23  ;;  %v495_v20 = vadd.f32 %v493_v57, %v491_v24 }
 0x1b9   :  { %v497_v28 = vpop.permute.xlu1 %496  ;;  %v545_v29 = vpop.permute.xlu0 %544 }
 0x1ba   :  { %v499_v30 = vadd.f32 %v497_v28, %v495_v20  ;;  %v542_v31 = vadd.f32 %v541_v26, %v444_v27  ;;  %v6386_v27 = vsub.s32 0, %v6380_v47 }
 0x1bc   :  { %v547_v32 = vadd.f32 %v545_v29, %v542_v31  ;;  %v500_v34 = vmul.f32 0.001953125, %v499_v30  ;;  %8535 = vst [vmem:[#allocation7_spill] sm:$0xff] %v6386_v27 }
 0x1bd   :  { %v549_v33 = vpop.permute.xlu0 %548  ;;  %v553_v39 = vpop.permute.xlu1 %552 }
 0x1be   :  { %v551_v35 = vadd.f32 %v549_v33, %v547_v32  ;;  %v557_v42 = vmul.f32 %v500_v34, %v500_v34 }
 0x1c0   :  { %v555_v41 = vadd.f32 %v553_v39, %v551_v35 }
 0x1c2   :  { %v556_v16 = vmul.f32 0.001953125, %v555_v41 }
 0x1c4   :  { %v558_v44 = vsub.f32 %v556_v16, %v557_v42 }
 0x1c6   :  { %v559_v25 = vadd.f32 1e-05, %v558_v44 }
 0x1c8   :  { %6130 = vrsqrt.f32 %v559_v25 }
 0x1d2   :  { %v6131_v50 = vpop.eup %6130 }
 0x1d3   :  { %v561_v53 = vmul.f32 %v6131_v50, %v355_v49 }
 0x1d5   :  { %v568_v55 = vrot.slane %v561_v53, %v6386_v27  ;;  %v562_v56 = vmul.f32 %v561_v53, %v500_v34 }
 0x1d7   :  { %572 = vrot.lane.b32.xlu1 %v568_v55, %s6170_s22  ;;  %569 = vrot.lane.b32.xlu0 %v568_v55, %s6168_s0  ;;  %v563_v58 = vsub.f32 %v356_v54, %v562_v56 }
 0x1d9   :  { %v588_v52 = vrot.slane %v563_v58, %v6386_v27 }
 0x1db   :  { %575 = vrot.lane.b32.xlu0 %v568_v55, %s6169_s21  ;;  %589 = vrot.lane.b32.xlu1 %v588_v52, %s6168_s0 }
 0x1df   :  { %592 = vrot.lane.b32.xlu0 %v588_v52, %s6170_s22  ;;  %595 = vrot.lane.b32.xlu1 %v588_v52, %s6169_s21 }
 0x249   :  { %v573_v0 = vpop.permute.xlu1 %572  ;;  %v570_v1 = vpop.permute.xlu0 %569 }
 0x24a   :  { %v579_v4 = vsel %vm578_vm2, %v561_v53, %v570_v1 }
 0x24b   :  { %v581_v63 = vsel %vm580_vm3, %v579_v4, %v573_v0 }
 0x24d   :  { %v576_v6 = vpop.permute.xlu0 %575  ;;  %v590_v10 = vpop.permute.xlu1 %589 }
 0x24e   :  { %v583_v11 = vsel %vm582_vm4, %v581_v63, %v576_v6  ;;  %v598_v17 = vsel %vm578_vm2, %v563_v58, %v590_v10 }
 0x24f   :  { %v604_v12 = vrot.slane %v583_v11, %v6386_v27 }
 0x251   :  { %v593_v18 = vpop.permute.xlu0 %592  ;;  %v596_v7 = vpop.permute.xlu1 %595  ;;  %v613_v19 = vmul.f32 %v604_v12, %v6310_v60  ;;  %v614_v21 = vmul.f32 %v604_v12, %v6320_v2  ;;  %v615_v57 = vmul.f32 %v604_v12, %v6312_v61  ;;  %v616_v23 = vmul.f32 %v604_v12, %v6322_v3 }
 0x252   :  { %v599_v22 = vsel %vm580_vm3, %v598_v17, %v593_v18  ;;  %v605_v24 = vmul.f32 %v604_v12, %v6270_v36  ;;  %v606_v26 = vmul.f32 %v604_v12, %v6274_v38  ;;  %v607_v28 = vmul.f32 %v604_v12, %v6272_v37 }
 0x253   :  { %v600_v20 = vsel %vm582_vm4, %v599_v22, %v596_v7  ;;  %v608_v29 = vmul.f32 %v604_v12, %v6278_v40  ;;  %v617_v60 = vmul.f32 %v604_v12, %v6330_v8  ;;  %v618_v61 = vmul.f32 %v604_v12, %v6337_v14 }
 0x254   :  { %v624_v2 = vrot.slane %v600_v20, %v6386_v27  ;;  %v619_v30 = vmul.f32 %v604_v12, %v6332_v9  ;;  %v620_v3 = vmul.f32 %v604_v12, %v6339_v15  ;;  %v609_v36 = vmul.f32 %v604_v12, %v6284_v43 }
 0x255   :  { %v610_v38 = vmul.f32 %v604_v12, %v6294_v48  ;;  %v611_v31 = vmul.f32 %v604_v12, %v6288_v45  ;;  %v612_v37 = vmul.f32 %v604_v12, %v6300_v51 }
 0x256   :  { %v633_v32 = vadd.f32 %v624_v2, %v613_v19  ;;  %v634_v40 = vadd.f32 %v624_v2, %v614_v21  ;;  %v635_v33 = vadd.f32 %v624_v2, %v615_v57  ;;  %v636_v8 = vadd.f32 %v624_v2, %v616_v23 }
 0x257   :  { %v625_v34 = vadd.f32 %v624_v2, %v605_v24  ;;  %v626_v35 = vadd.f32 %v624_v2, %v606_v26  ;;  %v627_v39 = vadd.f32 %v624_v2, %v607_v28  ;;  %v628_v14 = vadd.f32 %v624_v2, %v608_v29 }
 0x258   :  { %v649_v41 = vmax.f32 %v633_v32, 0.0  ;;  %v650_v9 = vmax.f32 %v634_v40, 0.0  ;;  %v651_v42 = vmax.f32 %v635_v33, 0.0  ;;  %v652_v15 = vmax.f32 %v636_v8, 0.0 }
 0x259   :  { %v641_v16 = vmax.f32 %v625_v34, 0.0  ;;  %v642_v43 = vmax.f32 %v626_v35, 0.0  ;;  %v643_v44 = vmax.f32 %v627_v39, 0.0  ;;  %v644_v48 = vmax.f32 %v628_v14, 0.0 }
 0x25a   :  { %v5478_v25 = vpack.c.bf16 %v650_v9, %v649_v41  ;;  %v5480_v45 = vpack.c.bf16 %v652_v15, %v651_v42  ;;  %v637_v46 = vadd.f32 %v624_v2, %v617_v60  ;;  %v638_v51 = vadd.f32 %v624_v2, %v618_v61 }
 0x25b   :  { %v5474_v49 = vpack.c.bf16 %v642_v43, %v641_v16  ;;  %v5476_v50 = vpack.c.bf16 %v644_v48, %v643_v44  ;;  %v639_v53 = vadd.f32 %v624_v2, %v619_v30  ;;  %v640_v54 = vadd.f32 %v624_v2, %v620_v3 }
 0x25c   :  { %v751_v55 = vrot.slane %v5478_v25, %v6404_v13  ;;  %v765_v56 = vrot.slane %v5480_v45, %v6404_v13  ;;  %v653_v58 = vmax.f32 %v637_v46, 0.0  ;;  %v654_v52 = vmax.f32 %v638_v51, 0.0 }
 0x25d   :  { %v683_v59 = vrot.slane %v5474_v49, %v6404_v13  ;;  %v697_v62 = vrot.slane %v5476_v50, %v6404_v13  ;;  %v655_v0 = vmax.f32 %v639_v53, 0.0  ;;  %v656_v1 = vmax.f32 %v640_v54, 0.0 }
 0x25e   :  { %v774_v4 = vcombine.high %v751_v55, %v765_v56  ;;  %v5479_v5 = vpack.c.bf16 %v654_v52, %v653_v58  ;;  %v773_v63 = vcombine.low %v751_v55, %v765_v56  ;;  %v629_v6 = vadd.f32 %v624_v2, %v609_v36 }
 0x25f   :  { %v706_v10 = vcombine.high %v683_v59, %v697_v62  ;;  %v5481_v11 = vpack.c.bf16 %v656_v1, %v655_v0  ;;  %v705_v12 = vcombine.low %v683_v59, %v697_v62  ;;  %v630_v17 = vadd.f32 %v624_v2, %v610_v38 }
 0x260   :  { %v6431_v18 = vrot.slane %v774_v4, %v6404_v13  ;;  %v758_v7 = vrot.slane %v5479_v5, %v6404_v13  ;;  %v6435_v19 = vrot.slane %v773_v63, %v6404_v13  ;;  %v6437_v21 = vadd.f32 %v624_v2, %v611_v31 }
 0x261   :  { %v6440_v57 = vrot.slane %v706_v10, %v6404_v13  ;;  %v772_v22 = vrot.slane %v5481_v11, %v6404_v13  ;;  %v6444_v23 = vrot.slane %v705_v12, %v6404_v13  ;;  %v632_v24 = vadd.f32 %v624_v2, %v612_v37 }
 0x262   :  { %v6448_v26 = vrot.slane %v6431_v18, %v6404_v13  ;;  %v6452_v20 = vrot.slane %v6435_v19, %v6404_v13  ;;  %v645_v28 = vmax.f32 %v629_v6, 0.0  ;;  %v646_v29 = vmax.f32 %v630_v17, 0.0 }
 0x263   :  { %v6456_v60 = vrot.slane %v6440_v57, %v6404_v13  ;;  %v775_v61 = vcombine.low %v758_v7, %v772_v22  ;;  %v6460_v30 = vrot.slane %v6444_v23, %v6404_v13  ;;  %v776_v2 = vcombine.high %v758_v7, %v772_v22 }
 0x264   :  { %v1039_v3 = vrot.slane %v6448_v26, %v6404_v13  ;;  %v6466_v36 = vrot.slane %v6452_v20, %v6404_v13  ;;  %v647_v38 = vmax.f32 %v6437_v21, 0.0  ;;  %v648_v31 = vmax.f32 %v632_v24, 0.0 }
 0x265   :  { %v6471_v37 = vrot.slane %v6456_v60, %v6404_v13  ;;  %v6474_v32 = vrot.slane %v775_v61, %v6404_v13  ;;  %v6478_v40 = vrot.slane %v6460_v30, %v6404_v13  ;;  %v6481_v33 = vrot.slane %v776_v2, %v6404_v13 }
 0x266   :  { %v1664_v8 = vsel %vm1193_vm5, %v1039_v3, 4286644096  ;;  %v1612_v34 = vsel %vm1193_vm5, %v6466_v36, 4286644096  ;;  %v1047_v35 = vcombine.high %v1039_v3, %v1039_v3  ;;  %v5475_v39 = vpack.c.bf16 %v646_v29, %v645_v28 }
 0x267   :  { %v1666_v14 = vunpack.i.l.bf16 %v1664_v8  ;;  %v1667_v41 = vunpack.i.h.bf16 %v1664_v8  ;;  %v1248_v9 = vsel %vm1193_vm5, %v6471_v37, 4286644096  ;;  %v6490_v42 = vrot.slane %v6474_v32, %v6404_v13 }
 0x268   :  { %v1250_v15 = vunpack.i.l.bf16 %v1248_v9  ;;  %v1251_v16 = vunpack.i.h.bf16 %v1248_v9  ;;  %v1196_v43 = vsel %vm1193_vm5, %v6478_v40, 4286644096  ;;  %v6496_v44 = vrot.slane %v6481_v33, %v6404_v13 }
 0x269   :  { %v1668_v48 = vmax.f32 %v1666_v14, %v1667_v41  ;;  %v6500_v25 = vrot.slane %v6490_v42, %v6404_v13  ;;  %v1198_v45 = vunpack.i.l.bf16 %v1196_v43  ;;  %v1199_v46 = vunpack.i.h.bf16 %v1196_v43 }
 0x26a   :  { %v1252_v51 = vmax.f32 %v1250_v15, %v1251_v16  ;;  %v6504_v49 = vrot.slane %v6496_v44, %v6404_v13  ;;  %v1614_v50 = vunpack.i.l.bf16 %v1612_v34  ;;  %v1615_v53 = vunpack.i.h.bf16 %v1612_v34 }
 0x26b   :  { %v1669_v54 = vrot.slane %v1668_v48, 4  ;;  %v1820_v55 = vsel %vm1193_vm5, %v6500_v25, 4286644096  ;;  %v1200_v56 = vmax.f32 %v1198_v45, %v1199_v46  ;;  %v1690_v58 = vsel %vm1193_vm5, %v1047_v35, 4286644096 }
 0x26c   :  { %v1253_v52 = vrot.slane %v1252_v51, 4  ;;  %v1822_v59 = vunpack.i.l.bf16 %v1820_v55  ;;  %v1823_v62 = vunpack.i.h.bf16 %v1820_v55  ;;  %v1872_v0 = vsel %vm1193_vm5, %v6504_v49, 4286644096 }
 0x26d   :  { %v1670_v1 = vmax.f32 %v1668_v48, %v1669_v54  ;;  %v1201_v4 = vrot.slane %v1200_v56, 4  ;;  %v1874_v5 = vunpack.i.l.bf16 %v1872_v0  ;;  %v1875_v63 = vunpack.i.h.bf16 %v1872_v0 }
 0x26e   :  { %v1254_v6 = vmax.f32 %v1252_v51, %v1253_v52  ;;  %v1824_v10 = vmax.f32 %v1822_v59, %v1823_v62  ;;  %v1616_v11 = vmax.f32 %v1614_v50, %v1615_v53  ;;  %v1692_v12 = vunpack.i.l.bf16 %v1690_v58 }
 0x26f   :  { %v1671_v17 = vrot.slane %v1670_v1, 2  ;;  %v1202_v7 = vmax.f32 %v1200_v56, %v1201_v4  ;;  %v1876_v21 = vmax.f32 %v1874_v5, %v1875_v63  ;;  %v1693_v22 = vunpack.i.h.bf16 %v1690_v58 }
 0x270   :  { %v1255_v24 = vrot.slane %v1254_v6, 2  ;;  %v1825_v28 = vrot.slane %v1824_v10, 4  ;;  %v1617_v29 = vrot.slane %v1616_v11, 4  ;;  %v5477_v61 = vpack.c.bf16 %v648_v31, %v647_v38 }
 0x271   :  { %v1672_v2 = vmax.f32 %v1670_v1, %v1671_v17  ;;  %v1203_v3 = vrot.slane %v1202_v7, 2  ;;  %v1877_v8 = vrot.slane %v1876_v21, 4  ;;  %v1694_v34 = vmax.f32 %v1692_v12, %v1693_v22 }
 0x272   :  { %v1256_v35 = vmax.f32 %v1254_v6, %v1255_v24  ;;  %v1826_v14 = vmax.f32 %v1824_v10, %v1825_v28  ;;  %v1618_v41 = vmax.f32 %v1616_v11, %v1617_v29  ;;  %v690_v9 = vrot.slane %v5475_v39, %v6404_v13 }
 0x273   :  { %v1673_v15 = vrot.slane %v1672_v2, 1  ;;  %v1204_v16 = vmax.f32 %v1202_v7, %v1203_v3  ;;  %v1878_v43 = vmax.f32 %v1876_v21, %v1877_v8  ;;  %v1695_v48 = vrot.slane %v1694_v34, 4 }
 0x274   :  { %v1257_v45 = vrot.slane %v1256_v35, 1  ;;  %v1827_v46 = vrot.slane %v1826_v14, 2  ;;  %v1619_v51 = vrot.slane %v1618_v41, 2  ;;  %v704_v50 = vrot.slane %v5477_v61, %v6404_v13 }
 0x275   :  { %v1674_v53 = vmax.f32 %v1672_v2, %v1673_v15  ;;  %v1205_v38 = vrot.slane %v1204_v16, 1  ;;  %v1879_v31 = vrot.slane %v1878_v43, 2  ;;  %v1696_v54 = vmax.f32 %v1694_v34, %v1695_v48 }
 0x276   :  { %v1258_v55 = vmax.f32 %v1256_v35, %v1257_v45  ;;  %v1828_v56 = vmax.f32 %v1826_v14, %v1827_v46  ;;  %v1620_v58 = vmax.f32 %v1618_v41, %v1619_v51  ;;  %v707_v52 = vcombine.low %v690_v9, %v704_v50 }
 0x277   :  { %v6513_v59 = vpack.i.bf16 %v1674_v53, %v1674_v53  ;;  %v1206_v39 = vmax.f32 %v1204_v16, %v1205_v38  ;;  %v1880_v62 = vmax.f32 %v1878_v43, %v1879_v31  ;;  %v1697_v0 = vrot.slane %v1696_v54, 2 }
 0x278   :  { %v6515_v1 = vpack.i.bf16 %v1258_v55, %v1258_v55  ;;  %v1829_v4 = vrot.slane %v1828_v56, 1  ;;  %v1621_v5 = vrot.slane %v1620_v58, 1  ;;  %v6518_v63 = vrot.slane %v707_v52, %v6404_v13 }
 0x279   :  { %2061 = vrot.lane.b32.xlu1 %v6513_v59, %s6169_s21  ;;  %v6522_v6 = vpack.i.bf16 %v1206_v39, %v1206_v39  ;;  %v1881_v10 = vrot.slane %v1880_v62, 1  ;;  %v1698_v11 = vmax.f32 %v1696_v54, %v1697_v0  ;;  %v805_v12 = vcombine.high %v6435_v19, %v6435_v19 }
 0x27a   :  { %2045 = vrot.lane.b32.xlu0 %v6515_v1, %s6169_s21  ;;  %v1830_v17 = vmax.f32 %v1828_v56, %v1829_v4  ;;  %v1622_v7 = vmax.f32 %v1620_v58, %v1621_v5  ;;  %v6530_v21 = vrot.slane %v6518_v63, %v6404_v13  ;;  %v708_v22 = vcombine.high %v690_v9, %v704_v50 }
 0x27b   :  { %v1882_v24 = vmax.f32 %v1880_v62, %v1881_v10  ;;  %v1699_v28 = vrot.slane %v1698_v11, 1  ;;  %v6533_v29 = vrot.slane %v805_v12, %v6404_v13  ;;  %v1032_v61 = vcombine.high %v6448_v26, %v6448_v26 }
 0x27c   :  { %v6537_v2 = vpack.i.bf16 %v1830_v17, %v1830_v17  ;;  %v6539_v19 = vpack.i.bf16 %v1622_v7, %v1622_v7  ;;  %v6543_v3 = vrot.slane %v6530_v21, %v6404_v13  ;;  %v6546_v8 = vrot.slane %v708_v22, %v6404_v13 }
 0x27d   :  { %v6548_v34 = vpack.i.bf16 %v1882_v24, %v1882_v24  ;;  %v1700_v35 = vmax.f32 %v1698_v11, %v1699_v28  ;;  %v6552_v14 = vrot.slane %v6533_v29, %v6404_v13  ;;  %v6555_v26 = vrot.slane %v1032_v61, %v6404_v13 }
 0x27e   :  { %2067 = vrot.lane.b32.xlu1 %v6537_v2, %s6169_s21  ;;  %2043 = vrot.lane.b32.xlu0 %v6522_v6, %s6169_s21  ;;  %v1404_v41 = vsel %vm1193_vm5, %v6543_v3, 4286644096  ;;  %v6565_v9 = vrot.slane %v6546_v8, %v6404_v13  ;;  %v855_v15 = vcombine.high %v6471_v37, %v6471_v37  ;;  %v739_v16 = vcombine.high %v6440_v57, %v6440_v57 }
 0x27f   :  { %v6571_v43 = vpack.i.bf16 %v1700_v35, %v1700_v35  ;;  %v1406_v48 = vunpack.i.l.bf16 %v1404_v41  ;;  %v1407_v45 = vunpack.i.h.bf16 %v1404_v41  ;;  %v1716_v46 = vsel %vm1193_vm5, %v6552_v14, 4286644096 }
 0x280   :  { %v1718_v51 = vunpack.i.l.bf16 %v1716_v46  ;;  %v1719_v50 = vunpack.i.h.bf16 %v1716_v46  ;;  %v6577_v53 = vrot.slane %v6565_v9, %v6404_v13  ;;  %v1677_v38 = vsel %vm1193_vm5, %v6555_v26, 4286644096 }
 0x281   :  { %8537 = vst [vmem:[#allocation9_spill] sm:$0xff] %v6571_v43  ;;  %v1408_v37 = vmax.f32 %v1406_v48, %v1407_v45  ;;  %v1679_v31 = vunpack.i.l.bf16 %v1677_v38  ;;  %v1680_v54 = vunpack.i.h.bf16 %v1677_v38  ;;  %v1274_v57 = vsel %vm1193_vm5, %v855_v15, 4286644096 }
 0x282   :  { %2069 = vrot.lane.b32.xlu1 %v6548_v34, %s6169_s21  ;;  %2059 = vrot.lane.b32.xlu0 %v6539_v19, %s6169_s21  ;;  %v1720_v55 = vmax.f32 %v1718_v51, %v1719_v50  ;;  %v1456_v56 = vsel %vm1193_vm5, %v6577_v53, 4286644096  ;;  %v1276_v58 = vunpack.i.l.bf16 %v1274_v57  ;;  %v1277_v52 = vunpack.i.h.bf16 %v1274_v57 }
 0x283   :  { %v1409_v39 = vrot.slane %v1408_v37, 4  ;;  %v1458_v62 = vunpack.i.l.bf16 %v1456_v56  ;;  %v1459_v0 = vunpack.i.h.bf16 %v1456_v56  ;;  %v1681_v4 = vmax.f32 %v1679_v31, %v1680_v54 }
 0x284   :  { %v1721_v5 = vrot.slane %v1720_v55, 4  ;;  %v1278_v10 = vmax.f32 %v1276_v58, %v1277_v52  ;;  %v6589_v11 = vrot.slane %v739_v16, %v6404_v13  ;;  %v737_v12 = vcombine.high %v6444_v23, %v6444_v23 }
 0x285   :  { %v1410_v17 = vmax.f32 %v1408_v37, %v1409_v39  ;;  %v1460_v7 = vmax.f32 %v1458_v62, %v1459_v0  ;;  %v1682_v22 = vrot.slane %v1681_v4, 4  ;;  %v807_v24 = vcombine.high %v6431_v18, %v6431_v18 }
 0x286   :  { %2221 = vrot.lane.b32.xlu1 %v6571_v43, %s6169_s21  ;;  %v1722_v28 = vmax.f32 %v1720_v55, %v1721_v5  ;;  %v1279_v61 = vrot.slane %v1278_v10, 4  ;;  %v6599_v35 = vrot.slane %v6589_v11, %v6404_v13  ;;  %v6602_v41 = vrot.slane %v737_v12, %v6404_v13 }
 0x287   :  { %v1411_v15 = vrot.slane %v1410_v17, 2  ;;  %v1461_v23 = vrot.slane %v1460_v7, 4  ;;  %v1683_v16 = vmax.f32 %v1681_v4, %v1682_v22  ;;  %v6605_v48 = vrot.slane %v807_v24, %v6404_v13 }
 0x288   :  { %v1723_v45 = vrot.slane %v1722_v28, 2  ;;  %v1280_v18 = vmax.f32 %v1278_v10, %v1279_v61  ;;  %v1352_v46 = vsel %vm1193_vm5, %v6599_v35, 4286644096  ;;  %v6611_v51 = vrot.slane %v6602_v41, %v6404_v13 }
 0x289   :  { %v1412_v50 = vmax.f32 %v1410_v17, %v1411_v15  ;;  %v1462_v38 = vmax.f32 %v1460_v7, %v1461_v23  ;;  %v1684_v37 = vrot.slane %v1683_v16, 2  ;;  %v1354_v31 = vunpack.i.l.bf16 %v1352_v46 }
 0x28a   :  { %v1724_v54 = vmax.f32 %v1722_v28, %v1723_v45  ;;  %v1281_v57 = vrot.slane %v1280_v18, 2  ;;  %v1355_v55 = vunpack.i.h.bf16 %v1352_v46  ;;  %v1300_v56 = vsel %vm1193_vm5, %v6611_v51, 4286644096 }
 0x28b   :  { %v1413_v58 = vrot.slane %v1412_v50, 1  ;;  %v1463_v52 = vrot.slane %v1462_v38, 2  ;;  %v1685_v39 = vmax.f32 %v1683_v16, %v1684_v37  ;;  %v1302_v62 = vunpack.i.l.bf16 %v1300_v56 }
 0x28c   :  { %v1725_v0 = vrot.slane %v1724_v54, 1  ;;  %v1282_v4 = vmax.f32 %v1280_v18, %v1281_v57  ;;  %v1356_v5 = vmax.f32 %v1354_v31, %v1355_v55  ;;  %v1303_v10 = vunpack.i.h.bf16 %v1300_v56 }
 0x28d   :  { %v1414_v12 = vmax.f32 %v1412_v50, %v1413_v58  ;;  %v1464_v22 = vmax.f32 %v1462_v38, %v1463_v52  ;;  %v1686_v17 = vrot.slane %v1685_v39, 1  ;;  %v6617_v7 = vrot.slane %v6605_v48, %v6404_v13 }
 0x28e   :  { %v1726_v24 = vmax.f32 %v1724_v54, %v1725_v0  ;;  %v1283_v28 = vrot.slane %v1282_v4, 1  ;;  %v1357_v61 = vrot.slane %v1356_v5, 4  ;;  %v1304_v15 = vmax.f32 %v1302_v62, %v1303_v10 }
 0x28f   :  { %v6619_v23 = vpack.i.bf16 %v1414_v12, %v1414_v12  ;;  %v1465_v45 = vrot.slane %v1464_v22, 1  ;;  %v1687_v16 = vmax.f32 %v1685_v39, %v1686_v17  ;;  %v1768_v18 = vsel %vm1193_vm5, %v6617_v7, 4286644096 }
 0x290   :  { %v6623_v46 = vpack.i.bf16 %v1726_v24, %v1726_v24  ;;  %v1284_v50 = vmax.f32 %v1282_v4, %v1283_v28  ;;  %v1358_v38 = vmax.f32 %v1356_v5, %v1357_v61  ;;  %v1305_v37 = vrot.slane %v1304_v15, 4 }
 0x291   :  { %2051 = vrot.lane.b32.xlu0 %v6619_v23, %s6169_s21  ;;  %v1466_v31 = vmax.f32 %v1464_v22, %v1465_v45  ;;  %v6627_v54 = vpack.i.bf16 %v1687_v16, %v1687_v16  ;;  %v1770_v57 = vunpack.i.l.bf16 %v1768_v18  ;;  %v1771_v55 = vunpack.i.h.bf16 %v1768_v18 }
 0x292   :  { %2063 = vrot.lane.b32.xlu1 %v6623_v46, %s6169_s21  ;;  %v6631_v56 = vpack.i.bf16 %v1284_v50, %v1284_v50  ;;  %v1359_v58 = vrot.slane %v1358_v38, 2  ;;  %v1306_v52 = vmax.f32 %v1304_v15, %v1305_v37  ;;  %v840_v39 = vcombine.high %v6456_v60, %v6456_v60 }
 0x293   :  { %8538 = vst [vmem:[#allocation10_spill] sm:$0xff] %v6627_v54  ;;  %v6635_v62 = vpack.i.bf16 %v1466_v31, %v1466_v31  ;;  %v1772_v0 = vmax.f32 %v1770_v57, %v1771_v55  ;;  %v1119_v4 = vcombine.high %v6500_v25, %v6500_v25  ;;  %v831_v5 = vcombine.high %v6478_v40, %v6478_v40 }
 0x294   :  { %8539 = vst [vmem:[#allocation11_spill] sm:$0xff] %v6631_v56  ;;  %v1360_v10 = vmax.f32 %v1358_v38, %v1359_v58  ;;  %v1307_v12 = vrot.slane %v1306_v52, 2  ;;  %v6642_v22 = vrot.slane %v840_v39, %v6404_v13  ;;  %v1104_v17 = vcombine.high %v6490_v42, %v6490_v42 }
 0x295   :  { %2053 = vrot.lane.b32.xlu0 %v6635_v62, %s6169_s21  ;;  %v1773_v60 = vrot.slane %v1772_v0, 4  ;;  %v1846_v24 = vsel %vm1193_vm5, %v1119_v4, 4286644096  ;;  %v1222_v28 = vsel %vm1193_vm5, %v831_v5, 4286644096  ;;  %v1023_v25 = vcombine.high %v6466_v36, %v6466_v36 }
 0x296   :  { %2141 = vrot.lane.b32.xlu1 %v6627_v54, %s6169_s21  ;;  %v1361_v40 = vrot.slane %v1360_v10, 1  ;;  %v1308_v61 = vmax.f32 %v1306_v52, %v1307_v12  ;;  %v1261_v15 = vsel %vm1193_vm5, %v6642_v22, 4286644096  ;;  %v1848_v42 = vunpack.i.l.bf16 %v1846_v24 }
 0x297   :  { %v1774_v45 = vmax.f32 %v1772_v0, %v1773_v60  ;;  %v1263_v16 = vunpack.i.l.bf16 %v1261_v15  ;;  %v1264_v18 = vunpack.i.h.bf16 %v1261_v15  ;;  %v1849_v50 = vunpack.i.h.bf16 %v1846_v24 }
 0x298   :  { %v1362_v38 = vmax.f32 %v1360_v10, %v1361_v40  ;;  %v1309_v37 = vrot.slane %v1308_v61, 1  ;;  %v1224_v31 = vunpack.i.l.bf16 %v1222_v28  ;;  %v1225_v57 = vunpack.i.h.bf16 %v1222_v28 }
 0x299   :  { %2205 = vrot.lane.b32.xlu0 %v6631_v56, %s6169_s21  ;;  %v1775_v36 = vrot.slane %v1774_v45, 2  ;;  %v1265_v55 = vmax.f32 %v1263_v16, %v1264_v18  ;;  %v1850_v58 = vmax.f32 %v1848_v42, %v1849_v50  ;;  %v6659_v52 = vrot.slane %v1104_v17, %v6404_v13 }
 0x29a   :  { %v6661_v39 = vpack.i.bf16 %v1362_v38, %v1362_v38  ;;  %v1310_v4 = vmax.f32 %v1308_v61, %v1309_v37  ;;  %v1226_v0 = vmax.f32 %v1224_v31, %v1225_v57  ;;  %v1638_v5 = vsel %vm1193_vm5, %v1023_v25, 4286644096 }
 0x29b   :  { %v1776_v12 = vmax.f32 %v1774_v45, %v1775_v36  ;;  %v1266_v10 = vrot.slane %v1265_v55, 4  ;;  %v1851_v60 = vrot.slane %v1850_v58, 4  ;;  %v1833_v24 = vsel %vm1193_vm5, %v6659_v52, 4286644096 }
 0x29c   :  { %2049 = vrot.lane.b32.xlu1 %v6661_v39, %s6169_s21  ;;  %v6668_v28 = vpack.i.bf16 %v1310_v4, %v1310_v4  ;;  %v1227_v40 = vrot.slane %v1226_v0, 4  ;;  %v1835_v17 = vunpack.i.l.bf16 %v1833_v24  ;;  %v1836_v15 = vunpack.i.h.bf16 %v1833_v24 }
 0x29d   :  { %v1777_v42 = vrot.slane %v1776_v12, 1  ;;  %v1267_v16 = vmax.f32 %v1265_v55, %v1266_v10  ;;  %v1852_v61 = vmax.f32 %v1850_v58, %v1851_v60  ;;  %v1640_v18 = vunpack.i.l.bf16 %v1638_v5 }
 0x29e   :  { %2047 = vrot.lane.b32.xlu0 %v6668_v28, %s6169_s21  ;;  %v1228_v25 = vmax.f32 %v1226_v0, %v1227_v40  ;;  %v1837_v45 = vmax.f32 %v1835_v17, %v1836_v15  ;;  %v1641_v50 = vunpack.i.h.bf16 %v1638_v5  ;;  %v1143_v38 = vcombine.high %v6504_v49, %v6504_v49 }
 0x29f   :  { %v1778_v37 = vmax.f32 %v1776_v12, %v1777_v42  ;;  %v1268_v31 = vrot.slane %v1267_v16, 2  ;;  %v1853_v57 = vrot.slane %v1852_v61, 2  ;;  %v816_v36 = vcombine.high %v6460_v30, %v6460_v30 }
 0x2a0   :  { %v1229_v4 = vrot.slane %v1228_v25, 2  ;;  %v1838_v24 = vrot.slane %v1837_v45, 4  ;;  %v1642_v55 = vmax.f32 %v1640_v18, %v1641_v50  ;;  %v1898_v58 = vsel %vm1193_vm5, %v1143_v38, 4286644096 }
 0x2a1   :  { %v6677_v10 = vpack.i.bf16 %v1778_v37, %v1778_v37  ;;  %v1269_v60 = vmax.f32 %v1267_v16, %v1268_v31  ;;  %v1854_v0 = vmax.f32 %v1852_v61, %v1853_v57  ;;  %v1900_v40 = vunpack.i.l.bf16 %v1898_v58 }
 0x2a2   :  { %v1230_v5 = vmax.f32 %v1228_v25, %v1229_v4  ;;  %v1839_v17 = vmax.f32 %v1837_v45, %v1838_v24  ;;  %v1643_v15 = vrot.slane %v1642_v55, 4  ;;  %v1901_v49 = vunpack.i.h.bf16 %v1898_v58 }
 0x2a3   :  { %2065 = vrot.lane.b32.xlu1 %v6677_v10, %s6169_s21  ;;  %v1270_v12 = vrot.slane %v1269_v60, 1  ;;  %v1855_v42 = vrot.slane %v1854_v0, 1  ;;  %v6682_v30 = vrot.slane %v816_v36, %v6404_v13  ;;  %v806_v18 = vcombine.high %v6474_v32, %v6474_v32 }
 0x2a4   :  { %v1231_v50 = vrot.slane %v1230_v5, 1  ;;  %v1840_v38 = vrot.slane %v1839_v17, 2  ;;  %v1644_v16 = vmax.f32 %v1642_v55, %v1643_v15  ;;  %v1902_v61 = vmax.f32 %v1900_v40, %v1901_v49 }
 0x2a5   :  { %v1271_v37 = vmax.f32 %v1269_v60, %v1270_v12  ;;  %v1856_v25 = vmax.f32 %v1854_v0, %v1855_v42  ;;  %v1209_v45 = vsel %vm1193_vm5, %v6682_v30, 4286644096  ;;  %v6689_v31 = vrot.slane %v806_v18, %v6404_v13 }
 0x2a6   :  { %v1232_v57 = vmax.f32 %v1230_v5, %v1231_v50  ;;  %v1841_v4 = vmax.f32 %v1839_v17, %v1840_v38  ;;  %v1645_v24 = vrot.slane %v1644_v16, 2  ;;  %v1903_v36 = vrot.slane %v1902_v61, 4 }
 0x2a7   :  { %v6691_v58 = vpack.i.bf16 %v1271_v37, %v1271_v37  ;;  %v6693_v47 = vpack.i.bf16 %v1856_v25, %v1856_v25  ;;  %v1211_v32 = vunpack.i.l.bf16 %v1209_v45  ;;  %v1212_v27 = vunpack.i.h.bf16 %v1209_v45 }
 0x2a8   :  { %v6695_v55 = vpack.i.bf16 %v1232_v57, %v1232_v57  ;;  %v1842_v60 = vrot.slane %v1841_v4, 1  ;;  %v1646_v0 = vmax.f32 %v1644_v16, %v1645_v24  ;;  %v1904_v40 = vmax.f32 %v1902_v61, %v1903_v36 }
 0x2a9   :  { %8540 = vst [vmem:[#allocation12_spill] sm:$0xff] %v6691_v58  ;;  %8541 = vst [vmem:[#allocation13_spill] sm:$0xff] %v6693_v47  ;;  %2125 = vrot.lane.b32.xlu0 %v6691_v58, %s6169_s21  ;;  %2227 = vrot.lane.b32.xlu1 %v6693_v47, %s6169_s21  ;;  %v1213_v5 = vmax.f32 %v1211_v32, %v1212_v27  ;;  %v6703_v17 = vrot.slane %v6689_v31, %v6404_v13 }
 0x2aa   :  { %8542 = vst [vmem:[#allocation14_spill] sm:$0xff] %v6695_v55  ;;  %v1008_v15 = vcombine.high %v6452_v20, %v6452_v20  ;;  %v1843_v49 = vmax.f32 %v1841_v4, %v1842_v60  ;;  %v1647_v12 = vrot.slane %v1646_v0, 1  ;;  %v1905_v42 = vrot.slane %v1904_v40, 2 }
 0x2ab   :  { %v1128_v18 = vcombine.high %v6496_v44, %v6496_v44  ;;  %v1214_v50 = vrot.slane %v1213_v5, 4  ;;  %v1924_v38 = vsel %vm1193_vm5, %v6703_v17, 4286644096  ;;  %v927_v27 = vcombine.high %v6543_v3, %v6543_v3 }
 0x2ac   :  { %v6712_v16 = vrot.slane %v1008_v15, %v6404_v13  ;;  %v6716_v61 = vpack.i.bf16 %v1843_v49, %v1843_v49  ;;  %v1648_v37 = vmax.f32 %v1646_v0, %v1647_v12  ;;  %v1906_v20 = vmax.f32 %v1904_v40, %v1905_v42 }
 0x2ad   :  { %v1926_v25 = vunpack.i.l.bf16 %v1924_v38  ;;  %2203 = vrot.lane.b32.xlu0 %v6695_v55, %s6169_s21  ;;  %v1215_v45 = vmax.f32 %v1213_v5, %v1214_v50  ;;  %v1927_v44 = vunpack.i.h.bf16 %v1924_v38  ;;  %v6723_v4 = vrot.slane %v1128_v18, %v6404_v13 }
 0x2ae   :  { %8543 = vst [vmem:[#allocation15_spill] sm:$0xff] %v6716_v61  ;;  %v1625_v57 = vsel %vm1193_vm5, %v6712_v16, 4286644096  ;;  %2147 = vrot.lane.b32.xlu1 %v6716_v61, %s6169_s21  ;;  %v6727_v3 = vpack.i.bf16 %v1648_v37, %v1648_v37  ;;  %v1907_v24 = vrot.slane %v1906_v20, 1  ;;  %v1430_v5 = vsel %vm1193_vm5, %v927_v27, 4286644096 }
 0x2af   :  { %v1627_v36 = vunpack.i.l.bf16 %v1625_v57  ;;  %v1628_v32 = vunpack.i.h.bf16 %v1625_v57  ;;  %v1216_v60 = vrot.slane %v1215_v45, 2  ;;  %v1928_v0 = vmax.f32 %v1926_v25, %v1927_v44 }
 0x2b0   :  { %8544 = vst [vmem:[#allocation16_spill] sm:$0xff] %v6727_v3  ;;  %v1885_v40 = vsel %vm1193_vm5, %v6723_v4, 4286644096  ;;  %v1908_v15 = vmax.f32 %v1906_v20, %v1907_v24  ;;  %v1432_v38 = vunpack.i.l.bf16 %v1430_v5  ;;  %v1433_v37 = vunpack.i.h.bf16 %v1430_v5 }
 0x2b1   :  { %v1629_v49 = vmax.f32 %v1627_v36, %v1628_v32  ;;  %v1887_v12 = vunpack.i.l.bf16 %v1885_v40  ;;  %v1888_v42 = vunpack.i.h.bf16 %v1885_v40  ;;  %2219 = vrot.lane.b32.xlu0 %v6727_v3, %s6169_s21  ;;  %v1217_v18 = vmax.f32 %v1215_v45, %v1216_v60 }
 0x2b2   :  { %v1929_v50 = vrot.slane %v1928_v0, 4  ;;  %v6734_v58 = vpack.i.bf16 %v1908_v15, %v1908_v15  ;;  %v808_v44 = vcombine.high %v6481_v33, %v6481_v33  ;;  %v1434_v20 = vmax.f32 %v1432_v38, %v1433_v37 }
 0x2b3   :  { %v1630_v57 = vrot.slane %v1629_v49, 4  ;;  %v1889_v25 = vmax.f32 %v1887_v12, %v1888_v42  ;;  %v1218_v55 = vrot.slane %v1217_v18, 1  ;;  %v912_v24 = vcombine.high %v6530_v21, %v6530_v21 }
 0x2b4   :  { %8545 = vst [vmem:[#allocation17_spill] sm:$0xff] %v6734_v58  ;;  %v1930_v27 = vmax.f32 %v1928_v0, %v1929_v50  ;;  %2229 = vrot.lane.b32.xlu1 %v6734_v58, %s6169_s21  ;;  %v6743_v32 = vrot.slane %v808_v44, %v6404_v13  ;;  %v1071_v60 = vcombine.high %v6552_v14, %v6552_v14  ;;  %v1435_v33 = vrot.slane %v1434_v20, 4 }
 0x2b5   :  { %v1631_v45 = vmax.f32 %v1629_v49, %v1630_v57  ;;  %v1890_v36 = vrot.slane %v1889_v25, 4  ;;  %v1219_v40 = vmax.f32 %v1217_v18, %v1218_v55  ;;  %v6748_v0 = vrot.slane %v912_v24, %v6404_v13 }
 0x2b6   :  { %v1931_v5 = vrot.slane %v1930_v27, 2  ;;  %v6752_v21 = vrot.slane %v6743_v32, %v6404_v13  ;;  %v1742_v49 = vsel %vm1193_vm5, %v1071_v60, 4286644096  ;;  %v1436_v38 = vmax.f32 %v1434_v20, %v1435_v33 }
 0x2b7   :  { %v1632_v15 = vrot.slane %v1631_v45, 2  ;;  %v1891_v12 = vmax.f32 %v1889_v25, %v1890_v36  ;;  %v6755_v42 = vpack.i.bf16 %v1219_v40, %v1219_v40  ;;  %v1417_v14 = vsel %vm1193_vm5, %v6748_v0, 4286644096 }
 0x2b8   :  { %v1932_v50 = vmax.f32 %v1930_v27, %v1931_v5  ;;  %v1976_v37 = vsel %vm1193_vm5, %v6752_v21, 4286644096  ;;  %v1419_v57 = vunpack.i.l.bf16 %v1417_v14  ;;  %v1437_v44 = vrot.slane %v1436_v38, 2 }
 0x2b9   :  { %8546 = vst [vmem:[#allocation18_spill] sm:$0xff] %v6755_v42  ;;  %v1633_v55 = vmax.f32 %v1631_v45, %v1632_v15  ;;  %v1892_v18 = vrot.slane %v1891_v12, 2  ;;  %2123 = vrot.lane.b32.xlu0 %v6755_v42, %s6169_s21  ;;  %v1978_v24 = vunpack.i.l.bf16 %v1976_v37  ;;  %v1979_v36 = vunpack.i.h.bf16 %v1976_v37 }
 0x2ba   :  { %v1933_v25 = vrot.slane %v1932_v50, 1  ;;  %v1420_v27 = vunpack.i.h.bf16 %v1417_v14  ;;  %v1744_v20 = vunpack.i.l.bf16 %v1742_v49  ;;  %v1438_v33 = vmax.f32 %v1436_v38, %v1437_v44 }
 0x2bb   :  { %v1634_v60 = vrot.slane %v1633_v55, 1  ;;  %v1893_v40 = vmax.f32 %v1891_v12, %v1892_v18  ;;  %v1980_v61 = vmax.f32 %v1978_v24, %v1979_v36  ;;  %v1745_v45 = vunpack.i.h.bf16 %v1742_v49 }
 0x2bc   :  { %v1934_v5 = vmax.f32 %v1932_v50, %v1933_v25  ;;  %v1421_v56 = vmax.f32 %v1419_v57, %v1420_v27  ;;  %v951_v47 = vcombine.high %v6577_v53, %v6577_v53  ;;  %v1439_v42 = vrot.slane %v1438_v33, 1 }
 0x2bd   :  { %v1635_v15 = vmax.f32 %v1633_v55, %v1634_v60  ;;  %v1894_v58 = vrot.slane %v1893_v40, 1  ;;  %v1981_v3 = vrot.slane %v1980_v61, 4  ;;  %v1746_v43 = vmax.f32 %v1744_v20, %v1745_v45 }
 0x2be   :  { %v6765_v54 = vpack.i.bf16 %v1934_v5, %v1934_v5  ;;  %v1422_v14 = vrot.slane %v1421_v56, 4  ;;  %v1482_v50 = vsel %vm1193_vm5, %v951_v47, 4286644096  ;;  %v1440_v49 = vmax.f32 %v1438_v33, %v1439_v42 }
 0x2bf   :  { %v6767_v37 = vpack.i.bf16 %v1635_v15, %v1635_v15  ;;  %v1895_v12 = vmax.f32 %v1893_v40, %v1894_v58  ;;  %v1982_v38 = vmax.f32 %v1980_v61, %v1981_v3  ;;  %v1747_v55 = vrot.slane %v1746_v43, 4 }
 0x2c0   :  { %2071 = vrot.lane.b32.xlu1 %v6765_v54, %s6169_s21  ;;  %v1484_v18 = vunpack.i.l.bf16 %v1482_v50  ;;  %v1423_v57 = vmax.f32 %v1421_v56, %v1422_v14  ;;  %v1485_v25 = vunpack.i.h.bf16 %v1482_v50  ;;  %v1048_v58 = vcombine.high %v6555_v26, %v6555_v26 }
 0x2c1   :  { %8547 = vst [vmem:[#allocation19_spill] sm:$0xff] %v6767_v37  ;;  %2139 = vrot.lane.b32.xlu0 %v6767_v37, %s6169_s21  ;;  %v6774_v53 = vpack.i.bf16 %v1895_v12, %v1895_v12  ;;  %v6778_v44 = vpack.i.bf16 %v1440_v49, %v1440_v49  ;;  %v1983_v47 = vrot.slane %v1982_v38, 2  ;;  %v1748_v24 = vmax.f32 %v1746_v43, %v1747_v55 }
 0x2c2   :  { %v738_v42 = vcombine.high %v6518_v63, %v6518_v63  ;;  %v1424_v61 = vrot.slane %v1423_v57, 2  ;;  %v1486_v3 = vmax.f32 %v1484_v18, %v1485_v25  ;;  %v1703_v36 = vsel %vm1193_vm5, %v1048_v58, 4286644096 }
 0x2c3   :  { %8548 = vst [vmem:[#allocation20_spill] sm:$0xff] %v6774_v53  ;;  %8549 = vst [vmem:[#allocation21_spill] sm:$0xff] %v6778_v44  ;;  %v1056_v60 = vcombine.high %v6533_v29, %v6533_v29  ;;  %v1984_v56 = vmax.f32 %v1982_v38, %v1983_v47  ;;  %v1749_v40 = vrot.slane %v1748_v24, 2  ;;  %v1705_v26 = vunpack.i.l.bf16 %v1703_v36 }
 0x2c4   :  { %2149 = vrot.lane.b32.xlu1 %v6774_v53, %s6169_s21  ;;  %v1706_v27 = vunpack.i.h.bf16 %v1703_v36  ;;  %v1425_v43 = vmax.f32 %v1423_v57, %v1424_v61  ;;  %v1487_v20 = vrot.slane %v1486_v3, 4  ;;  %v6790_v63 = vrot.slane %v738_v42, %v6404_v13 }
 0x2c5   :  { %2211 = vrot.lane.b32.xlu0 %v6778_v44, %s6169_s21  ;;  %v6793_v5 = vrot.slane %v1056_v60, %v6404_v13  ;;  %v1985_v33 = vrot.slane %v1984_v56, 1  ;;  %v1750_v29 = vmax.f32 %v1748_v24, %v1749_v40  ;;  %v936_v15 = vcombine.high %v6565_v9, %v6565_v9 }
 0x2c6   :  { %v1707_v45 = vmax.f32 %v1705_v26, %v1706_v27  ;;  %v1426_v12 = vrot.slane %v1425_v43, 1  ;;  %v1488_v14 = vmax.f32 %v1486_v3, %v1487_v20  ;;  %v6799_v50 = vrot.slane %v6790_v63, %v6404_v13 }
 0x2c7   :  { %v1729_v49 = vsel %vm1193_vm5, %v6793_v5, 4286644096  ;;  %v1986_v38 = vmax.f32 %v1984_v56, %v1985_v33  ;;  %v1751_v55 = vrot.slane %v1750_v29, 1  ;;  %v903_v20 = vcombine.high %v6599_v35, %v6599_v35 }
 0x2c8   :  { %v1708_v18 = vrot.slane %v1707_v45, 4  ;;  %v1731_v57 = vunpack.i.l.bf16 %v1729_v49  ;;  %v1427_v25 = vmax.f32 %v1425_v43, %v1426_v12  ;;  %v1489_v58 = vrot.slane %v1488_v14, 2 }
 0x2c9   :  { %v1508_v47 = vsel %vm1193_vm5, %v6799_v50, 4286644096  ;;  %v1732_v24 = vunpack.i.h.bf16 %v1729_v49  ;;  %v6805_v9 = vpack.i.bf16 %v1986_v38, %v1986_v38  ;;  %v1752_v42 = vmax.f32 %v1750_v29, %v1751_v55 }
 0x2ca   :  { %v1709_v61 = vmax.f32 %v1707_v45, %v1708_v18  ;;  %v1510_v3 = vunpack.i.l.bf16 %v1508_v47  ;;  %v6807_v36 = vpack.i.bf16 %v1427_v25, %v1427_v25  ;;  %v1490_v60 = vmax.f32 %v1488_v14, %v1489_v58 }
 0x2cb   :  { %v1511_v40 = vunpack.i.h.bf16 %v1508_v47  ;;  %v1733_v26 = vmax.f32 %v1731_v57, %v1732_v24  ;;  %2073 = vrot.lane.b32.xlu1 %v6805_v9, %s6169_s21  ;;  %v6811_v56 = vpack.i.bf16 %v1752_v42, %v1752_v42  ;;  %v6814_v43 = vrot.slane %v936_v15, %v6404_v13 }
 0x2cc   :  { %8550 = vst [vmem:[#allocation22_spill] sm:$0xff] %v6807_v36  ;;  %v1710_v27 = vrot.slane %v1709_v61, 2  ;;  %2131 = vrot.lane.b32.xlu0 %v6807_v36, %s6169_s21  ;;  %v1491_v33 = vrot.slane %v1490_v60, 1  ;;  %v740_v12 = vcombine.high %v6546_v8, %v6546_v8  ;;  %v1378_v38 = vsel %vm1193_vm5, %v903_v20, 4286644096 }
 0x2cd   :  { %v1512_v29 = vmax.f32 %v1510_v3, %v1511_v40  ;;  %v1734_v45 = vrot.slane %v1733_v26, 4  ;;  %v1469_v49 = vsel %vm1193_vm5, %v6814_v43, 4286644096  ;;  %v1095_v15 = vcombine.high %v6617_v7, %v6617_v7 }
 0x2ce   :  { %v1711_v14 = vmax.f32 %v1709_v61, %v1710_v27  ;;  %v1492_v55 = vmax.f32 %v1490_v60, %v1491_v33  ;;  %v1471_v57 = vunpack.i.l.bf16 %v1469_v49  ;;  %v1472_v58 = vunpack.i.h.bf16 %v1469_v49 }
 0x2cf   :  { %v1513_v35 = vrot.slane %v1512_v29, 4  ;;  %v1735_v18 = vmax.f32 %v1733_v26, %v1734_v45  ;;  %2223 = vrot.lane.b32.xlu1 %v6811_v56, %s6169_s21  ;;  %v1380_v47 = vunpack.i.l.bf16 %v1378_v38  ;;  %v1381_v8 = vunpack.i.h.bf16 %v1378_v38 }
 0x2d0   :  { %v1712_v25 = vrot.slane %v1711_v14, 1  ;;  %v6829_v24 = vpack.i.bf16 %v1492_v55, %v1492_v55  ;;  %v6832_v3 = vrot.slane %v740_v12, %v6404_v13  ;;  %v1473_v7 = vmax.f32 %v1471_v57, %v1472_v58 }
 0x2d1   :  { %v1514_v42 = vmax.f32 %v1512_v29, %v1513_v35  ;;  %v1736_v61 = vrot.slane %v1735_v18, 2  ;;  %v1382_v60 = vmax.f32 %v1380_v47, %v1381_v8  ;;  %v1794_v26 = vsel %vm1193_vm5, %v1095_v15, 4286644096 }
 0x2d2   :  { %8551 = vst [vmem:[#allocation23_spill] sm:$0xff] %v6829_v24  ;;  %v1713_v40 = vmax.f32 %v1711_v14, %v1712_v25  ;;  %2213 = vrot.lane.b32.xlu0 %v6829_v24, %s6169_s21  ;;  %v6839_v33 = vrot.slane %v6832_v3, %v6404_v13  ;;  %v1796_v45 = vunpack.i.l.bf16 %v1794_v26  ;;  %v1474_v49 = vrot.slane %v1473_v7, 4 }
 0x2d3   :  { %v1515_v27 = vrot.slane %v1514_v42, 2  ;;  %v1737_v20 = vmax.f32 %v1735_v18, %v1736_v61  ;;  %v1383_v12 = vrot.slane %v1382_v60, 4  ;;  %v1797_v38 = vunpack.i.h.bf16 %v1794_v26 }
 0x2d4   :  { %v6841_v29 = vpack.i.bf16 %v1713_v40, %v1713_v40  ;;  %v1560_v15 = vsel %vm1193_vm5, %v6839_v33, 4286644096  ;;  %v879_v35 = vcombine.high %v6611_v51, %v6611_v51  ;;  %v1475_v18 = vmax.f32 %v1473_v7, %v1474_v49 }
 0x2d5   :  { %v1516_v14 = vmax.f32 %v1514_v42, %v1515_v27  ;;  %v1738_v55 = vrot.slane %v1737_v20, 1  ;;  %v1384_v57 = vmax.f32 %v1382_v60, %v1383_v12  ;;  %v1562_v25 = vunpack.i.l.bf16 %v1560_v15 }
 0x2d6   :  { %8552 = vst [vmem:[#allocation24_spill] sm:$0xff] %v6841_v29  ;;  %2301 = vrot.lane.b32.xlu1 %v6841_v29, %s6169_s21  ;;  %v1563_v58 = vunpack.i.h.bf16 %v1560_v15  ;;  %v1798_v61 = vmax.f32 %v1796_v45, %v1797_v38  ;;  %v1326_v40 = vsel %vm1193_vm5, %v879_v35, 4286644096  ;;  %v1476_v42 = vrot.slane %v1475_v18, 2 }
 0x2d7   :  { %v1517_v47 = vrot.slane %v1516_v14, 1  ;;  %v1739_v8 = vmax.f32 %v1737_v20, %v1738_v55  ;;  %v1385_v26 = vrot.slane %v1384_v57, 2  ;;  %v1328_v36 = vunpack.i.l.bf16 %v1326_v40 }
 0x2d8   :  { %v1564_v27 = vmax.f32 %v1562_v25, %v1563_v58  ;;  %v1799_v51 = vrot.slane %v1798_v61, 4  ;;  %v1329_v53 = vunpack.i.h.bf16 %v1326_v40  ;;  %v1477_v37 = vmax.f32 %v1475_v18, %v1476_v42 }
 0x2d9   :  { %v1518_v24 = vmax.f32 %v1516_v14, %v1517_v47  ;;  %v6850_v44 = vpack.i.bf16 %v1739_v8, %v1739_v8  ;;  %v1386_v29 = vmax.f32 %v1384_v57, %v1385_v26  ;;  %v888_v60 = vcombine.high %v6589_v11, %v6589_v11 }
 0x2da   :  { %v1565_v7 = vrot.slane %v1564_v27, 4  ;;  %v1800_v20 = vmax.f32 %v1798_v61, %v1799_v51  ;;  %v1330_v45 = vmax.f32 %v1328_v36, %v1329_v53  ;;  %v856_v12 = vcombine.high %v6642_v22, %v6642_v22 }
 0x2db   :  { %v6854_v49 = vpack.i.bf16 %v1518_v24, %v1518_v24  ;;  %2143 = vrot.lane.b32.xlu1 %v6850_v44, %s6169_s21  ;;  %v1478_v38 = vrot.slane %v1477_v37, 1  ;;  %v1387_v14 = vrot.slane %v1386_v29, 1  ;;  %v6861_v15 = vrot.slane %v888_v60, %v6404_v13 }
 0x2dc   :  { %v1566_v55 = vmax.f32 %v1564_v27, %v1565_v7  ;;  %v1801_v11 = vrot.slane %v1800_v20, 2  ;;  %v1331_v24 = vrot.slane %v1330_v45, 4  ;;  %v1287_v35 = vsel %vm1193_vm5, %v856_v12, 4286644096 }
 0x2dd   :  { %2055 = vrot.lane.b32.xlu0 %v6854_v49, %s6169_s21  ;;  %v1080_v18 = vcombine.high %v6605_v48, %v6605_v48  ;;  %v1479_v53 = vmax.f32 %v1477_v37, %v1478_v38  ;;  %v1388_v36 = vmax.f32 %v1386_v29, %v1387_v14  ;;  %v1365_v22 = vsel %vm1193_vm5, %v6861_v15, 4286644096 }
 0x2de   :  { %v1567_v57 = vrot.slane %v1566_v55, 2  ;;  %v1802_v25 = vmax.f32 %v1800_v20, %v1801_v11  ;;  %v1332_v58 = vmax.f32 %v1330_v45, %v1331_v24  ;;  %v1367_v47 = vunpack.i.l.bf16 %v1365_v22 }
 0x2df   :  { %v1368_v8 = vunpack.i.h.bf16 %v1365_v22  ;;  %v6870_v61 = vpack.i.bf16 %v1479_v53, %v1479_v53  ;;  %v6872_v40 = vpack.i.bf16 %v1388_v36, %v1388_v36  ;;  %v1289_v26 = vunpack.i.l.bf16 %v1287_v35 }
 0x2e0   :  { %v1568_v42 = vmax.f32 %v1566_v55, %v1567_v57  ;;  %v1803_v27 = vrot.slane %v1802_v25, 1  ;;  %v1333_v51 = vrot.slane %v1332_v58, 2  ;;  %v1290_v48 = vunpack.i.h.bf16 %v1287_v35 }
 0x2e1   :  { %8553 = vst [vmem:[#allocation25_spill] sm:$0xff] %v6870_v61  ;;  %8554 = vst [vmem:[#allocation26_spill] sm:$0xff] %v6872_v40  ;;  %v1369_v7 = vmax.f32 %v1367_v47, %v1368_v8  ;;  %2133 = vrot.lane.b32.xlu0 %v6870_v61, %s6169_s21  ;;  %2209 = vrot.lane.b32.xlu1 %v6872_v40, %s6169_s21  ;;  %v6879_v29 = vrot.slane %v1080_v18, %v6404_v13 }
 0x2e2   :  { %v1569_v37 = vrot.slane %v1568_v42, 1  ;;  %v864_v60 = vcombine.high %v6602_v41, %v6602_v41  ;;  %v1120_v20 = vcombine.high %v6659_v52, %v6659_v52  ;;  %v1804_v45 = vmax.f32 %v1802_v25, %v1803_v27 }
 0x2e3   :  { %v1334_v12 = vmax.f32 %v1332_v58, %v1333_v51  ;;  %v1370_v38 = vrot.slane %v1369_v7, 4  ;;  %v1291_v14 = vmax.f32 %v1289_v26, %v1290_v48  ;;  %v1781_v11 = vsel %vm1193_vm5, %v6879_v29, 4286644096 }
 0x2e4   :  { %v1570_v55 = vmax.f32 %v1568_v42, %v1569_v37  ;;  %v6888_v24 = vrot.slane %v864_v60, %v6404_v13  ;;  %v1859_v35 = vsel %vm1193_vm5, %v1120_v20, 4286644096  ;;  %v6891_v18 = vpack.i.bf16 %v1804_v45, %v1804_v45 }
 0x2e5   :  { %v1335_v53 = vrot.slane %v1334_v12, 1  ;;  %v1371_v41 = vmax.f32 %v1369_v7, %v1370_v38  ;;  %v1292_v36 = vrot.slane %v1291_v14, 4  ;;  %v1783_v52 = vunpack.i.l.bf16 %v1781_v11 }
 0x2e6   :  { %v6893_v57 = vpack.i.bf16 %v1570_v55, %v1570_v55  ;;  %v1784_v22 = vunpack.i.h.bf16 %v1781_v11  ;;  %v1313_v25 = vsel %vm1193_vm5, %v6888_v24, 4286644096  ;;  %2225 = vrot.lane.b32.xlu1 %v6891_v18, %s6169_s21  ;;  %v1861_v51 = vunpack.i.l.bf16 %v1859_v35 }
 0x2e7   :  { %v1336_v58 = vmax.f32 %v1334_v12, %v1335_v53  ;;  %v1372_v47 = vrot.slane %v1371_v41, 2  ;;  %v1293_v8 = vmax.f32 %v1291_v14, %v1292_v36  ;;  %v1315_v42 = vunpack.i.l.bf16 %v1313_v25 }
 0x2e8   :  { %2057 = vrot.lane.b32.xlu0 %v6893_v57, %s6169_s21  ;;  %v1785_v26 = vmax.f32 %v1783_v52, %v1784_v22  ;;  %v1316_v27 = vunpack.i.h.bf16 %v1313_v25  ;;  %v1862_v7 = vunpack.i.h.bf16 %v1859_v35  ;;  %v832_v20 = vcombine.high %v6682_v30, %v6682_v30 }
 0x2e9   :  { %v6901_v48 = vpack.i.bf16 %v1336_v58, %v1336_v58  ;;  %v1373_v37 = vmax.f32 %v1371_v41, %v1372_v47  ;;  %v1294_v60 = vrot.slane %v1293_v8, 2  ;;  %v1167_v14 = vcombine.high %v6703_v17, %v6703_v17 }
 0x2ea   :  { %v1786_v45 = vrot.slane %v1785_v26, 4  ;;  %v1317_v38 = vmax.f32 %v1315_v42, %v1316_v27  ;;  %v1863_v12 = vmax.f32 %v1861_v51, %v1862_v7  ;;  %v1235_v53 = vsel %vm1193_vm5, %v832_v20, 4286644096 }
 0x2eb   :  { %8555 = vst [vmem:[#allocation27_spill] sm:$0xff] %v6901_v48  ;;  %v1374_v55 = vrot.slane %v1373_v37, 1  ;;  %v1295_v11 = vmax.f32 %v1293_v8, %v1294_v60  ;;  %v1024_v35 = vcombine.high %v6712_v16, %v6712_v16  ;;  %v1237_v30 = vunpack.i.l.bf16 %v1235_v53 }
 0x2ec   :  { %2207 = vrot.lane.b32.xlu0 %v6901_v48, %s6169_s21  ;;  %v1787_v41 = vmax.f32 %v1785_v26, %v1786_v45  ;;  %v1318_v36 = vrot.slane %v1317_v38, 4  ;;  %v1864_v52 = vrot.slane %v1863_v12, 4  ;;  %v1238_v58 = vunpack.i.h.bf16 %v1235_v53 }
 0x2ed   :  { %v1375_v22 = vmax.f32 %v1373_v37, %v1374_v55  ;;  %v1296_v25 = vrot.slane %v1295_v11, 1  ;;  %v1950_v47 = vsel %vm1193_vm5, %v1167_v14, 4286644096  ;;  %v1651_v45 = vsel %vm1193_vm5, %v1024_v35, 4286644096 }
 0x2ee   :  { %v1788_v17 = vrot.slane %v1787_v41, 2  ;;  %v1319_v42 = vmax.f32 %v1317_v38, %v1318_v36  ;;  %v1865_v8 = vmax.f32 %v1863_v12, %v1864_v52  ;;  %v1952_v27 = vunpack.i.l.bf16 %v1950_v47 }
 0x2ef   :  { %v6913_v51 = vpack.i.bf16 %v1375_v22, %v1375_v22  ;;  %v1297_v7 = vmax.f32 %v1295_v11, %v1296_v25  ;;  %v1239_v16 = vmax.f32 %v1237_v30, %v1238_v58  ;;  %v1953_v60 = vunpack.i.h.bf16 %v1950_v47  ;;  %v6926_v22 = vpop.permute.xlu1 %2061 }
 0x2f0   :  { %v1789_v20 = vmax.f32 %v1787_v41, %v1788_v17  ;;  %v1320_v61 = vrot.slane %v1319_v42, 2  ;;  %v1866_v26 = vrot.slane %v1865_v8, 2  ;;  %v1653_v38 = vunpack.i.l.bf16 %v1651_v45 }
 0x2f1   :  { %8556 = vst [vmem:[#allocation28_spill] sm:$0xff] %v6913_v51  ;;  %2129 = vrot.lane.b32.xlu1 %v6913_v51, %s6169_s21  ;;  %v6918_v37 = vpack.i.bf16 %v1297_v7, %v1297_v7  ;;  %v1240_v14 = vrot.slane %v1239_v16, 4  ;;  %v1954_v55 = vmax.f32 %v1952_v27, %v1953_v60  ;;  %v1654_v52 = vunpack.i.h.bf16 %v1651_v45  ;;  %v6930_v7 = vpop.permute.xlu0 %2045 }
 0x2f2   :  { %v1790_v12 = vrot.slane %v1789_v20, 1  ;;  %v1321_v53 = vmax.f32 %v1319_v42, %v1320_v61  ;;  %v1867_v36 = vmax.f32 %v1865_v8, %v1866_v26  ;;  %v1144_v35 = vcombine.high %v6723_v4, %v6723_v4 }
 0x2f3   :  { %8557 = vst [vmem:[#allocation29_spill] sm:$0xff] %v6918_v37  ;;  %2285 = vrot.lane.b32.xlu0 %v6918_v37, %s6169_s21  ;;  %v1241_v11 = vmax.f32 %v1239_v16, %v1240_v14  ;;  %v1955_v41 = vrot.slane %v1954_v55, 4  ;;  %v928_v30 = vcombine.high %v6748_v0, %v6748_v0  ;;  %v1655_v17 = vmax.f32 %v1653_v38, %v1654_v52 }
 0x2f4   :  { %v1791_v25 = vmax.f32 %v1789_v20, %v1790_v12  ;;  %v1322_v58 = vrot.slane %v1321_v53, 1  ;;  %v1868_v47 = vrot.slane %v1867_v36, 1  ;;  %v1911_v8 = vsel %vm1193_vm5, %v1144_v35, 4286644096 }
 0x2f5   :  { %v1242_v61 = vrot.slane %v1241_v11, 2  ;;  %v1956_v42 = vmax.f32 %v1954_v55, %v1955_v41  ;;  %v1443_v27 = vsel %vm1193_vm5, %v928_v30, 4286644096  ;;  %v1656_v26 = vrot.slane %v1655_v17, 4 }
 0x2f6   :  { %v6932_v16 = vpack.i.bf16 %v1791_v25, %v1791_v25  ;;  %v1323_v4 = vmax.f32 %v1321_v53, %v1322_v58  ;;  %v1869_v60 = vmax.f32 %v1867_v36, %v1868_v47  ;;  %v1913_v14 = vunpack.i.l.bf16 %v1911_v8  ;;  %v6940_v53 = vpop.permute.xlu1 %2067 }
 0x2f7   :  { %v1243_v0 = vmax.f32 %v1241_v11, %v1242_v61  ;;  %v1957_v45 = vrot.slane %v1956_v42, 2  ;;  %v1914_v20 = vunpack.i.h.bf16 %v1911_v8  ;;  %v1657_v12 = vmax.f32 %v1655_v17, %v1656_v26 }
 0x2f8   :  { %2145 = vrot.lane.b32.xlu1 %v6932_v16, %s6169_s21  ;;  %v6936_v38 = vpack.i.bf16 %v1323_v4, %v1323_v4  ;;  %v6938_v55 = vpack.i.bf16 %v1869_v60, %v1869_v60  ;;  %v1445_v52 = vunpack.i.l.bf16 %v1443_v27  ;;  %v1446_v25 = vunpack.i.h.bf16 %v1443_v27  ;;  %v6950_v27 = vpop.permute.xlu0 %2043 }
 0x2f9   :  { %v1244_v41 = vrot.slane %v1243_v0, 1  ;;  %v1958_v35 = vmax.f32 %v1956_v42, %v1957_v45  ;;  %v1915_v30 = vmax.f32 %v1913_v14, %v1914_v20  ;;  %v1658_v36 = vrot.slane %v1657_v12, 2 }
 0x2fa   :  { %8558 = vst [vmem:[#allocation30_spill] sm:$0xff] %v6936_v38  ;;  %8559 = vst [vmem:[#allocation31_spill] sm:$0xff] %v6938_v55  ;;  %2127 = vrot.lane.b32.xlu0 %v6936_v38, %s6169_s21  ;;  %v1152_v11 = vcombine.high %v6689_v31, %v6689_v31  ;;  %v975_v58 = vcombine.high %v6799_v50, %v6799_v50  ;;  %v1191_v47 = vcombine.high %v6752_v21, %v6752_v21 }
 0x2fb   :  { %v1245_v17 = vmax.f32 %v1243_v0, %v1244_v41  ;;  %v1959_v61 = vrot.slane %v1958_v35, 1  ;;  %v1916_v42 = vrot.slane %v1915_v30, 4  ;;  %v1447_v8 = vmax.f32 %v1445_v52, %v1446_v25 }
 0x2fc   :  { %2307 = vrot.lane.b32.xlu1 %v6938_v55, %s6169_s21  ;;  %v1659_v4 = vmax.f32 %v1657_v12, %v1658_v36  ;;  %v6955_v60 = vrot.slane %v1152_v11, %v6404_v13  ;;  %v1534_v31 = vsel %vm1193_vm5, %v975_v58, 4286644096  ;;  %v2002_v50 = vsel %vm1193_vm5, %v1191_v47, 4286644096  ;;  %v6967_v58 = vpop.permute.xlu1 %2069 }
 0x2fd   :  { %v6959_v26 = vpack.i.bf16 %v1245_v17, %v1245_v17  ;;  %v1960_v21 = vmax.f32 %v1958_v35, %v1959_v61  ;;  %v1917_v0 = vmax.f32 %v1915_v30, %v1916_v42  ;;  %v1448_v45 = vrot.slane %v1447_v8, 4 }
 0x2fe   :  { %v1660_v14 = vrot.slane %v1659_v4, 1  ;;  %v1937_v20 = vsel %vm1193_vm5, %v6955_v60, 4286644096  ;;  %v1536_v52 = vunpack.i.l.bf16 %v1534_v31  ;;  %v1537_v41 = vunpack.i.h.bf16 %v1534_v31 }
 0x2ff   :  { %8560 = vst [vmem:[#allocation32_spill] sm:$0xff] %v6959_v26  ;;  %2283 = vrot.lane.b32.xlu0 %v6959_v26, %s6169_s21  ;;  %v6965_v12 = vpack.i.bf16 %v1960_v21, %v1960_v21  ;;  %v1918_v25 = vrot.slane %v1917_v0, 2  ;;  %v1449_v36 = vmax.f32 %v1447_v8, %v1448_v45  ;;  %v1939_v11 = vunpack.i.l.bf16 %v1937_v20  ;;  %v6973_v21 = vpop.permute.xlu0 %2059 }
 0x300   :  { %v1661_v47 = vmax.f32 %v1659_v4, %v1660_v14  ;;  %v1940_v35 = vunpack.i.h.bf16 %v1937_v20  ;;  %v1538_v30 = vmax.f32 %v1536_v52, %v1537_v41  ;;  %v2004_v17 = vunpack.i.l.bf16 %v2002_v50 }
 0x301   :  { %8561 = vst [vmem:[#allocation33_spill] sm:$0xff] %v6965_v12  ;;  %2231 = vrot.lane.b32.xlu1 %v6965_v12, %s6169_s21  ;;  %v1919_v61 = vmax.f32 %v1917_v0, %v1918_v25  ;;  %v1450_v42 = vrot.slane %v1449_v36, 2  ;;  %v2005_v31 = vunpack.i.h.bf16 %v2002_v50  ;;  %v952_v26 = vcombine.high %v6814_v43, %v6814_v43 }
 0x302   :  { %v6975_v55 = vpack.i.bf16 %v1661_v47, %v1661_v47  ;;  %v1941_v8 = vmax.f32 %v1939_v11, %v1940_v35  ;;  %v1539_v45 = vrot.slane %v1538_v30, 4  ;;  %v1176_v4 = vcombine.high %v6743_v32, %v6743_v32  ;;  %v6985_v35 = vpop.permute.xlu1 %2221 }
 0x303   :  { %v1920_v14 = vrot.slane %v1919_v61, 1  ;;  %v1451_v20 = vmax.f32 %v1449_v36, %v1450_v42  ;;  %v2006_v52 = vmax.f32 %v2004_v17, %v2005_v31  ;;  %v1495_v41 = vsel %vm1193_vm5, %v952_v26, 4286644096 }
 0x304   :  { %8562 = vst [vmem:[#allocation34_spill] sm:$0xff] %v6975_v55  ;;  %2299 = vrot.lane.b32.xlu0 %v6975_v55, %s6169_s21  ;;  %v1942_v50 = vrot.slane %v1941_v8, 4  ;;  %v1540_v0 = vmax.f32 %v1538_v30, %v1539_v45  ;;  %v1497_v43 = vunpack.i.l.bf16 %v1495_v41  ;;  %v1498_v25 = vunpack.i.h.bf16 %v1495_v41  ;;  %v6993_v45 = vpop.permute.xlu0 %2051 }
 0x305   :  { %v1921_v37 = vmax.f32 %v1919_v61, %v1920_v14  ;;  %v1452_v47 = vrot.slane %v1451_v20, 1  ;;  %v2007_v51 = vrot.slane %v2006_v52, 4  ;;  %v6983_v11 = vrot.slane %v1176_v4, %v6404_v13 }
 0x306   :  { %v1943_v32 = vmax.f32 %v1941_v8, %v1942_v50  ;;  %v1541_v36 = vrot.slane %v1540_v0, 2  ;;  %v1499_v17 = vmax.f32 %v1497_v43, %v1498_v25  ;;  %v960_v26 = vcombine.high %v6790_v63, %v6790_v63 }
 0x307   :  { %v6989_v42 = vpack.i.bf16 %v1921_v37, %v1921_v37  ;;  %v1453_v31 = vmax.f32 %v1451_v20, %v1452_v47  ;;  %v2008_v30 = vmax.f32 %v2006_v52, %v2007_v51  ;;  %v1989_v61 = vsel %vm1193_vm5, %v6983_v11, 4286644096 }
 0x308   :  { %v1944_v14 = vrot.slane %v1943_v32, 2  ;;  %v1542_v4 = vmax.f32 %v1540_v0, %v1541_v36  ;;  %v1500_v41 = vrot.slane %v1499_v17, 4  ;;  %v1991_v55 = vunpack.i.l.bf16 %v1989_v61 }
 0x309   :  { %8563 = vst [vmem:[#allocation35_spill] sm:$0xff] %v6989_v42  ;;  %2309 = vrot.lane.b32.xlu1 %v6989_v42, %s6169_s21  ;;  %v6997_v8 = vpack.i.bf16 %v1453_v31, %v1453_v31  ;;  %v2009_v50 = vrot.slane %v2008_v30, 2  ;;  %v1992_v63 = vunpack.i.h.bf16 %v1989_v61  ;;  %v7000_v37 = vrot.slane %v960_v26, %v6404_v13  ;;  %v7010_v31 = vpop.permute.xlu1 %2063 }
 0x30a   :  { %v1945_v51 = vmax.f32 %v1943_v32, %v1944_v14  ;;  %v1543_v20 = vrot.slane %v1542_v4, 1  ;;  %v1501_v52 = vmax.f32 %v1499_v17, %v1500_v41  ;;  %v1072_v43 = vcombine.high %v6793_v5, %v6793_v5 }
 0x30b   :  { %8564 = vst [vmem:[#allocation36_spill] sm:$0xff] %v6997_v8  ;;  %2291 = vrot.lane.b32.xlu0 %v6997_v8, %s6169_s21  ;;  %v2010_v0 = vmax.f32 %v2008_v30, %v2009_v50  ;;  %v1993_v25 = vmax.f32 %v1991_v55, %v1992_v63  ;;  %v1521_v47 = vsel %vm1193_vm5, %v7000_v37, 4286644096  ;;  %v999_v36 = vcombine.high %v6839_v33, %v6839_v33  ;;  %v7013_v8 = vpop.permute.xlu0 %2053 }
 0x30c   :  { %v1946_v26 = vrot.slane %v1945_v51, 1  ;;  %v1544_v32 = vmax.f32 %v1542_v4, %v1543_v20  ;;  %v1502_v61 = vrot.slane %v1501_v52, 2  ;;  %v1523_v17 = vunpack.i.l.bf16 %v1521_v47 }
 0x30d   :  { %v2011_v14 = vrot.slane %v2010_v0, 1  ;;  %v1994_v41 = vrot.slane %v1993_v25, 4  ;;  %v1524_v5 = vunpack.i.h.bf16 %v1521_v47  ;;  %v1755_v42 = vsel %vm1193_vm5, %v1072_v43, 4286644096 }
 0x30e   :  { %v1947_v55 = vmax.f32 %v1945_v51, %v1946_v26  ;;  %v7015_v30 = vpack.i.bf16 %v1544_v32, %v1544_v32  ;;  %v1503_v50 = vmax.f32 %v1501_v52, %v1502_v61  ;;  %v1757_v63 = vunpack.i.l.bf16 %v1755_v42 }
 0x30f   :  { %v2012_v38 = vmax.f32 %v2010_v0, %v2011_v14  ;;  %v1995_v33 = vmax.f32 %v1993_v25, %v1994_v41  ;;  %v1525_v40 = vmax.f32 %v1523_v17, %v1524_v5  ;;  %v1758_v48 = vunpack.i.h.bf16 %v1755_v42  ;;  %v7026_v0 = vpop.permute.xlu1 %2141 }
 0x310   :  { %8565 = vst [vmem:[#allocation37_spill] sm:$0xff] %v7015_v30  ;;  %v7017_v12 = vpack.i.bf16 %v1947_v55, %v1947_v55  ;;  %2215 = vrot.lane.b32.xlu0 %v7015_v30, %s6169_s21  ;;  %v1504_v4 = vrot.slane %v1503_v50, 1  ;;  %v1586_v20 = vsel %vm1193_vm5, %v999_v36, 4286644096  ;;  %v904_v43 = vcombine.high %v6861_v15, %v6861_v15  ;;  %v7031_v15 = vpop.permute.xlu0 %2205 }
 0x311   :  { %v7024_v51 = vpack.i.bf16 %v2012_v38, %v2012_v38  ;;  %v1996_v47 = vrot.slane %v1995_v33, 2  ;;  %v1526_v52 = vrot.slane %v1525_v40, 4  ;;  %v1759_v26 = vmax.f32 %v1757_v63, %v1758_v48 }
 0x312   :  { %2151 = vrot.lane.b32.xlu1 %v7017_v12, %s6169_s21  ;;  %v1505_v42 = vmax.f32 %v1503_v50, %v1504_v4  ;;  %v1588_v25 = vunpack.i.l.bf16 %v1586_v20  ;;  %v1589_v32 = vunpack.i.h.bf16 %v1586_v20  ;;  %v1391_v61 = vsel %vm1193_vm5, %v904_v43, 4286644096 }
 0x313   :  { %8566 = vst [vmem:[#allocation38_spill] sm:$0xff] %v7024_v51  ;;  %v1997_v17 = vmax.f32 %v1995_v33, %v1996_v47  ;;  %v1527_v36 = vmax.f32 %v1525_v40, %v1526_v52  ;;  %v1760_v14 = vrot.slane %v1759_v26, 4  ;;  %v1393_v41 = vunpack.i.l.bf16 %v1391_v61  ;;  %v7044_v52 = vpop.permute.xlu1 %2049 }
 0x314   :  { %v7033_v38 = vpack.i.bf16 %v1505_v42, %v1505_v42  ;;  %v1590_v5 = vmax.f32 %v1588_v25, %v1589_v32  ;;  %v1394_v48 = vunpack.i.h.bf16 %v1391_v61  ;;  %v984_v55 = vcombine.high %v6832_v3, %v6832_v3 }
 0x315   :  { %v1998_v63 = vrot.slane %v1997_v17, 1  ;;  %v1528_v30 = vrot.slane %v1527_v36, 2  ;;  %v1761_v50 = vmax.f32 %v1759_v26, %v1760_v14 }
 0x316   :  { %8567 = vst [vmem:[#allocation39_spill] sm:$0xff] %v7033_v38  ;;  %2233 = vrot.lane.b32.xlu1 %v7024_v51, %s6169_s21  ;;  %2293 = vrot.lane.b32.xlu0 %v7033_v38, %s6169_s21  ;;  %v1591_v40 = vrot.slane %v1590_v5, 4  ;;  %v1395_v33 = vmax.f32 %v1393_v41, %v1394_v48  ;;  %v7042_v4 = vrot.slane %v984_v55, %v6404_v13  ;;  %v7050_v38 = vpop.permute.xlu0 %2047 }
 0x317   :  { %v1999_v20 = vmax.f32 %v1997_v17, %v1998_v63  ;;  %v1529_v43 = vmax.f32 %v1527_v36, %v1528_v30  ;;  %v1762_v47 = vrot.slane %v1761_v50, 2  ;;  %v1096_v36 = vcombine.high %v6879_v29, %v6879_v29 }
 0x318   :  { %v1592_v3 = vmax.f32 %v1590_v5, %v1591_v40  ;;  %v1396_v42 = vrot.slane %v1395_v33, 4  ;;  %v1573_v26 = vsel %vm1193_vm5, %v7042_v4, 4286644096 }
 0x319   :  { %v7048_v25 = vpack.i.bf16 %v1999_v20, %v1999_v20  ;;  %v1530_v32 = vrot.slane %v1529_v43, 1  ;;  %v1763_v61 = vmax.f32 %v1761_v50, %v1762_v47  ;;  %v1575_v14 = vunpack.i.l.bf16 %v1573_v26 }
 0x31a   :  { %v1593_v41 = vrot.slane %v1592_v3, 2  ;;  %v1397_v48 = vmax.f32 %v1395_v33, %v1396_v42  ;;  %v1576_v55 = vunpack.i.h.bf16 %v1573_v26  ;;  %v880_v50 = vcombine.high %v6888_v24, %v6888_v24  ;;  %v7061_v42 = vpop.permute.xlu1 %2065 }
 0x31b   :  { %8568 = vst [vmem:[#allocation40_spill] sm:$0xff] %v7048_v25  ;;  %2153 = vrot.lane.b32.xlu1 %v7048_v25, %s6169_s21  ;;  %v1531_v30 = vmax.f32 %v1529_v43, %v1530_v32  ;;  %v1764_v17 = vrot.slane %v1763_v61, 1  ;;  %v1807_v33 = vsel %vm1193_vm5, %v1096_v36, 4286644096  ;;  %v7068_v24 = vpop.permute.xlu0 %2125 }
 0x31c   :  { %v1594_v5 = vmax.f32 %v1592_v3, %v1593_v41  ;;  %v1398_v63 = vrot.slane %v1397_v48, 2  ;;  %v1577_v40 = vmax.f32 %v1575_v14, %v1576_v55  ;;  %v1809_v32 = vunpack.i.l.bf16 %v1807_v33  ;;  %8571 = vst [vmem:[#allocation43_spill] sm:$0xff] %v7068_v24 }
 0x31d   :  { %v7058_v20 = vpack.i.bf16 %v1531_v30, %v1531_v30  ;;  %v1765_v47 = vmax.f32 %v1763_v61, %v1764_v17  ;;  %v1810_v3 = vunpack.i.h.bf16 %v1807_v33  ;;  %v1339_v14 = vsel %vm1193_vm5, %v880_v50, 4286644096 }
 0x31e   :  { %v1595_v26 = vrot.slane %v1594_v5, 1  ;;  %v1399_v13 = vmax.f32 %v1397_v48, %v1398_v63  ;;  %v1578_v43 = vrot.slane %v1577_v40, 4  ;;  %v1341_v30 = vunpack.i.l.bf16 %v1339_v14  ;;  %v7078_v33 = vpop.permute.xlu1 %2227 }
 0x31f   :  { %8569 = vst [vmem:[#allocation41_spill] sm:$0xff] %v7058_v20  ;;  %2135 = vrot.lane.b32.xlu0 %v7058_v20, %s6169_s21  ;;  %v7065_v29 = vpack.i.bf16 %v1765_v47, %v1765_v47  ;;  %v1811_v48 = vmax.f32 %v1809_v32, %v1810_v3  ;;  %v1342_v17 = vunpack.i.h.bf16 %v1339_v14  ;;  %v1168_v50 = vcombine.high %v6955_v60, %v6955_v60  ;;  %v7086_v14 = vpop.permute.xlu0 %2203 }
 0x320   :  { %v1596_v41 = vmax.f32 %v1594_v5, %v1595_v26  ;;  %v1400_v61 = vrot.slane %v1399_v13, 1  ;;  %v1579_v55 = vmax.f32 %v1577_v40, %v1578_v43  ;;  %v976_v5 = vcombine.high %v7000_v37, %v7000_v37 }
 0x321   :  { %8570 = vst [vmem:[#allocation42_spill] sm:$0xff] %v7065_v29  ;;  %2303 = vrot.lane.b32.xlu1 %v7065_v29, %s6169_s21  ;;  %v1812_v47 = vrot.slane %v1811_v48, 4  ;;  %v1343_v25 = vmax.f32 %v1341_v30, %v1342_v17 }
 0x322   :  { %v7072_v36 = vpack.i.bf16 %v1596_v41, %v1596_v41  ;;  %v1401_v63 = vmax.f32 %v1399_v13, %v1400_v61  ;;  %v1580_v20 = vrot.slane %v1579_v55, 2  ;;  %v1963_v13 = vsel %vm1193_vm5, %v1168_v50, 4286644096 }
 0x323   :  { %v1813_v43 = vmax.f32 %v1811_v48, %v1812_v47  ;;  %v1344_v32 = vrot.slane %v1343_v25, 4  ;;  %v1547_v3 = vsel %vm1193_vm5, %v976_v5, 4286644096  ;;  %v1965_v37 = vunpack.i.l.bf16 %v1963_v13  ;;  %v7092_v5 = vpop.permute.xlu1 %2147 }
 0x324   :  { %8572 = vst [vmem:[#allocation44_spill] sm:$0xff] %v7072_v36  ;;  %2217 = vrot.lane.b32.xlu0 %v7072_v36, %s6169_s21  ;;  %v7082_v40 = vpack.i.bf16 %v1401_v63, %v1401_v63  ;;  %v1581_v26 = vmax.f32 %v1579_v55, %v1580_v20  ;;  %v1966_v41 = vunpack.i.h.bf16 %v1963_v13  ;;  %v1549_v17 = vunpack.i.l.bf16 %v1547_v3 }
 0x325   :  { %v1814_v61 = vrot.slane %v1813_v43, 2  ;;  %v1345_v30 = vmax.f32 %v1343_v25, %v1344_v32  ;;  %v1550_v63 = vunpack.i.h.bf16 %v1547_v3  ;;  %v1192_v50 = vcombine.high %v6983_v11, %v6983_v11  ;;  %v7097_v32 = vpop.permute.xlu0 %2219 }
 0x326   :  { %8573 = vst [vmem:[#allocation45_spill] sm:$0xff] %v7082_v40  ;;  %2289 = vrot.lane.b32.xlu1 %v7082_v40, %s6169_s21  ;;  %v1582_v60 = vrot.slane %v1581_v26, 1  ;;  %v1967_v20 = vmax.f32 %v1965_v37, %v1966_v41 }
 0x327   :  { %v1815_v55 = vmax.f32 %v1813_v43, %v1814_v61  ;;  %v1346_v48 = vrot.slane %v1345_v30, 2  ;;  %v1551_v47 = vmax.f32 %v1549_v17, %v1550_v63  ;;  %v2015_v25 = vsel %vm1193_vm5, %v1192_v50, 4286644096  ;;  %v7106_v50 = vpop.permute.xlu1 %2229 }
 0x328   :  { %v1583_v29 = vmax.f32 %v1581_v26, %v1582_v60  ;;  %v1968_v40 = vrot.slane %v1967_v20, 4  ;;  %v2017_v43 = vunpack.i.l.bf16 %v2015_v25  ;;  %v2018_v3 = vunpack.i.h.bf16 %v2015_v25 }
 0x329   :  { %v1816_v24 = vrot.slane %v1815_v55, 1  ;;  %v1347_v51 = vmax.f32 %v1345_v30, %v1346_v48  ;;  %v1552_v13 = vrot.slane %v1551_v47, 4 }
 0x32a   :  { %v7094_v36 = vpack.i.bf16 %v1583_v29, %v1583_v29  ;;  %v1969_v26 = vmax.f32 %v1967_v20, %v1968_v40  ;;  %v1000_v29 = vcombine.high %v7042_v4, %v7042_v4  ;;  %v2019_v61 = vmax.f32 %v2017_v43, %v2018_v3 }
 0x32b   :  { %v1817_v60 = vmax.f32 %v1815_v55, %v1816_v24  ;;  %v1348_v11 = vrot.slane %v1347_v51, 1  ;;  %v1553_v37 = vmax.f32 %v1551_v47, %v1552_v13  ;;  %v7112_v55 = vpop.permute.xlu0 %2123 }
 0x32c   :  { %8574 = vst [vmem:[#allocation46_spill] sm:$0xff] %v7094_v36  ;;  %2137 = vrot.lane.b32.xlu0 %v7094_v36, %s6169_s21  ;;  %v1970_v41 = vrot.slane %v1969_v26, 2  ;;  %v1599_v48 = vsel %vm1193_vm5, %v1000_v29, 4286644096  ;;  %v2020_v40 = vrot.slane %v2019_v61, 4 }
 0x32d   :  { %v7103_v30 = vpack.i.bf16 %v1817_v60, %v1817_v60  ;;  %v1349_v17 = vmax.f32 %v1347_v51, %v1348_v11  ;;  %v1554_v63 = vrot.slane %v1553_v37, 2  ;;  %v1601_v20 = vunpack.i.l.bf16 %v1599_v48 }
 0x32e   :  { %v1971_v36 = vmax.f32 %v1969_v26, %v1970_v41  ;;  %v1602_v25 = vunpack.i.h.bf16 %v1599_v48  ;;  %v2021_v13 = vmax.f32 %v2019_v61, %v2020_v40  ;;  %v2101_v61 = vmax.bf16 %v7010_v31, %v6623_v46 }
 0x32f   :  { %2305 = vrot.lane.b32.xlu1 %v7103_v30, %s6169_s21  ;;  %v7110_v24 = vpack.i.bf16 %v1349_v17, %v1349_v17  ;;  %v1555_v4 = vmax.f32 %v1553_v37, %v1554_v63  ;;  %v2100_v37 = vmax.bf16 %v6926_v22, %v6513_v59  ;;  %v2102_v46 = vmax.bf16 %v7061_v42, %v6677_v10 }
 0x330   :  { %v1972_v47 = vrot.slane %v1971_v36, 1  ;;  %v1603_v51 = vmax.f32 %v1601_v20, %v1602_v25  ;;  %v2022_v26 = vrot.slane %v2021_v13, 2  ;;  %v2099_v25 = vmax.bf16 %v6973_v21, %v6539_v19 }
 0x331   :  { %2287 = vrot.lane.b32.xlu0 %v7110_v24, %s6169_s21  ;;  %v1556_v43 = vrot.slane %v1555_v4, 1  ;;  %v2372_v22 = vunpack.c.l.b16 %v2100_v37  ;;  %v2104_v10 = vmax.bf16 %v6967_v58, %v6548_v34 }
 0x332   :  { %v1973_v3 = vmax.f32 %v1971_v36, %v1972_v47  ;;  %v1604_v60 = vrot.slane %v1603_v51, 4  ;;  %v2072_v29 = vpop.permute.xlu1 %2071  ;;  %v2023_v48 = vmax.f32 %v2021_v13, %v2022_v26  ;;  %v2373_v47 = vunpack.c.l.b16 %v2101_v61 }
 0x333   :  { %v1557_v11 = vmax.f32 %v1555_v4, %v1556_v43  ;;  %v7124_v40 = vpop.permute.xlu0 %2139  ;;  %v2103_v43 = vmax.bf16 %v6940_v53, %v6537_v2  ;;  %v2400_v21 = vrot.slane %v2372_v22, 7  ;;  %v2105_v61 = vmax.bf16 %v2072_v29, %v6765_v54 }
 0x334   :  { %v7116_v41 = vpack.i.bf16 %v1973_v3, %v1973_v3  ;;  %v1605_v17 = vmax.f32 %v1603_v51, %v1604_v60  ;;  %v2024_v36 = vrot.slane %v2023_v48, 1  ;;  %v2374_v3 = vunpack.c.l.b16 %v2102_v46 }
 0x335   :  { %v7120_v63 = vpack.i.bf16 %v1557_v11, %v1557_v11  ;;  %v2371_v60 = vunpack.c.l.b16 %v2099_v25  ;;  %v2402_v11 = vrot.slane %v2373_v47, 6  ;;  %v2376_v34 = vunpack.c.l.b16 %v2104_v10 }
 0x336   :  { %2311 = vrot.lane.b32.xlu1 %v7116_v41, %s6169_s21  ;;  %v1606_v20 = vrot.slane %v1605_v17, 2  ;;  %v2025_v4 = vmax.f32 %v2023_v48, %v2024_v36  ;;  %v7134_v31 = vpop.permute.xlu1 %2149  ;;  %v2404_v48 = vrot.slane %v2374_v3, 5  ;;  %v2093_v54 = vmax.bf16 %v7050_v38, %v6668_v28 }
 0x337   :  { %2295 = vrot.lane.b32.xlu0 %v7120_v63, %s6169_s21  ;;  %v7140_v26 = vpop.permute.xlu0 %2211  ;;  %v2401_v53 = vsel %vm2380_vm7, %v2400_v21, %v2371_v60  ;;  %v2408_v46 = vrot.slane %v2376_v34, 3  ;;  %v2092_v29 = vmax.bf16 %v6930_v7, %v6515_v1  ;;  %v2091_v21 = vmax.bf16 %v6950_v27, %v6522_v6 }
 0x338   :  { %v1607_v59 = vmax.f32 %v1605_v17, %v1606_v20  ;;  %v7136_v13 = vpack.i.bf16 %v2025_v4, %v2025_v4  ;;  %v2375_v17 = vunpack.c.l.b16 %v2103_v43  ;;  %v2403_v37 = vsel %vm2383_vm6, %v2402_v11, %v2401_v53 }
 0x339   :  { %v2405_v58 = vsel %vm2386_vm8, %v2404_v48, %v2403_v37  ;;  %v2377_v4 = vunpack.c.l.b16 %v2105_v61  ;;  %v2094_v11 = vmax.bf16 %v7044_v52, %v6661_v39  ;;  %v2365_v48 = vunpack.c.l.b16 %v2093_v54 }
 0x33a   :  { %v1608_v51 = vrot.slane %v1607_v59, 1  ;;  %2313 = vrot.lane.b32.xlu1 %v7136_v13, %s6169_s21  ;;  %v2406_v25 = vrot.slane %v2375_v17, 4  ;;  %v2364_v38 = vunpack.c.l.b16 %v2092_v29  ;;  %v2363_v1 = vunpack.c.l.b16 %v2091_v21 }
 0x33b   :  { %v2410_v47 = vrot.slane %v2377_v4, 2  ;;  %v2366_v7 = vunpack.c.l.b16 %v2094_v11  ;;  %v2382_v53 = vrot.slane %v2365_v48, 6  ;;  %v2096_v61 = vmax.bf16 %v7013_v8, %v6635_v62 }
 0x33c   :  { %v1609_v19 = vmax.f32 %v1607_v59, %v1608_v51  ;;  %v2407_v22 = vsel %vm2389_vm9, %v2406_v25, %v2405_v58  ;;  %v2379_v6 = vrot.slane %v2364_v38, 7 }
 0x33d   :  { %v2074_v2 = vpop.permute.xlu1 %2073  ;;  %v2385_v34 = vrot.slane %v2366_v7, 5  ;;  %v2368_v4 = vunpack.c.l.b16 %v2096_v61  ;;  %v8576_v61 = vld [vmem:[#allocation16_spill] sm:$0xff] }
 0x33e   :  { %v7146_v42 = vpack.i.bf16 %v1609_v19, %v1609_v19  ;;  %v7153_v36 = vpop.permute.xlu0 %2131  ;;  %v2106_v20 = vmax.bf16 %v2074_v2, %v6805_v9  ;;  %v2409_v9 = vsel %vm2392_vm10, %v2408_v46, %v2407_v22  ;;  %v2095_v2 = vmax.bf16 %v6993_v45, %v6619_v23 }
 0x33f   :  { %v2411_v60 = vsel %vm2395_vm11, %v2410_v47, %v2409_v9  ;;  %v2381_v37 = vsel %vm2380_vm7, %v2379_v6, %v2363_v1  ;;  %v8575_v6 = vld [vmem:[#allocation9_spill] sm:$0xff] }
 0x340   :  { %2297 = vrot.lane.b32.xlu0 %v7146_v42, %s6169_s21  ;;  %v2378_v59 = vunpack.c.l.b16 %v2106_v20  ;;  %v2367_v58 = vunpack.c.l.b16 %v2095_v2  ;;  %v2384_v20 = vsel %vm2383_vm6, %v2382_v53, %v2381_v37 }
 0x341   :  { %v2224_v43 = vpop.permute.xlu1 %2223  ;;  %v2387_v23 = vsel %vm2386_vm8, %v2385_v34, %v2384_v20  ;;  %v2259_v34 = vmax.bf16 %v7097_v32, %v8576_v61 }
 0x342   :  { %v2412_v51 = vrot.slane %v2378_v59, 1  ;;  %v2388_v45 = vrot.slane %v2367_v58, 4  ;;  %v2261_v53 = vmax.bf16 %v2224_v43, %v6811_v56  ;;  %v8578_v56 = vld [vmem:[#allocation13_spill] sm:$0xff]  ;;  %v8579_v43 = vld [vmem:[#allocation11_spill] sm:$0xff] }
 0x343   :  { %v2252_v32 = vmax.bf16 %v7031_v15, %v8579_v43 }
 0x344   :  { %v7158_v3 = vpop.permute.xlu0 %2213  ;;  %v2413_v19 = vsel %vm2398_vm12, %v2412_v51, %v2411_v60  ;;  %v2390_v46 = vsel %vm2389_vm9, %v2388_v45, %v2387_v23  ;;  %v2391_v51 = vrot.slane %v2368_v4, 3  ;;  %v2516_v58 = vunpack.c.l.b16 %v2261_v53  ;;  %v8577_v4 = vld [vmem:[#allocation10_spill] sm:$0xff] }
 0x345   :  { %v7171_v10 = vpack.c.b16 %v2413_v19, %v2413_v19  ;;  %v2180_v23 = vmax.bf16 %v7026_v0, %v8577_v4 }
 0x346   :  { %v2393_v8 = vsel %vm2392_vm10, %v2391_v51, %v2390_v46  ;;  %v8580_v46 = vld [vmem:[#allocation17_spill] sm:$0xff] }
 0x347   :  { %2418 = vrot.lane.b32.xlu1 %v7171_v10, %s6169_s21  ;;  %v2264_v51 = vmax.bf16 %v7106_v50, %v8580_v46 }
 0x348   :  { %v7173_v28 = vpop.permute.xlu1 %2301 }
 0x349   :  { %v2519_v50 = vunpack.c.l.b16 %v2264_v51 }
 0x34b   :  { %v2544_v51 = vrot.slane %v2519_v50, 3 }
 0x34d   :  { %v2144_v39 = vpop.permute.xlu1 %2143 }
 0x34e   :  { %v2181_v45 = vmax.bf16 %v2144_v39, %v6850_v44  ;;  %v8582_v44 = vld [vmem:[#allocation33_spill] sm:$0xff] }
 0x34f   :  { %v2056_v17 = vpop.permute.xlu0 %2055 }
 0x350   :  { %v2097_v27 = vmax.bf16 %v2056_v17, %v6854_v49 }
 0x352   :  { %v2369_v25 = vunpack.c.l.b16 %v2097_v27  ;;  %v2260_v27 = vmax.bf16 %v6985_v35, %v8575_v6  ;;  %v2263_v35 = vmax.bf16 %v7078_v33, %v8578_v56  ;;  %v8583_v6 = vld [vmem:[#allocation15_spill] sm:$0xff] }
 0x353   :  { %v7180_v52 = vpop.permute.xlu0 %2133  ;;  %v7187_v59 = vpop.permute.xlu1 %2209  ;;  %v2183_v15 = vmax.bf16 %v7092_v5, %v8583_v6  ;;  %v8585_v5 = vld [vmem:[#allocation14_spill] sm:$0xff] }
 0x354   :  { %v2394_v47 = vrot.slane %v2369_v25, 2  ;;  %v2515_v25 = vunpack.c.l.b16 %v2260_v27  ;;  %v2518_v33 = vunpack.c.l.b16 %v2263_v35  ;;  %v2251_v56 = vmax.bf16 %v7086_v14, %v8585_v5  ;;  %v8586_v35 = vld [vmem:[#allocation20_spill] sm:$0xff] }
 0x355   :  { %v2448_v46 = vunpack.c.l.b16 %v2183_v15 }
 0x356   :  { %v2396_v29 = vsel %vm2395_vm11, %v2394_v47, %v2393_v8  ;;  %v2514_v47 = vunpack.c.l.b16 %v2259_v34  ;;  %v2536_v8 = vrot.slane %v2515_v25, 7 }
 0x357   :  { %v2472_v15 = vrot.slane %v2448_v46, 4 }
 0x358   :  { %v2226_v9 = vpop.permute.xlu1 %2225  ;;  %v2537_v27 = vsel %vm2380_vm7, %v2536_v8, %v2514_v47  ;;  %v8588_v8 = vld [vmem:[#allocation26_spill] sm:$0xff] }
 0x359   :  { %v2262_v37 = vmax.bf16 %v2226_v9, %v6891_v18  ;;  %v2445_v9 = vunpack.c.l.b16 %v2180_v23  ;;  %v2254_v14 = vmax.bf16 %v7187_v59, %v8588_v8 }
 0x35a   :  { %v2058_v49 = vpop.permute.xlu0 %2057 }
 0x35b   :  { %v2098_v22 = vmax.bf16 %v2058_v49, %v6893_v57  ;;  %v2517_v49 = vunpack.c.l.b16 %v2262_v37  ;;  %v2466_v25 = vrot.slane %v2445_v9, 7 }
 0x35d   :  { %v2370_v54 = vunpack.c.l.b16 %v2098_v22 }
 0x35e   :  { %v7193_v60 = vpop.permute.xlu0 %2207 }
 0x35f   :  { %v2397_v62 = vrot.slane %v2370_v54, 1  ;;  %v8581_v54 = vld [vmem:[#allocation19_spill] sm:$0xff] }
 0x360   :  { %v2179_v0 = vmax.bf16 %v7124_v40, %v8581_v54 }
 0x361   :  { %v2399_v19 = vsel %vm2398_vm12, %v2397_v62, %v2396_v29  ;;  %v2538_v62 = vrot.slane %v2516_v58, 6  ;;  %v2446_v29 = vunpack.c.l.b16 %v2181_v45 }
 0x362   :  { %v7196_v21 = vpack.c.b16 %v2399_v19, %v2399_v19  ;;  %v2540_v19 = vrot.slane %v2517_v49, 5  ;;  %v2444_v40 = vunpack.c.l.b16 %v2179_v0  ;;  %v2542_v49 = vrot.slane %v2518_v33, 4  ;;  %v8590_v33 = vld [vmem:[#allocation43_spill] sm:$0xff] }
 0x363   :  { %v7200_v57 = vpop.permute.xlu1 %2129  ;;  %v2539_v61 = vsel %vm2383_vm6, %v2538_v62, %v2537_v27  ;;  %v2468_v4 = vrot.slane %v2446_v29, 6  ;;  %v8591_v27 = vld [vmem:[#allocation21_spill] sm:$0xff] }
 0x364   :  { %2416 = vrot.lane.b32.xlu0 %v7196_v21, %s6169_s21  ;;  %v2541_v23 = vsel %vm2386_vm8, %v2540_v19, %v2539_v61  ;;  %v2467_v0 = vsel %vm2380_vm7, %v2466_v25, %v2444_v40  ;;  %v8589_v19 = vld [vmem:[#allocation12_spill] sm:$0xff]  ;;  %v2255_v50 = vmax.bf16 %v7140_v26, %v8591_v27  ;;  %v8594_v26 = vld [vmem:[#allocation37_spill] sm:$0xff] }
 0x365   :  { %v7202_v11 = vpop.permute.xlu0 %2285  ;;  %v2543_v62 = vsel %vm2389_vm9, %v2542_v49, %v2541_v23  ;;  %v8593_v25 = vld [vmem:[#allocation40_spill] sm:$0xff] }
 0x36a   :  { %v2146_v48 = vpop.permute.xlu1 %2145 }
 0x36b   :  { %v2182_v18 = vmax.bf16 %v2146_v48, %v6932_v16  ;;  %v2507_v48 = vunpack.c.l.b16 %v2252_v32 }
 0x36c   :  { %v7204_v38 = vpop.permute.xlu0 %2127 }
 0x36d   :  { %v2447_v53 = vunpack.c.l.b16 %v2182_v18  ;;  %v2184_v18 = vmax.bf16 %v7134_v31, %v8586_v35  ;;  %v2522_v47 = vrot.slane %v2507_v48, 7 }
 0x36e   :  { %v7206_v17 = vpop.permute.xlu1 %2307 }
 0x36f   :  { %v2470_v43 = vrot.slane %v2447_v53, 5  ;;  %v2172_v53 = vmax.bf16 %v8590_v33, %v8589_v19  ;;  %v2449_v48 = vunpack.c.l.b16 %v2184_v18 }
 0x371   :  { %v7208_v1 = vpop.permute.xlu0 %2283  ;;  %v2474_v35 = vrot.slane %v2449_v48, 3 }
 0x373   :  { %v2232_v7 = vpop.permute.xlu1 %2231 }
 0x374   :  { %v2265_v39 = vmax.bf16 %v2232_v7, %v8582_v44  ;;  %v8584_v7 = vld [vmem:[#allocation27_spill] sm:$0xff] }
 0x375   :  { %v2253_v34 = vmax.bf16 %v7193_v60, %v8584_v7  ;;  %v8587_v60 = vld [vmem:[#allocation38_spill] sm:$0xff]  ;;  %v2545_v7 = vsel %vm2392_vm10, %v2544_v51, %v2543_v62 }
 0x376   :  { %v7210_v2 = vpop.permute.xlu0 %2299  ;;  %v2520_v58 = vunpack.c.l.b16 %v2265_v39  ;;  %v2469_v39 = vsel %vm2383_vm6, %v2468_v4, %v2467_v0 }
 0x377   :  { %v2508_v44 = vunpack.c.l.b16 %v2253_v34  ;;  %v2471_v6 = vsel %vm2386_vm8, %v2470_v43, %v2469_v39  ;;  %v8592_v34 = vld [vmem:[#allocation30_spill] sm:$0xff] }
 0x378   :  { %v2473_v49 = vsel %vm2389_vm9, %v2472_v15, %v2471_v6  ;;  %v8598_v15 = vld [vmem:[#allocation22_spill] sm:$0xff] }
 0x379   :  { %v2524_v59 = vrot.slane %v2508_v44, 6  ;;  %v2475_v39 = vsel %vm2392_vm10, %v2474_v35, %v2473_v49  ;;  %v2175_v27 = vmax.bf16 %v7153_v36, %v8598_v15  ;;  %v8601_v49 = vld [vmem:[#allocation25_spill] sm:$0xff] }
 0x37a   :  { %v2176_v36 = vmax.bf16 %v7180_v52, %v8601_v49 }
 0x37b   :  { %v7218_v20 = vpop.permute.xlu1 %2309 }
 0x37d   :  { %v7223_v22 = vpop.permute.xlu0 %2291 }
 0x382   :  { %v7238_v37 = vpop.permute.xlu0 %2215 }
 0x383   :  { %v2257_v18 = vmax.bf16 %v7238_v37, %v8594_v26  ;;  %v2437_v37 = vunpack.c.l.b16 %v2172_v53 }
 0x384   :  { %v2152_v16 = vpop.permute.xlu1 %2151 }
 0x385   :  { %v2185_v45 = vmax.bf16 %v2152_v16, %v7017_v12  ;;  %v2546_v12 = vrot.slane %v2520_v58, 2  ;;  %v2506_v16 = vunpack.c.l.b16 %v2251_v56  ;;  %v2173_v58 = vmax.bf16 %v7204_v38, %v8592_v34  ;;  %v8595_v38 = vld [vmem:[#allocation18_spill] sm:$0xff] }
 0x386   :  { %v2171_v51 = vmax.bf16 %v7112_v55, %v8595_v38 }
 0x387   :  { %v2450_v9 = vunpack.c.l.b16 %v2185_v45  ;;  %v2547_v23 = vsel %vm2395_vm11, %v2546_v12, %v2545_v7  ;;  %v2509_v45 = vunpack.c.l.b16 %v2254_v14  ;;  %v2523_v46 = vsel %vm2380_vm7, %v2522_v47, %v2506_v16  ;;  %v8597_v47 = vld [vmem:[#allocation28_spill] sm:$0xff] }
 0x388   :  { %v2234_v32 = vpop.permute.xlu1 %2233  ;;  %v7255_v29 = vpop.permute.xlu0 %2293  ;;  %v2525_v44 = vsel %vm2383_vm6, %v2524_v59, %v2523_v46  ;;  %v2438_v12 = vunpack.c.l.b16 %v2173_v58  ;;  %v2436_v19 = vunpack.c.l.b16 %v2171_v51  ;;  %v2441_v51 = vunpack.c.l.b16 %v2176_v36 }
 0x389   :  { %v2266_v54 = vmax.bf16 %v2234_v32, %v8587_v60  ;;  %v2476_v5 = vrot.slane %v2450_v9, 2  ;;  %v2510_v60 = vunpack.c.l.b16 %v2255_v50  ;;  %v2526_v14 = vrot.slane %v2509_v45, 5 }
 0x38a   :  { %v2174_v9 = vmax.bf16 %v7200_v57, %v8597_v47  ;;  %v2454_v50 = vrot.slane %v2438_v12, 6  ;;  %v8599_v57 = vld [vmem:[#allocation44_spill] sm:$0xff]  ;;  %v8602_v12 = vld [vmem:[#allocation46_spill] sm:$0xff] }
 0x38b   :  { %v2521_v31 = vunpack.c.l.b16 %v2266_v54  ;;  %v8596_v54 = vld [vmem:[#allocation23_spill] sm:$0xff]  ;;  %v2477_v55 = vsel %vm2395_vm11, %v2476_v5, %v2475_v39  ;;  %v2527_v16 = vsel %vm2386_vm8, %v2526_v14, %v2525_v44  ;;  %v2528_v6 = vrot.slane %v2510_v60, 4  ;;  %v8603_v14 = vld [vmem:[#allocation42_spill] sm:$0xff] }
 0x38c   :  { %v2256_v0 = vmax.bf16 %v7158_v3, %v8596_v54 }
 0x38d   :  { %v2548_v40 = vrot.slane %v2521_v31, 1  ;;  %v2154_v61 = vpop.permute.xlu1 %2153  ;;  %v2512_v31 = vunpack.c.l.b16 %v2257_v18  ;;  %v2529_v34 = vsel %vm2389_vm9, %v2528_v6, %v2527_v16  ;;  %v8606_v16 = vld [vmem:[#allocation34_spill] sm:$0xff] }
 0x38e   :  { %v2186_v4 = vmax.bf16 %v2154_v61, %v8593_v25  ;;  %v2511_v33 = vunpack.c.l.b16 %v2256_v0  ;;  %v2439_v61 = vunpack.c.l.b16 %v2174_v9  ;;  %v8600_v25 = vld [vmem:[#allocation41_spill] sm:$0xff]  ;;  %v8604_v9 = vld [vmem:[#allocation24_spill] sm:$0xff] }
 0x38f   :  { %v2549_v56 = vsel %vm2398_vm12, %v2548_v40, %v2547_v23  ;;  %v2452_v40 = vrot.slane %v2437_v37, 7  ;;  %v2532_v58 = vrot.slane %v2512_v31, 2  ;;  %v2460_v31 = vrot.slane %v2441_v51, 3 }
 0x390   :  { %v2451_v43 = vunpack.c.l.b16 %v2186_v4  ;;  %v7271_v32 = vpack.c.b16 %v2549_v56, %v2549_v56  ;;  %v2530_v45 = vrot.slane %v2511_v33, 3  ;;  %v2440_v56 = vunpack.c.l.b16 %v2175_v27 }
 0x391   :  { %v2136_v62 = vpop.permute.xlu0 %2135  ;;  %v2453_v23 = vsel %vm2380_vm7, %v2452_v40, %v2436_v19  ;;  %v2456_v26 = vrot.slane %v2439_v61, 5  ;;  %v8605_v19 = vld [vmem:[#allocation29_spill] sm:$0xff] }
 0x392   :  { %v2478_v8 = vrot.slane %v2451_v43, 1  ;;  %2554 = vrot.lane.b32.xlu1 %v7271_v32, %s6169_s21  ;;  %v2177_v4 = vmax.bf16 %v2136_v62, %v8600_v25  ;;  %v2455_v35 = vsel %vm2383_vm6, %v2454_v50, %v2453_v23  ;;  %v2531_v18 = vsel %vm2392_vm10, %v2530_v45, %v2529_v34  ;;  %v8607_v50 = vld [vmem:[#allocation31_spill] sm:$0xff]  ;;  %v8609_v45 = vld [vmem:[#allocation45_spill] sm:$0xff] }
 0x393   :  { %v2304_v7 = vpop.permute.xlu1 %2303  ;;  %v2533_v46 = vsel %vm2395_vm11, %v2532_v58, %v2531_v18  ;;  %v2457_v60 = vsel %vm2386_vm8, %v2456_v26, %v2455_v35  ;;  %v2458_v52 = vrot.slane %v2440_v56, 4  ;;  %v2332_v33 = vmax.bf16 %v7202_v11, %v8605_v19  ;;  %v8610_v35 = vld [vmem:[#allocation35_spill] sm:$0xff]  ;;  %v8611_v18 = vld [vmem:[#allocation36_spill] sm:$0xff] }
 0x394   :  { %v2479_v3 = vsel %vm2398_vm12, %v2478_v8, %v2477_v55  ;;  %v2442_v38 = vunpack.c.l.b16 %v2177_v4  ;;  %v2341_v47 = vmax.bf16 %v2304_v7, %v8603_v14  ;;  %v2340_v55 = vmax.bf16 %v7173_v28, %v8604_v9 }
 0x395   :  { %v2481_v48 = vpack.c.b16 %v2479_v3, %v2479_v3  ;;  %v2459_v8 = vsel %vm2389_vm9, %v2458_v52, %v2457_v60  ;;  %v2573_v4 = vunpack.c.l.b16 %v2332_v33 }
 0x396   :  { %v2218_v53 = vpop.permute.xlu0 %2217  ;;  %v2462_v37 = vrot.slane %v2442_v38, 2  ;;  %v2461_v6 = vsel %vm2392_vm10, %v2460_v31, %v2459_v8  ;;  %v2582_v61 = vunpack.c.l.b16 %v2341_v47  ;;  %v2581_v7 = vunpack.c.l.b16 %v2340_v55 }
 0x397   :  { %v2258_v59 = vmax.bf16 %v2218_v53, %v8599_v57  ;;  %2484 = vrot.lane.b32.xlu1 %v2481_v48, %s6170_s22  ;;  %v2343_v53 = vmax.bf16 %v7206_v17, %v8607_v50  ;;  %v8608_v57 = vld [vmem:[#allocation32_spill] sm:$0xff]  ;;  %v2588_v38 = vrot.slane %v2573_v4, 7  ;;  %v5919_v4 = vld [vmem:[%s8482_s4 + $0x14] ss:$8 sps:$4 sm:$0xff]  }
 0x398   :  { %v2290_v54 = vpop.permute.xlu1 %2289  ;;  %v2463_v40 = vsel %vm2395_vm11, %v2462_v37, %v2461_v6  ;;  %v2604_v36 = vrot.slane %v2582_v61, 6 }
 0x399   :  { %v2513_v5 = vunpack.c.l.b16 %v2258_v59  ;;  %v2331_v59 = vmax.bf16 %v7208_v1, %v8608_v57  ;;  %v2334_v17 = vmax.bf16 %v2290_v54, %v8609_v45  ;;  %v2584_v49 = vunpack.c.l.b16 %v2343_v53  ;;  %v5917_v45 = vld [vmem:[%s8482_s4 + $0x10] ss:$8 sps:$4 sm:$0xff]  }
 0x39a   :  { %v2344_v1 = vmax.bf16 %v7218_v20, %v8610_v35  ;;  %v5943_v35 = vld [vmem:[%s8482_s4 + $0x324] ss:$8 sps:$4 sm:$0xff]  }
 0x39b   :  { %v2534_v43 = vrot.slane %v2513_v5, 1  ;;  %2488 = vrot.lane.b32.xlu1 %v2481_v48, %s6168_s0  ;;  %v2339_v48 = vmax.bf16 %v7210_v2, %v8606_v16  ;;  %v2572_v56 = vunpack.c.l.b16 %v2331_v59  ;;  %v2575_v60 = vunpack.c.l.b16 %v2334_v17  ;;  %v5929_v17 = vld [vmem:[%s8482_s4 + $0x300] ss:$8 sps:$4 sm:$0xff]  }
 0x39c   :  { %v2608_v52 = vrot.slane %v2584_v49, 4  ;;  %v5931_v49 = vld [vmem:[%s8482_s4 + $0x304] ss:$8 sps:$4 sm:$0xff]  }
 0x39d   :  { %v2535_v0 = vsel %vm2398_vm12, %v2534_v43, %v2533_v46  ;;  %v2580_v23 = vunpack.c.l.b16 %v2339_v48  ;;  %v2335_v43 = vmax.bf16 %v7223_v22, %v8611_v18  ;;  %v2589_v20 = vsel %vm2380_vm7, %v2588_v38, %v2572_v56  ;;  %3700 = vmatprep.subr.bf16.mxu1 %v5931_v49  ;;  %v5920_v56 = vld [vmem:[%s8482_s4 + $0x20] ss:$8 sps:$4 sm:$0xff]   ;;  %v5923_v18 = vld [vmem:[%s8482_s4 + $0x30] ss:$8 sps:$4 sm:$0xff]  }
 0x39e   :  { %v2138_v62 = vpop.permute.xlu0 %2137  ;;  %v7302_v44 = vpack.c.b16 %v2535_v0, %v2535_v0  ;;  %v2592_v9 = vrot.slane %v2575_v60, 5  ;;  %3701 = vmatpush1.bf16.msra.mxu1 %v5929_v17  ;;  %v5926_v38 = vld [vmem:[%s8482_s4 + $0x40] ss:$8 sps:$4 sm:$0xff]   ;;  %v5934_v60 = vld [vmem:[%s8482_s4 + $0x54] ss:$8 sps:$4 sm:$0xff]  }
 0x39f   :  { %v2178_v39 = vmax.bf16 %v2138_v62, %v8602_v12  ;;  %v2585_v12 = vunpack.c.l.b16 %v2344_v1  ;;  %v2576_v37 = vunpack.c.l.b16 %v2335_v43  ;;  %v5925_v1 = vld [vmem:[%s8482_s4 + $0x34] ss:$8 sps:$4 sm:$0xff]   ;;  %v5983_v17 = vld [vmem:[%s8482_s4 + $0x390] ss:$8 sps:$4 sm:$0xff]  }
 0x3a0   :  { %2552 = vrot.lane.b32.xlu0 %v7302_v44, %s6169_s21  ;;  %v5949_v43 = vld [vmem:[%s8482_s4 + $0x334] ss:$8 sps:$4 sm:$0xff]  }
 0x3a1   :  { %v2443_v3 = vunpack.c.l.b16 %v2178_v39  ;;  %v2306_v27 = vpop.permute.xlu1 %2305  ;;  %v8612_v39 = vld [vmem:[#allocation39_spill] sm:$0xff]  ;;  %v2594_v48 = vrot.slane %v2576_v37, 4 }
 0x3a2   :  { %v2342_v28 = vmax.bf16 %v2306_v27, %v7103_v30  ;;  %v2602_v30 = vrot.slane %v2581_v7, 7  ;;  %v2336_v22 = vmax.bf16 %v7255_v29, %v8612_v39  ;;  %v5952_v39 = vld [vmem:[%s8482_s4 + $0x84] ss:$8 sps:$4 sm:$0xff]  }
 0x3a3   :  { %v2464_v15 = vrot.slane %v2443_v3, 1  ;;  %v2288_v34 = vpop.permute.xlu0 %2287  ;;  %v2610_v3 = vrot.slane %v2585_v12, 3  ;;  %v5944_v12 = vld [vmem:[%s8482_s4 + $0x70] ss:$8 sps:$4 sm:$0xff]  }
 0x3a4   :  { %v2583_v58 = vunpack.c.l.b16 %v2342_v28  ;;  %v2333_v25 = vmax.bf16 %v2288_v34, %v7110_v24  ;;  %v2603_v51 = vsel %vm2380_vm7, %v2602_v30, %v2580_v23  ;;  %v2577_v19 = vunpack.c.l.b16 %v2336_v22  ;;  %v5935_v30 = vld [vmem:[%s8482_s4 + $0x310] ss:$8 sps:$4 sm:$0xff]   ;;  %v5950_v22 = vld [vmem:[%s8482_s4 + $0x80] ss:$8 sps:$4 sm:$0xff]  }
 0x3a5   :  { %v2465_v11 = vsel %vm2398_vm12, %v2464_v15, %v2463_v40  ;;  %v2605_v62 = vsel %vm2383_vm6, %v2604_v36, %v2603_v51  ;;  %v5922_v36 = vld [vmem:[%s8482_s4 + $0x24] ss:$8 sps:$4 sm:$0xff]  }
 0x3a6   :  { %v2480_v2 = vpack.c.b16 %v2465_v11, %v2465_v11  ;;  %v2574_v5 = vunpack.c.l.b16 %v2333_v25  ;;  %v2606_v26 = vrot.slane %v2583_v58, 5  ;;  %v5914_v58 = vld [vmem:[%s8482_s4] ss:$8 sps:$4 sm:$0xff]   ;;  %v5955_v51 = vld [vmem:[%s8482_s4 + $0x344] ss:$8 sps:$4 sm:$0xff]  }
 0x3a8   :  { %2482 = vrot.lane.b32.xlu0 %v2480_v2, %s6170_s22  ;;  %v2590_v46 = vrot.slane %v2574_v5, 6  ;;  %v2312_v24 = vpop.permute.xlu1 %2311  ;;  %v2607_v8 = vsel %vm2386_vm8, %v2606_v26, %v2605_v62  ;;  %v5937_v5 = vld [vmem:[%s8482_s4 + $0x314] ss:$8 sps:$4 sm:$0xff]   ;;  %v5941_v26 = vld [vmem:[%s8482_s4 + $0x320] ss:$8 sps:$4 sm:$0xff]  }
 0x3a9   :  { %v2345_v54 = vmax.bf16 %v2312_v24, %v7116_v41  ;;  %v2296_v0 = vpop.permute.xlu0 %2295  ;;  %v2609_v55 = vsel %vm2389_vm9, %v2608_v52, %v2607_v8  ;;  %3702 = vmatprep.subr.bf16.mxu1 %v5937_v5  ;;  %v5947_v24 = vld [vmem:[%s8482_s4 + $0x330] ss:$8 sps:$4 sm:$0xff]   ;;  %v5940_v52 = vld [vmem:[%s8482_s4 + $0x64] ss:$8 sps:$4 sm:$0xff]   ;;  %v5938_v62 = vld [vmem:[%s8482_s4 + $0x60] ss:$8 sps:$4 sm:$0xff]  }
 0x3aa   :  { %v2591_v14 = vsel %vm2383_vm6, %v2590_v46, %v2589_v20  ;;  %v2337_v41 = vmax.bf16 %v2296_v0, %v7120_v63  ;;  %v2611_v15 = vsel %vm2392_vm10, %v2610_v3, %v2609_v55  ;;  %v2596_v63 = vrot.slane %v2577_v19, 3  ;;  %3703 = vmatpush1.bf16.msra.mxu1 %v5935_v30  ;;  %v5928_v46 = vld [vmem:[%s8482_s4 + $0x44] ss:$8 sps:$4 sm:$0xff]   ;;  %v5932_v0 = vld [vmem:[%s8482_s4 + $0x50] ss:$8 sps:$4 sm:$0xff]  }
 0x3ab   :  { %v2586_v47 = vunpack.c.l.b16 %v2345_v54  ;;  %v2593_v33 = vsel %vm2386_vm8, %v2592_v9, %v2591_v14  ;;  %3704 = vmatprep.subr.bf16.mxu1 %v5943_v35  ;;  %v5953_v54 = vld [vmem:[%s8482_s4 + $0x340] ss:$8 sps:$4 sm:$0xff]   ;;  %v5946_v20 = vld [vmem:[%s8482_s4 + $0x74] ss:$8 sps:$4 sm:$0xff]   ;;  %v5956_v55 = vld [vmem:[%s8482_s4 + $0x90] ss:$8 sps:$4 sm:$0xff]  }
 0x3ac   :  { %2486 = vrot.lane.b32.xlu0 %v2480_v2, %s6168_s0  ;;  %v2314_v31 = vpop.permute.xlu1 %2313  ;;  %v2578_v6 = vunpack.c.l.b16 %v2337_v41  ;;  %v2595_v50 = vsel %vm2389_vm9, %v2594_v48, %v2593_v33  ;;  %v5959_v3 = vld [vmem:[%s8482_s4 + $0x350] ss:$8 sps:$4 sm:$0xff]   ;;  %v5961_v19 = vld [vmem:[%s8482_s4 + $0x354] ss:$8 sps:$4 sm:$0xff]   ;;  %v5988_v5 = vld [vmem:[%s8482_s4 + $0xe4] ss:$8 sps:$4 sm:$0xff]  }
 0x3ad   :  { %v2346_v16 = vmax.bf16 %v2314_v31, %v7136_v13  ;;  %v2612_v29 = vrot.slane %v2586_v47, 2  ;;  %v2597_v57 = vsel %vm2392_vm10, %v2596_v63, %v2595_v50  ;;  %v5958_v31 = vld [vmem:[%s8482_s4 + $0x94] ss:$8 sps:$4 sm:$0xff]   ;;  %vm7553_vm9 = vmand %vm2731_vm14, %vm2732_vm15 }
 0x3ae   :  { %v2598_v7 = vrot.slane %v2578_v6, 2  ;;  %3705 = vmatpush1.bf16.msra.mxu1 %v5941_v26  ;;  %v5970_v63 = vld [vmem:[%s8482_s4 + $0xb4] ss:$8 sps:$4 sm:$0xff]  }
 0x3af   :  { %v2587_v27 = vunpack.c.l.b16 %v2346_v16  ;;  %v2613_v28 = vsel %vm2395_vm11, %v2612_v29, %v2611_v15  ;;  %3706 = vmatprep.subr.bf16.mxu1 %v5949_v43  ;;  %v5962_v15 = vld [vmem:[%s8482_s4 + $0xa0] ss:$8 sps:$4 sm:$0xff]   ;;  %v5994_v26 = vld [vmem:[%s8482_s4 + $0xf4] ss:$8 sps:$4 sm:$0xff]   ;;  %v5992_v43 = vld [vmem:[%s8482_s4 + $0xf0] ss:$8 sps:$4 sm:$0xff]  }
 0x3b0   :  { %v2599_v2 = vsel %vm2395_vm11, %v2598_v7, %v2597_v57  ;;  %v5971_v7 = vld [vmem:[%s8482_s4 + $0x370] ss:$8 sps:$4 sm:$0xff]  }
 0x3b1   :  { %v2614_v40 = vrot.slane %v2587_v27, 1  ;;  %v5965_v27 = vld [vmem:[%s8482_s4 + $0x360] ss:$8 sps:$4 sm:$0xff]  }
 0x3b2   :  { %v2298_v53 = vpop.permute.xlu0 %2297  ;;  %3707 = vmatpush1.bf16.msra.mxu1 %v5947_v24  ;;  %v6000_v24 = vld [vmem:[%s8482_s4 + $0x104] ss:$8 sps:$4 sm:$0xff]  }
 0x3b3   :  { %v2338_v61 = vmax.bf16 %v2298_v53, %v7146_v42  ;;  %v2615_v13 = vsel %vm2398_vm12, %v2614_v40, %v2613_v28  ;;  %v5916_v42 = vld [vmem:[%s8482_s4 + $0x4] ss:$8 sps:$4 sm:$0xff]   ;;  %3708 = vmatprep.subr.bf16.mxu1 %v5955_v51 }
 0x3b4   :  { %v2617_v11 = vpack.c.b16 %v2615_v13, %v2615_v13  ;;  %3571 = vmatprep.subr.bf16.mxu0 %v5916_v42  ;;  %v5967_v53 = vld [vmem:[%s8482_s4 + $0x364] ss:$8 sps:$4 sm:$0xff]  }
 0x3b5   :  { %v2579_v59 = vunpack.c.l.b16 %v2338_v61  ;;  %3572 = vmatpush1.bf16.msra.mxu0 %v5914_v58  ;;  %v5973_v61 = vld [vmem:[%s8482_s4 + $0x374] ss:$8 sps:$4 sm:$0xff]   ;;  %v5979_v58 = vld [vmem:[%s8482_s4 + $0x384] ss:$8 sps:$4 sm:$0xff]  }
 0x3b6   :  { %2620 = vrot.lane.b32.xlu1 %v2617_v11, %s6170_s22  ;;  %3573 = vmatprep.subr.bf16.mxu0 %v5919_v4 }
 0x3b7   :  { %v2600_v34 = vrot.slane %v2579_v59, 1  ;;  %3709 = vmatpush1.bf16.msra.mxu1 %v5953_v54  ;;  %v5974_v59 = vld [vmem:[%s8482_s4 + $0xc0] ss:$8 sps:$4 sm:$0xff]  }
 0x3b8   :  { %3710 = vmatprep.subr.bf16.mxu1 %v5961_v19 }
 0x3b9   :  { %v2601_v25 = vsel %vm2398_vm12, %v2600_v34, %v2599_v2  ;;  %3574 = vmatpush1.bf16.msra.mxu0 %v5917_v45  ;;  %v2419_v8 = vpop.permute.xlu1 %2418  ;;  %v5977_v34 = vld [vmem:[%s8482_s4 + $0x380] ss:$8 sps:$4 sm:$0xff]   ;;  %v5982_v45 = vld [vmem:[%s8482_s4 + $0xd4] ss:$8 sps:$4 sm:$0xff]  }
 0x3ba   :  { %v2616_v23 = vpack.c.b16 %v2601_v25, %v2601_v25  ;;  %2624 = vrot.lane.b32.xlu1 %v2617_v11, %s6168_s0  ;;  %3575 = vmatprep.subr.bf16.mxu0 %v5922_v36  ;;  %v2631_v50 = vsel %vm578_vm2, %v7171_v10, %v2419_v8  ;;  %v5968_v10 = vld [vmem:[%s8482_s4 + $0xb0] ss:$8 sps:$4 sm:$0xff]   ;;  %v5976_v11 = vld [vmem:[%s8482_s4 + $0xc4] ss:$8 sps:$4 sm:$0xff]   ;;  %v5985_v36 = vld [vmem:[%s8482_s4 + $0x394] ss:$8 sps:$4 sm:$0xff]  }
 0x3bb   :  { %3711 = vmatpush1.bf16.msra.mxu1 %v5959_v3 }
 0x3bc   :  { %2618 = vrot.lane.b32.xlu0 %v2616_v23, %s6170_s22  ;;  %3712 = vmatprep.subr.bf16.mxu1 %v5967_v53 }
 0x3bd   :  { %3576 = vmatpush1.bf16.msra.mxu0 %v5920_v56  ;;  %v5991_v56 = vld [vmem:[%s8482_s4 + $0x3a4] ss:$8 sps:$4 sm:$0xff]  }
 0x3be   :  { %3577 = vmatprep.subr.bf16.mxu0 %v5925_v1  ;;  %v5989_v1 = vld [vmem:[%s8482_s4 + $0x3a0] ss:$8 sps:$4 sm:$0xff]  }
 0x3bf   :  { %3713 = vmatpush1.bf16.msra.mxu1 %v5965_v27 }
 0x3c0   :  { %2622 = vrot.lane.b32.xlu0 %v2616_v23, %s6168_s0  ;;  %3714 = vmatprep.subr.bf16.mxu1 %v5973_v61 }
 0x3c1   :  { %3578 = vmatpush1.bf16.msra.mxu0 %v5923_v18  ;;  %v5997_v18 = vld [vmem:[%s8482_s4 + $0x3b4] ss:$8 sps:$4 sm:$0xff]  }
 0x3c2   :  { %3579 = vmatprep.subr.bf16.mxu0 %v5928_v46  ;;  %v5995_v46 = vld [vmem:[%s8482_s4 + $0x3b0] ss:$8 sps:$4 sm:$0xff]  }
 0x3c3   :  { %3715 = vmatpush1.bf16.msra.mxu1 %v5971_v7 }
 0x3c4   :  { %3716 = vmatprep.subr.bf16.mxu1 %v5979_v58 }
 0x3c5   :  { %3580 = vmatpush1.bf16.msra.mxu0 %v5926_v38 }
 0x3c6   :  { %3581 = vmatprep.subr.bf16.mxu0 %v5934_v60 }
 0x3c7   :  { %3717 = vmatpush1.bf16.msra.mxu1 %v5977_v34 }
 0x3c8   :  { %3718 = vmatprep.subr.bf16.mxu1 %v5985_v36 }
 0x3c9   :  { %3582 = vmatpush1.bf16.msra.mxu0 %v5932_v0 }
 0x3ca   :  { %3583 = vmatprep.subr.bf16.mxu0 %v5940_v52 }
 0x3cb   :  { %3719 = vmatpush1.bf16.msra.mxu1 %v5983_v17 }
 0x3cc   :  { %3720 = vmatprep.subr.bf16.mxu1 %v5991_v56 }
 0x3cd   :  { %3584 = vmatpush1.bf16.msra.mxu0 %v5938_v62 }
 0x3ce   :  { %3585 = vmatprep.subr.bf16.mxu0 %v5946_v20 }
 0x3cf   :  { %3721 = vmatpush1.bf16.msra.mxu1 %v5989_v1 }
 0x3d0   :  { %3722 = vmatprep.subr.bf16.mxu1 %v5997_v18 }
 0x3d1   :  { %3586 = vmatpush1.bf16.msra.mxu0 %v5944_v12 }
 0x3d2   :  { %3587 = vmatprep.subr.bf16.mxu0 %v5952_v39 }
 0x3d3   :  { %3723 = vmatpush1.bf16.msra.mxu1 %v5995_v46 }
 0x3d5   :  { %3588 = vmatpush1.bf16.msra.mxu0 %v5950_v22 }
 0x3d6   :  { %v2417_v37 = vpop.permute.xlu0 %2416  ;;  %3589 = vmatprep.subr.bf16.mxu0 %v5958_v31 }
 0x3d7   :  { %v2628_v33 = vsel %vm578_vm2, %v7196_v21, %v2417_v37  ;;  %v5964_v21 = vld [vmem:[%s8482_s4 + $0xa4] ss:$8 sps:$4 sm:$0xff]  }
 0x3d9   :  { %3590 = vmatpush1.bf16.msra.mxu0 %v5956_v55 }
 0x3da   :  { %3591 = vmatprep.subr.bf16.mxu0 %v5964_v21 }
 0x3dd   :  { %3592 = vmatpush1.bf16.msra.mxu0 %v5962_v15 }
 0x3de   :  { %3593 = vmatprep.subr.bf16.mxu0 %v5970_v63 }
 0x3e1   :  { %3594 = vmatpush1.bf16.msra.mxu0 %v5968_v10 }
 0x3e2   :  { %3595 = vmatprep.subr.bf16.mxu0 %v5976_v11 }
 0x3e5   :  { %3596 = vmatpush1.bf16.msra.mxu0 %v5974_v59 }
 0x3e6   :  { %3597 = vmatprep.subr.bf16.mxu0 %v5982_v45 }
 0x404   :  { %v2555_v14 = vpop.permute.xlu1 %2554 }
 0x405   :  { %v2645_v49 = vsel %vm578_vm2, %v7271_v32, %v2555_v14  ;;  %v5986_v32 = vld [vmem:[%s8482_s4 + $0xe0] ss:$8 sps:$4 sm:$0xff]  }
 0x409   :  { %v2485_v41 = vpop.permute.xlu1 %2484 }
 0x40a   :  { %v2635_v40 = vsel %vm580_vm3, %v2631_v50, %v2485_v41 }
 0x40d   :  { %v2489_v6 = vpop.permute.xlu1 %2488 }
 0x40e   :  { %v2639_v28 = vsel %vm582_vm4, %v2635_v40, %v2489_v6 }
 0x412   :  { %v2553_v47 = vpop.permute.xlu0 %2552 }
 0x413   :  { %v2642_v2 = vsel %vm578_vm2, %v7302_v44, %v2553_v47  ;;  %v5980_v44 = vld [vmem:[%s8482_s4 + $0xd0] ss:$8 sps:$4 sm:$0xff]  }
 0x414   :  { %3598 = vmatpush1.bf16.msra.mxu0 %v5980_v44 }
 0x415   :  { %3599 = vmatprep.subr.bf16.mxu0 %v5988_v5 }
 0x418   :  { %3600 = vmatpush1.bf16.msra.mxu0 %v5986_v32 }
 0x419   :  { %3601 = vmatprep.subr.bf16.mxu0 %v5994_v26 }
 0x41a   :  { %v2483_v9 = vpop.permute.xlu0 %2482 }
 0x41b   :  { %v2633_v16 = vsel %vm580_vm3, %v2628_v33, %v2483_v9 }
 0x41c   :  { %3602 = vmatpush1.bf16.msra.mxu0 %v5992_v43 }
 0x41d   :  { %3614 = vmatprep.subr.bf16.mxu0 %v6000_v24 }
 0x41e   :  { %v2487_v48 = vpop.permute.xlu0 %2486 }
 0x41f   :  { %v2637_v29 = vsel %vm582_vm4, %v2633_v16, %v2487_v48 }
 0x420   :  { %2658 = vrot.lane.b32.xlu0 %v2637_v29, %s6168_s0 }
 0x424   :  { %2662 = vrot.lane.b32.xlu0 %v2639_v28, %s6168_s0 }
 0x428   :  { %v2621_v57 = vpop.permute.xlu1 %2620 }
 0x429   :  { %v2649_v30 = vsel %vm580_vm3, %v2645_v49, %v2621_v57 }
 0x42c   :  { %v2625_v23 = vpop.permute.xlu1 %2624 }
 0x42d   :  { %v2653_v35 = vsel %vm582_vm4, %v2649_v30, %v2625_v23 }
 0x42e   :  { %v2619_v13 = vpop.permute.xlu0 %2618 }
 0x42f   :  { %v2647_v42 = vsel %vm580_vm3, %v2642_v2, %v2619_v13 }
 0x432   :  { %v2623_v25 = vpop.permute.xlu0 %2622 }
 0x433   :  { %v2651_v4 = vsel %vm582_vm4, %v2647_v42, %v2623_v25 }
 0x434   :  { %2660 = vrot.lane.b32.xlu1 %v2651_v4, %s6168_s0 }
 0x438   :  { %2664 = vrot.lane.b32.xlu1 %v2653_v35, %s6168_s0 }
 0x492   :  { %v2659_v38 = vpop.permute.xlu0 %2658 }
 0x493   :  { %v2671_v51 = vsel %vm578_vm2, 0, %v2659_v38 }
 0x494   :  { %v2678_v60 = vshrl.u32 %v2671_v51, 16  ;;  %v2681_v0 = vshll.u32 %v2671_v51, 16 }
 0x496   :  { %v2680_v54 = vrot.slane %v2678_v60, 7  ;;  %v2663_v52 = vpop.permute.xlu0 %2662 }
 0x497   :  { %v2673_v20 = vsel %vm578_vm2, 0, %v2663_v52 }
 0x498   :  { %v2683_v39 = vor.u32 %v2681_v0, %v2680_v54  ;;  %v2697_v22 = vshrl.u32 %v2673_v20, 16  ;;  %v2700_v14 = vshll.u32 %v2673_v20, 16  ;;  %v5998_v20 = vld [vmem:[%s8482_s4 + $0x100] ss:$8 sps:$4 sm:$0xff]  }
 0x49a   :  { %v2725_v8 = vsel %vm7548_vm1, 0, %v2683_v39  ;;  %v2699_v37 = vrot.slane %v2697_v22, 7 }
 0x49b   :  { %v7561_v47 = vsel %vm7553_vm9, %v2725_v8, 0 }
 0x49c   :  { %v2702_v41 = vor.u32 %v2700_v14, %v2699_v37  ;;  %v2743_v9 = vshll.u32 %v7561_v47, 16  ;;  %v2741_v31 = vshrl.u32 %v7561_v47, 16  ;;  %v2805_v48 = vrot.slane %v7561_v47, 1  ;;  %v6003_v14 = vld [vmem:[%s8482_s4 + $0x114] ss:$8 sps:$4 sm:$0xff]  }
 0x49e   :  { %v2728_v55 = vsel %vm7548_vm1, 0, %v2702_v41  ;;  %v2745_v3 = vrot.slane %v2743_v9, 1 }
 0x49f   :  { %v7569_v19 = vsel %vm7553_vm9, %v2728_v55, 0 }
 0x4a0   :  { %v2746_v33 = vor.u32 %v2745_v3, %v2741_v31  ;;  %v2764_v16 = vshll.u32 %v7569_v19, 16  ;;  %v2808_v29 = vrot.slane %v7569_v19, 1  ;;  %v2762_v6 = vshrl.u32 %v7569_v19, 16  ;;  %v6001_v31 = vld [vmem:[%s8482_s4 + $0x110] ss:$8 sps:$4 sm:$0xff]  }
 0x4a1   :  { %v5482_v56 = vcombine.low %v7561_v47, %v7569_v19 }
 0x4a2   :  { %2782 = vrot.lane.b32.xlu0 %v2746_v33, %s6170_s22  ;;  %v2766_v15 = vrot.slane %v2764_v16, 1  ;;  %v7576_v21 = vcombine.low %v2805_v48, %v2808_v29  ;;  %v6006_v33 = vld [vmem:[%s8482_s4 + $0x124] ss:$8 sps:$4 sm:$0xff]   ;;  %v6004_v48 = vld [vmem:[%s8482_s4 + $0x120] ss:$8 sps:$4 sm:$0xff]  }
 0x4a4   :  { %v2767_v27 = vor.u32 %v2766_v15, %v2762_v6  ;;  %v6009_v6 = vld [vmem:[%s8482_s4 + $0x134] ss:$8 sps:$4 sm:$0xff]   ;;  %v6007_v15 = vld [vmem:[%s8482_s4 + $0x130] ss:$8 sps:$4 sm:$0xff]  }
 0x4a6   :  { %2788 = vrot.lane.b32.xlu0 %v2767_v27, %s6170_s22  ;;  %v2661_v50 = vpop.permute.xlu1 %2660  ;;  %v6012_v27 = vld [vmem:[%s8482_s4 + $0x144] ss:$8 sps:$4 sm:$0xff]  }
 0x4a7   :  { %v2667_v53 = vsel %vm578_vm2, %v2659_v38, %v2661_v50  ;;  %v2675_v63 = vsel %vm578_vm2, %v2661_v50, 0  ;;  %v6010_v50 = vld [vmem:[%s8482_s4 + $0x140] ss:$8 sps:$4 sm:$0xff]  }
 0x4a8   :  { %v2685_v40 = vshrl.u32 %v2667_v53, 16  ;;  %v2691_v61 = vshrl.u32 %v2675_v63, 16  ;;  %v2688_v10 = vshll.u32 %v2667_v53, 16  ;;  %v2694_v57 = vshll.u32 %v2675_v63, 16  ;;  %v6015_v53 = vld [vmem:[%s8482_s4 + $0x154] ss:$8 sps:$4 sm:$0xff]  }
 0x4a9   :  { %v6013_v63 = vld [vmem:[%s8482_s4 + $0x150] ss:$8 sps:$4 sm:$0xff]  }
 0x4aa   :  { %v2687_v28 = vrot.slane %v2685_v40, 7  ;;  %v2693_v7 = vrot.slane %v2691_v61, 7  ;;  %v2665_v13 = vpop.permute.xlu1 %2664  ;;  %v6018_v40 = vld [vmem:[%s8482_s4 + $0x164] ss:$8 sps:$4 sm:$0xff]   ;;  %v6016_v61 = vld [vmem:[%s8482_s4 + $0x160] ss:$8 sps:$4 sm:$0xff]  }
 0x4ab   :  { %v2668_v59 = vsel %vm578_vm2, %v2663_v52, %v2665_v13  ;;  %v2677_v11 = vsel %vm578_vm2, %v2665_v13, 0  ;;  %v6027_v13 = vld [vmem:[%s8482_s4 + $0x194] ss:$8 sps:$4 sm:$0xff]  }
 0x4ac   :  { %v2690_v34 = vor.u32 %v2688_v10, %v2687_v28  ;;  %v2696_v2 = vor.u32 %v2694_v57, %v2693_v7  ;;  %v2704_v58 = vshrl.u32 %v2668_v59, 16  ;;  %v2710_v42 = vshrl.u32 %v2677_v11, 16  ;;  %v6021_v28 = vld [vmem:[%s8482_s4 + $0x174] ss:$8 sps:$4 sm:$0xff]   ;;  %v6019_v10 = vld [vmem:[%s8482_s4 + $0x170] ss:$8 sps:$4 sm:$0xff]  }
 0x4ad   :  { %v2707_v44 = vshll.u32 %v2668_v59, 16  ;;  %v2713_v36 = vshll.u32 %v2677_v11, 16  ;;  %v6024_v7 = vld [vmem:[%s8482_s4 + $0x184] ss:$8 sps:$4 sm:$0xff]   ;;  %v6022_v57 = vld [vmem:[%s8482_s4 + $0x180] ss:$8 sps:$4 sm:$0xff]  }
 0x4ae   :  { %v2726_v25 = vsel %vm7548_vm1, 0, %v2690_v34  ;;  %v2727_v4 = vsel %vm7548_vm1, 0, %v2696_v2  ;;  %v2706_v23 = vrot.slane %v2704_v58, 7  ;;  %v2712_v49 = vrot.slane %v2710_v42, 7  ;;  %v6025_v59 = vld [vmem:[%s8482_s4 + $0x190] ss:$8 sps:$4 sm:$0xff]  }
 0x4af   :  { %v2735_v45 = vsel %vm7553_vm9, %v2726_v25, 0  ;;  %v7591_v17 = vsel %vm7553_vm9, %v2727_v4, 0  ;;  %v6030_v11 = vld [vmem:[%s8482_s4 + $0x1a4] ss:$8 sps:$4 sm:$0xff]   ;;  %v6028_v34 = vld [vmem:[%s8482_s4 + $0x1a0] ss:$8 sps:$4 sm:$0xff]  }
 0x4b0   :  { %v2709_v5 = vor.u32 %v2707_v44, %v2706_v23  ;;  %v2750_v30 = vshll.u32 %v2735_v45, 16  ;;  %v2715_v35 = vor.u32 %v2713_v36, %v2712_v49  ;;  %v2757_v32 = vshll.u32 %v7591_v17, 16  ;;  %v6033_v2 = vld [vmem:[%s8482_s4 + $0x1b4] ss:$8 sps:$4 sm:$0xff]   ;;  %v6031_v58 = vld [vmem:[%s8482_s4 + $0x1b0] ss:$8 sps:$4 sm:$0xff]  }
 0x4b1   :  { %v2806_v1 = vrot.slane %v2735_v45, 1  ;;  %v2748_v18 = vshrl.u32 %v2735_v45, 16  ;;  %v2755_v38 = vshrl.u32 %v7591_v17, 16  ;;  %v2807_v22 = vrot.slane %v7591_v17, 1  ;;  %v6036_v42 = vld [vmem:[%s8482_s4 + $0x1c4] ss:$8 sps:$4 sm:$0xff]  }
 0x4b2   :  { %v2729_v26 = vsel %vm7548_vm1, 0, %v2709_v5  ;;  %v2752_v43 = vrot.slane %v2750_v30, 1  ;;  %v2730_v46 = vsel %vm7548_vm1, 0, %v2715_v35  ;;  %v2759_v51 = vrot.slane %v2757_v32, 1  ;;  %v6034_v25 = vld [vmem:[%s8482_s4 + $0x1c0] ss:$8 sps:$4 sm:$0xff]  }
 0x4b3   :  { %v2738_v24 = vsel %vm7553_vm9, %v2729_v26, 0  ;;  %v7605_v60 = vsel %vm7553_vm9, %v2730_v46, 0  ;;  %v6039_v4 = vld [vmem:[%s8482_s4 + $0x1d4] ss:$8 sps:$4 sm:$0xff]   ;;  %v6037_v23 = vld [vmem:[%s8482_s4 + $0x1d0] ss:$8 sps:$4 sm:$0xff]  }
 0x4b4   :  { %v2809_v54 = vrot.slane %v2738_v24, 1  ;;  %v2753_v0 = vor.u32 %v2752_v43, %v2748_v18  ;;  %v5483_v52 = vcombine.low %v2735_v45, %v2738_v24  ;;  %v2760_v39 = vor.u32 %v2759_v51, %v2755_v38  ;;  %v6042_v44 = vld [vmem:[%s8482_s4 + $0x1e4] ss:$8 sps:$4 sm:$0xff]   ;;  %v6040_v45 = vld [vmem:[%s8482_s4 + $0x1e0] ss:$8 sps:$4 sm:$0xff]  }
 0x4b5   :  { %v2810_v8 = vrot.slane %v7605_v60, 1  ;;  %v2771_v37 = vshll.u32 %v2738_v24, 16  ;;  %v2778_v47 = vshll.u32 %v7605_v60, 16  ;;  %v2769_v9 = vshrl.u32 %v2738_v24, 16  ;;  %v6045_v49 = vld [vmem:[%s8482_s4 + $0x1f4] ss:$8 sps:$4 sm:$0xff]  }
 0x4b6   :  { %2784 = vrot.lane.b32.xlu1 %v2753_v0, %s6170_s22  ;;  %3603 = vmatprep.mubr.bf16.mxu0 %v5483_v52  ;;  %v5488_v12 = vcombine.low %v2806_v1, %v2809_v54  ;;  %v2776_v16 = vshrl.u32 %v7605_v60, 16  ;;  %v6043_v36 = vld [vmem:[%s8482_s4 + $0x1f0] ss:$8 sps:$4 sm:$0xff]   ;;  %v6048_v5 = vld [vmem:[%s8482_s4 + $0x204] ss:$8 sps:$4 sm:$0xff]  }
 0x4b7   :  { %2786 = vrot.lane.b32.xlu0 %v2760_v39, %s6170_s22  ;;  %3604 = vmatmul.mubr.bf16.vlgmr.msra.gmra.mrb[8].mxu0 %v5482_v56  ;;  %v5489_v41 = vcombine.low %v2807_v22, %v2810_v8  ;;  %v2773_v55 = vrot.slane %v2771_v37, 1  ;;  %v2780_v19 = vrot.slane %v2778_v47, 1  ;;  %v6046_v38 = vld [vmem:[%s8482_s4 + $0x200] ss:$8 sps:$4 sm:$0xff]   ;;  %v6051_v54 = vld [vmem:[%s8482_s4 + $0x214] ss:$8 sps:$4 sm:$0xff]  }
 0x4b8   :  { %3615 = vmatpush1.bf16.msra.mxu0 %v5998_v20  ;;  %v6049_v20 = vld [vmem:[%s8482_s4 + $0x210] ss:$8 sps:$4 sm:$0xff]   ;;  %v6054_v39 = vld [vmem:[%s8482_s4 + $0x224] ss:$8 sps:$4 sm:$0xff]   ;;  %v6052_v22 = vld [vmem:[%s8482_s4 + $0x220] ss:$8 sps:$4 sm:$0xff]  }
 0x4b9   :  { %5610 = vmatprep.mubr.msk.bf16.mxu1 %vm580_vm3, %v5489_v41  ;;  %v2774_v3 = vor.u32 %v2773_v55, %v2769_v9  ;;  %3616 = vmatprep.subr.bf16.mxu0 %v6003_v14  ;;  %v2781_v29 = vor.u32 %v2780_v19, %v2776_v16  ;;  %v6057_v8 = vld [vmem:[%s8482_s4 + $0x234] ss:$8 sps:$4 sm:$0xff]   ;;  %v6060_v37 = vld [vmem:[%s8482_s4 + $0x244] ss:$8 sps:$4 sm:$0xff]   ;;  %v6058_v14 = vld [vmem:[%s8482_s4 + $0x240] ss:$8 sps:$4 sm:$0xff]  }
 0x4ba   :  { %3733 = vmatmul.mubr.bf16.vlgmr.msra.gmra.mrb[8].mxu1 %v5488_v12  ;;  %v6063_v12 = vld [vmem:[%s8482_s4 + $0x254] ss:$8 sps:$4 sm:$0xff]   ;;  %v6061_v47 = vld [vmem:[%s8482_s4 + $0x250] ss:$8 sps:$4 sm:$0xff]   ;;  %v6066_v41 = vld [vmem:[%s8482_s4 + $0x264] ss:$8 sps:$4 sm:$0xff]  }
 0x4bb   :  { %2790 = vrot.lane.b32.xlu1 %v2774_v3, %s6170_s22  ;;  %v6064_v9 = vld [vmem:[%s8482_s4 + $0x260] ss:$8 sps:$4 sm:$0xff]   ;;  %v6069_v55 = vld [vmem:[%s8482_s4 + $0x274] ss:$8 sps:$4 sm:$0xff]   ;;  %v6072_v3 = vld [vmem:[%s8482_s4 + $0x284] ss:$8 sps:$4 sm:$0xff]  }
 0x4bc   :  { %3617 = vmatpush1.bf16.msra.mxu0 %v6001_v31  ;;  %v6067_v31 = vld [vmem:[%s8482_s4 + $0x270] ss:$8 sps:$4 sm:$0xff]   ;;  %v6070_v19 = vld [vmem:[%s8482_s4 + $0x280] ss:$8 sps:$4 sm:$0xff]  }
 0x4bd   :  { %3618 = vmatprep.subr.bf16.mxu0 %v6006_v33  ;;  %v6075_v33 = vld [vmem:[%s8482_s4 + $0x294] ss:$8 sps:$4 sm:$0xff]   ;;  %v6073_v16 = vld [vmem:[%s8482_s4 + $0x290] ss:$8 sps:$4 sm:$0xff]  }
 0x4bf   :  { %2792 = vrot.lane.b32.xlu1 %v2781_v29, %s6170_s22  ;;  %v6076_v29 = vld [vmem:[%s8482_s4 + $0x2a0] ss:$8 sps:$4 sm:$0xff]  }
 0x4c0   :  { %3619 = vmatpush1.bf16.msra.mxu0 %v6004_v48  ;;  %v6078_v48 = vld [vmem:[%s8482_s4 + $0x2a4] ss:$8 sps:$4 sm:$0xff]  }
 0x4c1   :  { %3620 = vmatprep.subr.bf16.mxu0 %v6009_v6  ;;  %v6081_v6 = vld [vmem:[%s8482_s4 + $0x2b4] ss:$8 sps:$4 sm:$0xff]  }
 0x4c4   :  { %3621 = vmatpush1.bf16.msra.mxu0 %v6007_v15  ;;  %v6079_v15 = vld [vmem:[%s8482_s4 + $0x2b0] ss:$8 sps:$4 sm:$0xff]  }
 0x4c5   :  { %3622 = vmatprep.subr.bf16.mxu0 %v6012_v27  ;;  %v6084_v27 = vld [vmem:[%s8482_s4 + $0x2c4] ss:$8 sps:$4 sm:$0xff]  }
 0x4c8   :  { %3623 = vmatpush1.bf16.msra.mxu0 %v6010_v50  ;;  %v6082_v50 = vld [vmem:[%s8482_s4 + $0x2c0] ss:$8 sps:$4 sm:$0xff]  }
 0x4c9   :  { %3624 = vmatprep.subr.bf16.mxu0 %v6015_v53  ;;  %v6087_v53 = vld [vmem:[%s8482_s4 + $0x2d4] ss:$8 sps:$4 sm:$0xff]  }
 0x4cc   :  { %3625 = vmatpush1.bf16.msra.mxu0 %v6013_v63  ;;  %v6085_v63 = vld [vmem:[%s8482_s4 + $0x2d0] ss:$8 sps:$4 sm:$0xff]  }
 0x4cd   :  { %3626 = vmatprep.subr.bf16.mxu0 %v6018_v40  ;;  %v6090_v40 = vld [vmem:[%s8482_s4 + $0x2e4] ss:$8 sps:$4 sm:$0xff]  }
 0x4d0   :  { %3627 = vmatpush1.bf16.msra.mxu0 %v6016_v61  ;;  %v6088_v61 = vld [vmem:[%s8482_s4 + $0x2e0] ss:$8 sps:$4 sm:$0xff]  }
 0x4d1   :  { %3628 = vmatprep.subr.bf16.mxu0 %v6021_v28  ;;  %v6093_v28 = vld [vmem:[%s8482_s4 + $0x2f4] ss:$8 sps:$4 sm:$0xff]  }
 0x4d4   :  { %3629 = vmatpush1.bf16.msra.mxu0 %v6019_v10  ;;  %v6091_v10 = vld [vmem:[%s8482_s4 + $0x2f0] ss:$8 sps:$4 sm:$0xff]  }
 0x4d5   :  { %3630 = vmatprep.subr.bf16.mxu0 %v6024_v7 }
 0x4d8   :  { %3631 = vmatpush1.bf16.msra.mxu0 %v6022_v57 }
 0x4d9   :  { %3632 = vmatprep.subr.bf16.mxu0 %v6027_v13 }
 0x4dc   :  { %3633 = vmatpush1.bf16.msra.mxu0 %v6025_v59 }
 0x4dd   :  { %3634 = vmatprep.subr.bf16.mxu0 %v6030_v11 }
 0x4e0   :  { %3635 = vmatpush1.bf16.msra.mxu0 %v6028_v34 }
 0x4e1   :  { %3636 = vmatprep.subr.bf16.mxu0 %v6033_v2 }
 0x4e4   :  { %3637 = vmatpush1.bf16.msra.mxu0 %v6031_v58 }
 0x4e5   :  { %3638 = vmatprep.subr.bf16.mxu0 %v6036_v42 }
 0x4e8   :  { %3639 = vmatpush1.bf16.msra.mxu0 %v6034_v25 }
 0x4e9   :  { %3640 = vmatprep.subr.bf16.mxu0 %v6039_v4 }
 0x4ec   :  { %3641 = vmatpush1.bf16.msra.mxu0 %v6037_v23 }
 0x4ed   :  { %3642 = vmatprep.subr.bf16.mxu0 %v6042_v44 }
 0x4f0   :  { %3643 = vmatpush1.bf16.msra.mxu0 %v6040_v45 }
 0x4f1   :  { %3644 = vmatprep.subr.bf16.mxu0 %v6045_v49 }
 0x4f4   :  { %3645 = vmatpush1.bf16.msra.mxu0 %v6043_v36 }
 0x4f5   :  { %3657 = vmatprep.subr.bf16.mxu0 %v6048_v5 }
 0x514   :  { %v2783_v30 = vpop.permute.xlu0 %2782 }
 0x515   :  { %v2812_v43 = vsel %vm580_vm3, %v7591_v17, %v2783_v30 }
 0x518   :  { %v2789_v35 = vpop.permute.xlu0 %2788 }
 0x519   :  { %v2814_v32 = vsel %vm580_vm3, %v7605_v60, %v2789_v35 }
 0x51a   :  { %v5484_v51 = vcombine.low %v2812_v43, %v2814_v32 }
 0x528   :  { %v2785_v56 = vpop.permute.xlu1 %2784 }
 0x529   :  { %v2795_v26 = vsel %vm580_vm3, %v2783_v30, %v2785_v56  ;;  %v2787_v46 = vpop.permute.xlu0 %2786 }
 0x52a   :  { %v7725_v0 = vsel %vm580_vm3, %v2785_v56, %v2787_v46 }
 0x52d   :  { %v2791_v1 = vpop.permute.xlu1 %2790 }
 0x52e   :  { %v2797_v18 = vsel %vm580_vm3, %v2789_v35, %v2791_v1 }
 0x52f   :  { %v5485_v24 = vcombine.low %v2795_v26, %v2797_v18 }
 0x531   :  { %v2793_v60 = vpop.permute.xlu1 %2792  ;;  %3646 = vmatprep.mubr.bf16.mxu0 %v5485_v24 }
 0x532   :  { %v7728_v52 = vsel %vm580_vm3, %v2791_v1, %v2793_v60  ;;  %3647 = vmatmul.mubr.bf16.vlgmr.msra.gmra.mrb[8].mxu0 %v5484_v51 }
 0x533   :  { %v5486_v17 = vcombine.low %v7725_v0, %v7728_v52  ;;  %3658 = vmatpush1.bf16.msra.mxu0 %v6046_v38  ;;  %3689 = vmatprep.mubr.bf16.mxu0 %v7576_v21  ;;  %v6055_v21 = vld [vmem:[%s8482_s4 + $0x230] ss:$8 sps:$4 sm:$0xff]  }
 0x534   :  { %3659 = vmatprep.subr.bf16.mxu0 %v6051_v54 }
 0x537   :  { %3660 = vmatpush1.bf16.msra.mxu0 %v6049_v20 }
 0x538   :  { %3661 = vmatprep.subr.bf16.mxu0 %v6054_v39 }
 0x53b   :  { %3662 = vmatpush1.bf16.msra.mxu0 %v6052_v22 }
 0x53c   :  { %3663 = vmatprep.subr.bf16.mxu0 %v6057_v8 }
 0x53f   :  { %3664 = vmatpush1.bf16.msra.mxu0 %v6055_v21 }
 0x540   :  { %3665 = vmatprep.subr.bf16.mxu0 %v6060_v37 }
 0x543   :  { %3666 = vmatpush1.bf16.msra.mxu0 %v6058_v14 }
 0x544   :  { %3667 = vmatprep.subr.bf16.mxu0 %v6063_v12 }
 0x547   :  { %3668 = vmatpush1.bf16.msra.mxu0 %v6061_v47 }
 0x548   :  { %3669 = vmatprep.subr.bf16.mxu0 %v6066_v41 }
 0x54b   :  { %3670 = vmatpush1.bf16.msra.mxu0 %v6064_v9 }
 0x54c   :  { %3671 = vmatprep.subr.bf16.mxu0 %v6069_v55 }
 0x54f   :  { %3672 = vmatpush1.bf16.msra.mxu0 %v6067_v31 }
 0x550   :  { %3673 = vmatprep.subr.bf16.mxu0 %v6072_v3 }
 0x553   :  { %3674 = vmatpush1.bf16.msra.mxu0 %v6070_v19 }
 0x554   :  { %3675 = vmatprep.subr.bf16.mxu0 %v6075_v33 }
 0x557   :  { %3676 = vmatpush1.bf16.msra.mxu0 %v6073_v16 }
 0x558   :  { %3677 = vmatprep.subr.bf16.mxu0 %v6078_v48 }
 0x55b   :  { %3678 = vmatpush1.bf16.msra.mxu0 %v6076_v29 }
 0x55c   :  { %3679 = vmatprep.subr.bf16.mxu0 %v6081_v6 }
 0x55f   :  { %3680 = vmatpush1.bf16.msra.mxu0 %v6079_v15 }
 0x560   :  { %3681 = vmatprep.subr.bf16.mxu0 %v6084_v27 }
 0x563   :  { %3682 = vmatpush1.bf16.msra.mxu0 %v6082_v50 }
 0x564   :  { %3683 = vmatprep.subr.bf16.mxu0 %v6087_v53 }
 0x567   :  { %3684 = vmatpush1.bf16.msra.mxu0 %v6085_v63 }
 0x568   :  { %3685 = vmatprep.subr.bf16.mxu0 %v6090_v40 }
 0x56b   :  { %3686 = vmatpush1.bf16.msra.mxu0 %v6088_v61 }
 0x56c   :  { %3687 = vmatprep.subr.bf16.mxu0 %v6093_v28 }
 0x56f   :  { %3688 = vmatpush1.bf16.msra.mxu0 %v6091_v10 }
 0x572   :  { %3690 = vmatmul.mubr.bf16.vlgmr.msra.gmra.mrb[8].mxu0 %v5486_v17 }
 0x58d   :  { %v3734_v7 = vpop.f32.mrb[8].mxu1 }
 0x58e   :  { %v3736_v57 = vpop.f32.mrb[9].mxu1 }
 0x58f   :  { %v3738_v13 = vpop.f32.mrb[10].mxu1 }
 0x590   :  { %v3740_v59 = vpop.f32.mrb[11].mxu1 }
 0x645   :  { %v3691_v11 = vpop.f32.mrb[8].mxu0 }
 0x646   :  { %v7820_v34 = vadd.f32 %v3734_v7, %v3691_v11  ;;  %v3693_v2 = vpop.f32.mrb[9].mxu0 }
 0x647   :  { %v7822_v58 = vadd.f32 %v3736_v57, %v3693_v2  ;;  %v3695_v42 = vpop.f32.mrb[10].mxu0 }
 0x648   :  { %v7824_v25 = vadd.f32 %v3738_v13, %v3695_v42  ;;  %v3697_v4 = vpop.f32.mrb[11].mxu0  ;;  %v3745_v44 = vmul.f32 %v7820_v34, %v7820_v34 }
 0x649   :  { %v7826_v23 = vadd.f32 %v3740_v59, %v3697_v4  ;;  %v3746_v30 = vmul.f32 %v7822_v58, %v7822_v58 }
 0x64a   :  { %v3747_v45 = vmul.f32 %v7824_v25, %v7824_v25  ;;  %v3749_v49 = vadd.f32 %v7824_v25, %v7820_v34 }
 0x64b   :  { %v3748_v36 = vmul.f32 %v7826_v23, %v7826_v23  ;;  %v3756_v5 = vadd.f32 %v7826_v23, %v7822_v58 }
 0x64c   :  { %v3750_v56 = vrot.slane %v3749_v49, 4  ;;  %v3763_v35 = vadd.f32 %v3747_v45, %v3745_v44 }
 0x64d   :  { %v3757_v32 = vrot.slane %v3756_v5, 4  ;;  %v3770_v18 = vadd.f32 %v3748_v36, %v3746_v30 }
 0x64e   :  { %v3751_v1 = vadd.f32 %v3750_v56, %v3749_v49  ;;  %v3764_v26 = vrot.slane %v3763_v35, 4 }
 0x64f   :  { %v3758_v43 = vadd.f32 %v3757_v32, %v3756_v5  ;;  %v3771_v60 = vrot.slane %v3770_v18, 4  ;;  %v3743_v5 = vld [vmem:[%s8483_s5] sm:$0x1] }
 0x650   :  { %v3752_v46 = vrot.slane %v3751_v1, 2  ;;  %v3765_v24 = vadd.f32 %v3764_v26, %v3763_v35  ;;  %v3744_v35 = vld [vmem:[%s8484_s6] sm:$0x1] }
 0x651   :  { %v3759_v38 = vrot.slane %v3758_v43, 2  ;;  %v3772_v17 = vadd.f32 %v3771_v60, %v3770_v18  ;;  %v8617_v32 = vld [vmem:[#allocation7_spill] sm:$0xff] }
 0x652   :  { %v3753_v51 = vadd.f32 %v3752_v46, %v3751_v1  ;;  %v3766_v54 = vrot.slane %v3765_v24, 2 }
 0x653   :  { %v3760_v0 = vadd.f32 %v3759_v38, %v3758_v43  ;;  %v3773_v8 = vrot.slane %v3772_v17, 2 }
 0x654   :  { %v3754_v52 = vrot.slane %v3753_v51, 1  ;;  %v3767_v22 = vadd.f32 %v3766_v54, %v3765_v24 }
 0x655   :  { %v3761_v39 = vrot.slane %v3760_v0, 1  ;;  %v3774_v12 = vadd.f32 %v3773_v8, %v3772_v17 }
 0x656   :  { %v3755_v20 = vadd.f32 %v3754_v52, %v3753_v51  ;;  %v3768_v37 = vrot.slane %v3767_v22, 1 }
 0x657   :  { %v3762_v21 = vadd.f32 %v3761_v39, %v3760_v0  ;;  %v3775_v47 = vrot.slane %v3774_v12, 1 }
 0x658   :  { %3782 = vrot.lane.b32.xlu1 %v3755_v20, %s6170_s22  ;;  %3778 = vrot.lane.b32.xlu0 %v3755_v20, %s6169_s21  ;;  %v3769_v14 = vadd.f32 %v3768_v37, %v3767_v22 }
 0x659   :  { %v3776_v41 = vadd.f32 %v3775_v47, %v3774_v12 }
 0x65c   :  { %3786 = vrot.lane.b32.xlu1 %v3755_v20, %s6168_s0  ;;  %3792 = vrot.lane.b32.xlu0 %v3762_v21, %s6169_s21 }
 0x660   :  { %3796 = vrot.lane.b32.xlu1 %v3762_v21, %s6170_s22  ;;  %3806 = vrot.lane.b32.xlu0 %v3769_v14, %s6169_s21 }
 0x664   :  { %3814 = vrot.lane.b32.xlu1 %v3769_v14, %s6168_s0  ;;  %3810 = vrot.lane.b32.xlu0 %v3769_v14, %s6170_s22 }
 0x668   :  { %3800 = vrot.lane.b32.xlu1 %v3762_v21, %s6168_s0  ;;  %3820 = vrot.lane.b32.xlu0 %v3776_v41, %s6169_s21 }
 0x66c   :  { %3828 = vrot.lane.b32.xlu1 %v3776_v41, %s6168_s0  ;;  %3824 = vrot.lane.b32.xlu0 %v3776_v41, %s6170_s22 }
 0x6ca   :  { %v3783_v9 = vpop.permute.xlu1 %3782  ;;  %v3779_v55 = vpop.permute.xlu0 %3778 }
 0x6cb   :  { %v3781_v31 = vadd.f32 %v3779_v55, %v3755_v20 }
 0x6cd   :  { %v3785_v3 = vadd.f32 %v3783_v9, %v3781_v31 }
 0x6ce   :  { %v3787_v19 = vpop.permute.xlu1 %3786  ;;  %v3793_v33 = vpop.permute.xlu0 %3792 }
 0x6cf   :  { %v3789_v16 = vadd.f32 %v3787_v19, %v3785_v3 }
 0x6d1   :  { %v3790_v48 = vadd.f32 %v3789_v16, %v3762_v21 }
 0x6d2   :  { %v3797_v29 = vpop.permute.xlu1 %3796  ;;  %v3807_v6 = vpop.permute.xlu0 %3806 }
 0x6d3   :  { %v3795_v15 = vadd.f32 %v3793_v33, %v3790_v48  ;;  %v3809_v27 = vadd.f32 %v3807_v6, %v3769_v14 }
 0x6d5   :  { %v3799_v40 = vadd.f32 %v3797_v29, %v3795_v15  ;;  %v8618_v29 = vld [vmem:[#allocation8_spill] sm:$0xff] }
 0x6d6   :  { %v3815_v50 = vpop.permute.xlu1 %3814  ;;  %v3811_v53 = vpop.permute.xlu0 %3810 }
 0x6d7   :  { %v3813_v63 = vadd.f32 %v3811_v53, %v3809_v27 }
 0x6d9   :  { %v3817_v61 = vadd.f32 %v3815_v50, %v3813_v63 }
 0x6da   :  { %v3801_v28 = vpop.permute.xlu1 %3800  ;;  %v3821_v10 = vpop.permute.xlu0 %3820 }
 0x6db   :  { %v3803_v7 = vadd.f32 %v3801_v28, %v3799_v40  ;;  %v3818_v57 = vadd.f32 %v3817_v61, %v3776_v41 }
 0x6dd   :  { %v3823_v13 = vadd.f32 %v3821_v10, %v3818_v57  ;;  %v3804_v11 = vmul.f32 0.0078125, %v3803_v7 }
 0x6de   :  { %v3825_v59 = vpop.permute.xlu0 %3824  ;;  %v3829_v42 = vpop.permute.xlu1 %3828 }
 0x6df   :  { %v3827_v2 = vadd.f32 %v3825_v59, %v3823_v13  ;;  %v3833_v44 = vmul.f32 %v3804_v11, %v3804_v11 }
 0x6e1   :  { %v3831_v4 = vadd.f32 %v3829_v42, %v3827_v2 }
 0x6e3   :  { %v3832_v45 = vmul.f32 0.0078125, %v3831_v4 }
 0x6e5   :  { %v3834_v49 = vsub.f32 %v3832_v45, %v3833_v44 }
 0x6e7   :  { %v3835_v36 = vadd.f32 1e-05, %v3834_v49 }
 0x6e9   :  { %6132 = vrsqrt.f32 %v3835_v36 }
 0x6f3   :  { %v6133_v30 = vpop.eup %6132 }
 0x6f4   :  { %v3837_v56 = vmul.f32 %v6133_v30, %v3743_v5 }
 0x6f6   :  { %v3844_v1 = vrot.slane %v3837_v56, %v8617_v32  ;;  %v3838_v26 = vmul.f32 %v3837_v56, %v3804_v11 }
 0x6f8   :  { %3848 = vrot.lane.b32.xlu1 %v3844_v1, %s6170_s22  ;;  %3845 = vrot.lane.b32.xlu0 %v3844_v1, %s6168_s0  ;;  %v3839_v18 = vsub.f32 %v3744_v35, %v3838_v26 }
 0x6fa   :  { %v3861_v43 = vrot.slane %v3839_v18, %v8617_v32 }
 0x6fc   :  { %3851 = vrot.lane.b32.xlu0 %v3844_v1, %s6169_s21  ;;  %3862 = vrot.lane.b32.xlu1 %v3861_v43, %s6168_s0 }
 0x700   :  { %3865 = vrot.lane.b32.xlu0 %v3861_v43, %s6170_s22  ;;  %3868 = vrot.lane.b32.xlu1 %v3861_v43, %s6169_s21 }
 0x76a   :  { %v3849_v46 = vpop.permute.xlu1 %3848  ;;  %v3846_v24 = vpop.permute.xlu0 %3845 }
 0x76b   :  { %v3854_v38 = vsel %vm578_vm2, %v3837_v56, %v3846_v24 }
 0x76c   :  { %v3855_v51 = vsel %vm580_vm3, %v3854_v38, %v3849_v46 }
 0x76e   :  { %v3852_v54 = vpop.permute.xlu0 %3851  ;;  %v3863_v60 = vpop.permute.xlu1 %3862 }
 0x76f   :  { %v3856_v0 = vsel %vm582_vm4, %v3855_v51, %v3852_v54  ;;  %v3871_v17 = vsel %vm578_vm2, %v3839_v18, %v3863_v60 }
 0x770   :  { %v3877_v52 = vrot.slane %v3856_v0, %v8617_v32 }
 0x772   :  { %v3866_v20 = vpop.permute.xlu0 %3865  ;;  %v3869_v39 = vpop.permute.xlu1 %3868  ;;  %v3878_v8 = vmul.f32 %v7820_v34, %v3877_v52  ;;  %v3879_v37 = vmul.f32 %v7822_v58, %v3877_v52  ;;  %v3880_v14 = vmul.f32 %v7824_v25, %v3877_v52  ;;  %v3881_v12 = vmul.f32 %v7826_v23, %v3877_v52 }
 0x773   :  { %v3872_v22 = vsel %vm580_vm3, %v3871_v17, %v3866_v20 }
 0x774   :  { %v3873_v21 = vsel %vm582_vm4, %v3872_v22, %v3869_v39 }
 0x775   :  { %v3885_v47 = vrot.slane %v3873_v21, %v8617_v32 }
 0x777   :  { %v3886_v41 = vadd.f32 %v3885_v47, %v3878_v8  ;;  %v3887_v9 = vadd.f32 %v3885_v47, %v3879_v37  ;;  %v3888_v55 = vadd.f32 %v3885_v47, %v3880_v14  ;;  %v3889_v31 = vadd.f32 %v3885_v47, %v3881_v12 }
 0x779   :  { %v3890_v3 = vmax.f32 %v3886_v41, 0.0  ;;  %v3891_v19 = vmax.f32 %v3887_v9, 0.0  ;;  %v3892_v33 = vmax.f32 %v3888_v55, 0.0  ;;  %v3893_v16 = vmax.f32 %v3889_v31, 0.0 }
 0x77b   :  { %v5611_v48 = vpack.c.bf16 %v3891_v19, %v3890_v3  ;;  %v5612_v34 = vpack.c.bf16 %v3893_v16, %v3892_v33 }
 0x77d   :  { %v3906_v6 = vrot.slane %v5611_v48, %v8618_v29  ;;  %v3913_v58 = vrot.slane %v5612_v34, %v8618_v29 }
 0x77f   :  { %v3914_v15 = vcombine.high %v3906_v6, %v3906_v6  ;;  %v3915_v25 = vcombine.high %v3913_v58, %v3913_v58  ;;  %v3922_v23 = vrot.slane %v3906_v6, %v8618_v29  ;;  %v3929_v27 = vrot.slane %v3913_v58, %v8618_v29 }
 0x781   :  { %v3936_v50 = vrot.slane %v3914_v15, %v8618_v29  ;;  %v7884_v53 = vrot.slane %v3915_v25, %v8618_v29  ;;  %v3944_v63 = vcombine.high %v3922_v23, %v3922_v23  ;;  %v3945_v40 = vcombine.high %v3929_v27, %v3929_v27 }
 0x782   :  { %v7887_v61 = vrot.slane %v3922_v23, %v8618_v29  ;;  %v7890_v28 = vrot.slane %v3929_v27, %v8618_v29 }
 0x783   :  { %v3946_v10 = vcombine.high %v3936_v50, %v3936_v50  ;;  %v3947_v7 = vcombine.high %v7884_v53, %v7884_v53  ;;  %v4064_v57 = vrot.slane %v7884_v53, %v8618_v29  ;;  %v7897_v13 = vrot.slane %v3945_v40, %v8618_v29 }
 0x784   :  { %v3962_v59 = vrot.slane %v7887_v61, %v8618_v29  ;;  %v4050_v11 = vrot.slane %v7890_v28, %v8618_v29  ;;  %v7904_v2 = vrot.slane %v3936_v50, %v8618_v29  ;;  %v7907_v42 = vrot.slane %v3944_v63, %v8618_v29 }
 0x785   :  { %v4072_v4 = vrot.slane %v4064_v57, %v8618_v29  ;;  %v4094_v44 = vrot.slane %v7897_v13, %v8618_v29  ;;  %v4065_v45 = vcombine.high %v4064_v57, %v4064_v57  ;;  %v7913_v49 = vrot.slane %v3946_v10, %v8618_v29 }
 0x786   :  { %v4125_v36 = vsel %vm1193_vm5, %v3962_v59, 4286644096  ;;  %v4229_v5 = vsel %vm1193_vm5, %v4050_v11, 4286644096  ;;  %v3984_v30 = vrot.slane %v7904_v2, %v8618_v29  ;;  %v4006_v56 = vrot.slane %v7907_v42, %v8618_v29 }
 0x787   :  { %v4127_v35 = vunpack.i.l.bf16 %v4125_v36  ;;  %v4128_v1 = vunpack.i.h.bf16 %v4125_v36  ;;  %v4255_v26 = vsel %vm1193_vm5, %v4072_v4, 4286644096  ;;  %v4231_v18 = vunpack.i.l.bf16 %v4229_v5 }
 0x788   :  { %v4257_v43 = vunpack.i.l.bf16 %v4255_v26  ;;  %v4258_v46 = vunpack.i.h.bf16 %v4255_v26  ;;  %v4232_v24 = vunpack.i.h.bf16 %v4229_v5  ;;  %v4281_v38 = vsel %vm1193_vm5, %v4094_v44, 4286644096 }
 0x789   :  { %v4129_v51 = vmax.f32 %v4127_v35, %v4128_v1  ;;  %v4283_v54 = vunpack.i.l.bf16 %v4281_v38  ;;  %v4284_v60 = vunpack.i.h.bf16 %v4281_v38  ;;  %v4151_v0 = vsel %vm1193_vm5, %v3984_v30, 4286644096 }
 0x78a   :  { %v4259_v52 = vmax.f32 %v4257_v43, %v4258_v46  ;;  %v4233_v17 = vmax.f32 %v4231_v18, %v4232_v24  ;;  %v4153_v20 = vunpack.i.l.bf16 %v4151_v0  ;;  %v4154_v39 = vunpack.i.h.bf16 %v4151_v0 }
 0x78b   :  { %v4130_v22 = vrot.slane %v4129_v51, 4  ;;  %v4285_v8 = vmax.f32 %v4283_v54, %v4284_v60  ;;  %v4079_v21 = vrot.slane %v4065_v45, %v8618_v29  ;;  %v4177_v37 = vsel %vm1193_vm5, %v4006_v56, 4286644096 }
 0x78c   :  { %v4260_v14 = vrot.slane %v4259_v52, 4  ;;  %v4234_v12 = vrot.slane %v4233_v17, 4  ;;  %v4155_v47 = vmax.f32 %v4153_v20, %v4154_v39  ;;  %v4179_v41 = vunpack.i.l.bf16 %v4177_v37 }
 0x78d   :  { %v4131_v9 = vmax.f32 %v4129_v51, %v4130_v22  ;;  %v4286_v55 = vrot.slane %v4285_v8, 4  ;;  %v4268_v31 = vsel %vm1193_vm5, %v4079_v21, 4286644096  ;;  %v4180_v3 = vunpack.i.h.bf16 %v4177_v37 }
 0x78e   :  { %v4261_v19 = vmax.f32 %v4259_v52, %v4260_v14  ;;  %v4235_v33 = vmax.f32 %v4233_v17, %v4234_v12  ;;  %v4156_v16 = vrot.slane %v4155_v47, 4  ;;  %v4270_v48 = vunpack.i.l.bf16 %v4268_v31 }
 0x78f   :  { %v4132_v34 = vrot.slane %v4131_v9, 2  ;;  %v4287_v6 = vmax.f32 %v4285_v8, %v4286_v55  ;;  %v4271_v58 = vunpack.i.h.bf16 %v4268_v31  ;;  %v4181_v15 = vmax.f32 %v4179_v41, %v4180_v3 }
 0x790   :  { %v4262_v25 = vrot.slane %v4261_v19, 2  ;;  %v4236_v23 = vrot.slane %v4235_v33, 2  ;;  %v4157_v27 = vmax.f32 %v4155_v47, %v4156_v16  ;;  %v4028_v50 = vrot.slane %v7913_v49, %v8618_v29 }
 0x791   :  { %v4133_v63 = vmax.f32 %v4131_v9, %v4132_v34  ;;  %v4288_v40 = vrot.slane %v4287_v6, 2  ;;  %v4272_v10 = vmax.f32 %v4270_v48, %v4271_v58  ;;  %v4182_v57 = vrot.slane %v4181_v15, 4 }
 0x792   :  { %v4263_v59 = vmax.f32 %v4261_v19, %v4262_v25  ;;  %v4237_v11 = vmax.f32 %v4235_v33, %v4236_v23  ;;  %v4158_v4 = vrot.slane %v4157_v27, 2  ;;  %v4203_v44 = vsel %vm1193_vm5, %v4028_v50, 4286644096 }
 0x793   :  { %v4134_v45 = vrot.slane %v4133_v63, 1  ;;  %v4289_v36 = vmax.f32 %v4287_v6, %v4288_v40  ;;  %v4273_v5 = vrot.slane %v4272_v10, 4  ;;  %v4183_v30 = vmax.f32 %v4181_v15, %v4182_v57 }
 0x794   :  { %v4264_v56 = vrot.slane %v4263_v59, 1  ;;  %v4238_v35 = vrot.slane %v4237_v11, 1  ;;  %v4159_v1 = vmax.f32 %v4157_v27, %v4158_v4  ;;  %v4205_v26 = vunpack.i.l.bf16 %v4203_v44 }
 0x795   :  { %v4135_v18 = vmax.f32 %v4133_v63, %v4134_v45  ;;  %v4290_v43 = vrot.slane %v4289_v36, 1  ;;  %v4274_v46 = vmax.f32 %v4272_v10, %v4273_v5  ;;  %v4184_v24 = vrot.slane %v4183_v30, 2 }
 0x796   :  { %v4265_v38 = vmax.f32 %v4263_v59, %v4264_v56  ;;  %v4239_v51 = vmax.f32 %v4237_v11, %v4238_v35  ;;  %v4160_v54 = vrot.slane %v4159_v1, 1  ;;  %v4206_v60 = vunpack.i.h.bf16 %v4203_v44 }
 0x797   :  { %v7930_v0 = vpack.i.bf16 %v4135_v18, %v4135_v18  ;;  %v4291_v52 = vmax.f32 %v4289_v36, %v4290_v43  ;;  %v4275_v17 = vrot.slane %v4274_v46, 2  ;;  %v4185_v20 = vmax.f32 %v4183_v30, %v4184_v24 }
 0x798   :  { %v7932_v39 = vpack.i.bf16 %v4265_v38, %v4265_v38  ;;  %v7934_v22 = vpack.i.bf16 %v4239_v51, %v4239_v51  ;;  %v4161_v8 = vmax.f32 %v4159_v1, %v4160_v54  ;;  %v4207_v21 = vmax.f32 %v4205_v26, %v4206_v60 }
 0x799   :  { %4340 = vrot.lane.b32.xlu0 %v7930_v0, %s6169_s21  ;;  %v7938_v37 = vpack.i.bf16 %v4291_v52, %v4291_v52  ;;  %v4276_v14 = vmax.f32 %v4274_v46, %v4275_v17  ;;  %v4186_v12 = vrot.slane %v4185_v20, 1  ;;  %v3955_v47 = vcombine.high %v7887_v61, %v7887_v61 }
 0x79a   :  { %4350 = vrot.lane.b32.xlu1 %v7932_v39, %s6169_s21  ;;  %v7944_v41 = vpack.i.bf16 %v4161_v8, %v4161_v8  ;;  %v4208_v9 = vrot.slane %v4207_v21, 4  ;;  %v7950_v55 = vrot.slane %v3947_v7, %v8618_v29  ;;  %v3977_v31 = vcombine.high %v7904_v2, %v7904_v2 }
 0x79b   :  { %v4277_v3 = vrot.slane %v4276_v14, 1  ;;  %v4187_v19 = vmax.f32 %v4185_v20, %v4186_v12  ;;  %v3969_v33 = vrot.slane %v3955_v47, %v8618_v29  ;;  %v4087_v61 = vcombine.high %v7897_v13, %v7897_v13 }
 0x79c   :  { %v4209_v16 = vmax.f32 %v4207_v21, %v4208_v9  ;;  %v4116_v48 = vrot.slane %v7950_v55, %v8618_v29  ;;  %v3991_v34 = vrot.slane %v3977_v31, %v8618_v29  ;;  %v3999_v53 = vcombine.high %v7907_v42, %v7907_v42 }
 0x79d   :  { %4348 = vrot.lane.b32.xlu0 %v7934_v22, %s6169_s21  ;;  %v4278_v7 = vmax.f32 %v4276_v14, %v4277_v3  ;;  %v7964_v2 = vpack.i.bf16 %v4187_v19, %v4187_v19  ;;  %v4138_v6 = vsel %vm1193_vm5, %v3969_v33, 4286644096  ;;  %v4101_v58 = vrot.slane %v4087_v61, %v8618_v29 }
 0x79e   :  { %4352 = vrot.lane.b32.xlu1 %v7938_v37, %s6169_s21  ;;  %v4210_v13 = vrot.slane %v4209_v16, 2  ;;  %v4140_v15 = vunpack.i.l.bf16 %v4138_v6  ;;  %v4141_v25 = vunpack.i.h.bf16 %v4138_v6  ;;  %v4307_v23 = vsel %vm1193_vm5, %v4116_v48, 4286644096 }
 0x79f   :  { %v7971_v27 = vpack.i.bf16 %v4278_v7, %v4278_v7  ;;  %v4309_v42 = vunpack.i.l.bf16 %v4307_v23  ;;  %v4310_v50 = vunpack.i.h.bf16 %v4307_v23  ;;  %v4164_v63 = vsel %vm1193_vm5, %v3991_v34, 4286644096 }
 0x7a0   :  { %v4211_v40 = vmax.f32 %v4209_v16, %v4210_v13  ;;  %v4142_v10 = vmax.f32 %v4140_v15, %v4141_v25  ;;  %v4166_v57 = vunpack.i.l.bf16 %v4164_v63  ;;  %v4167_v59 = vunpack.i.h.bf16 %v4164_v63 }
 0x7a1   :  { %4342 = vrot.lane.b32.xlu0 %v7944_v41, %s6169_s21  ;;  %v4311_v11 = vmax.f32 %v4309_v42, %v4310_v50  ;;  %v4294_v4 = vsel %vm1193_vm5, %v4101_v58, 4286644096  ;;  %v4013_v44 = vrot.slane %v3999_v53, %v8618_v29  ;;  %v4021_v45 = vcombine.high %v7913_v49, %v7913_v49 }
 0x7a2   :  { %4390 = vrot.lane.b32.xlu1 %v7971_v27, %s6169_s21  ;;  %v4212_v36 = vrot.slane %v4211_v40, 1  ;;  %v4143_v5 = vrot.slane %v4142_v10, 4  ;;  %v4168_v30 = vmax.f32 %v4166_v57, %v4167_v59  ;;  %v4296_v56 = vunpack.i.l.bf16 %v4294_v4 }
 0x7a3   :  { %v4312_v35 = vrot.slane %v4311_v11, 4  ;;  %v4297_v1 = vunpack.i.h.bf16 %v4294_v4  ;;  %v4190_v26 = vsel %vm1193_vm5, %v4013_v44, 4286644096  ;;  %v4035_v18 = vrot.slane %v4021_v45, %v8618_v29 }
 0x7a4   :  { %v4213_v43 = vmax.f32 %v4211_v40, %v4212_v36  ;;  %v4144_v46 = vmax.f32 %v4142_v10, %v4143_v5  ;;  %v4169_v24 = vrot.slane %v4168_v30, 4  ;;  %v4192_v38 = vunpack.i.l.bf16 %v4190_v26 }
 0x7a5   :  { %4344 = vrot.lane.b32.xlu0 %v7964_v2, %s6169_s21  ;;  %v4313_v49 = vmax.f32 %v4311_v11, %v4312_v35  ;;  %v4298_v51 = vmax.f32 %v4296_v56, %v4297_v1  ;;  %v4193_v54 = vunpack.i.h.bf16 %v4190_v26  ;;  %v4216_v60 = vsel %vm1193_vm5, %v4035_v18, 4286644096 }
 0x7a6   :  { %v7987_v52 = vpack.i.bf16 %v4213_v43, %v4213_v43  ;;  %v4145_v17 = vrot.slane %v4144_v46, 2  ;;  %v4170_v20 = vmax.f32 %v4168_v30, %v4169_v24  ;;  %v4218_v8 = vunpack.i.l.bf16 %v4216_v60 }
 0x7a7   :  { %v4314_v21 = vrot.slane %v4313_v49, 2  ;;  %v4299_v14 = vrot.slane %v4298_v51, 4  ;;  %v4194_v12 = vmax.f32 %v4192_v38, %v4193_v54  ;;  %v4219_v47 = vunpack.i.h.bf16 %v4216_v60 }
 0x7a8   :  { %4346 = vrot.lane.b32.xlu1 %v7987_v52, %s6169_s21  ;;  %v4146_v9 = vmax.f32 %v4144_v46, %v4145_v17  ;;  %v4171_v31 = vrot.slane %v4170_v20, 2  ;;  %v4043_v3 = vcombine.high %v7890_v28, %v7890_v28  ;;  %v4109_v19 = vcombine.high %v7950_v55, %v7950_v55 }
 0x7a9   :  { %v4315_v33 = vmax.f32 %v4313_v49, %v4314_v21  ;;  %v4300_v61 = vmax.f32 %v4298_v51, %v4299_v14  ;;  %v4195_v16 = vrot.slane %v4194_v12, 4  ;;  %v4220_v48 = vmax.f32 %v4218_v8, %v4219_v47 }
 0x7aa   :  { %v4147_v34 = vrot.slane %v4146_v9, 1  ;;  %v4172_v53 = vmax.f32 %v4170_v20, %v4171_v31  ;;  %v4057_v7 = vrot.slane %v4043_v3, %v8618_v29  ;;  %v4123_v6 = vrot.slane %v4109_v19, %v8618_v29 }
 0x7ab   :  { %v4316_v58 = vrot.slane %v4315_v33, 1  ;;  %v4301_v13 = vrot.slane %v4300_v61, 2  ;;  %v4196_v15 = vmax.f32 %v4194_v12, %v4195_v16  ;;  %v4221_v25 = vrot.slane %v4220_v48, 4 }
 0x7ac   :  { %v4148_v23 = vmax.f32 %v4146_v9, %v4147_v34  ;;  %v4173_v42 = vrot.slane %v4172_v53, 1  ;;  %v4242_v28 = vsel %vm1193_vm5, %v4057_v7, 4286644096  ;;  %v4320_v55 = vsel %vm1193_vm5, %v4123_v6, 4286644096 }
 0x7ad   :  { %v4317_v50 = vmax.f32 %v4315_v33, %v4316_v58  ;;  %v4302_v63 = vmax.f32 %v4300_v61, %v4301_v13  ;;  %v4197_v40 = vrot.slane %v4196_v15, 2  ;;  %v4222_v10 = vmax.f32 %v4220_v48, %v4221_v25 }
 0x7ae   :  { %v7999_v57 = vpack.i.bf16 %v4148_v23, %v4148_v23  ;;  %v4174_v59 = vmax.f32 %v4172_v53, %v4173_v42  ;;  %v4244_v11 = vunpack.i.l.bf16 %v4242_v28  ;;  %v4245_v4 = vunpack.i.h.bf16 %v4242_v28 }
 0x7af   :  { %v8001_v29 = vpack.i.bf16 %v4317_v50, %v4317_v50  ;;  %v4303_v44 = vrot.slane %v4302_v63, 1  ;;  %v4198_v45 = vmax.f32 %v4196_v15, %v4197_v40  ;;  %v4223_v36 = vrot.slane %v4222_v10, 2 }
 0x7b0   :  { %4380 = vrot.lane.b32.xlu0 %v7999_v57, %s6169_s21  ;;  %v4246_v5 = vmax.f32 %v4244_v11, %v4245_v4  ;;  %v4322_v30 = vunpack.i.l.bf16 %v4320_v55  ;;  %v4323_v56 = vunpack.i.h.bf16 %v4320_v55  ;;  %v8007_v18 = vpack.i.bf16 %v4174_v59, %v4174_v59 }
 0x7b1   :  { %4354 = vrot.lane.b32.xlu1 %v8001_v29, %s6169_s21  ;;  %v4304_v35 = vmax.f32 %v4302_v63, %v4303_v44  ;;  %v4199_v1 = vrot.slane %v4198_v45, 1  ;;  %v4224_v26 = vmax.f32 %v4222_v10, %v4223_v36  ;;  %vm4543_vm5 = vsmask.f32 2304 }
 0x7b2   :  { %v4247_v43 = vrot.slane %v4246_v5, 4  ;;  %v4324_v46 = vmax.f32 %v4322_v30, %v4323_v56 }
 0x7b3   :  { %v8009_v24 = vpack.i.bf16 %v4304_v35, %v4304_v35  ;;  %v4200_v38 = vmax.f32 %v4198_v45, %v4199_v1  ;;  %v4225_v49 = vrot.slane %v4224_v26, 1 }
 0x7b4   :  { %4382 = vrot.lane.b32.xlu0 %v8007_v18, %s6169_s21  ;;  %v4248_v51 = vmax.f32 %v4246_v5, %v4247_v43  ;;  %v4325_v54 = vrot.slane %v4324_v46, 4 }
 0x7b5   :  { %4392 = vrot.lane.b32.xlu1 %v8009_v24, %s6169_s21  ;;  %v4226_v60 = vmax.f32 %v4224_v26, %v4225_v49  ;;  %v8015_v17 = vpack.i.bf16 %v4200_v38, %v4200_v38 }
 0x7b6   :  { %v4249_v20 = vrot.slane %v4248_v51, 2  ;;  %v4326_v8 = vmax.f32 %v4324_v46, %v4325_v54 }
 0x7b7   :  { %v8017_v21 = vpack.i.bf16 %v4226_v60, %v4226_v60 }
 0x7b8   :  { %4384 = vrot.lane.b32.xlu0 %v8015_v17, %s6169_s21  ;;  %v4250_v14 = vmax.f32 %v4248_v51, %v4249_v20  ;;  %v4327_v12 = vrot.slane %v4326_v8, 2 }
 0x7b9   :  { %4386 = vrot.lane.b32.xlu1 %v8017_v21, %s6169_s21 }
 0x7ba   :  { %v4251_v47 = vrot.slane %v4250_v14, 1  ;;  %v4328_v9 = vmax.f32 %v4326_v8, %v4327_v12 }
 0x7bc   :  { %v4252_v31 = vmax.f32 %v4250_v14, %v4251_v47  ;;  %v4329_v3 = vrot.slane %v4328_v9, 1 }
 0x7be   :  { %v8023_v19 = vpack.i.bf16 %v4252_v31, %v4252_v31  ;;  %v4330_v33 = vmax.f32 %v4328_v9, %v4329_v3 }
 0x7c0   :  { %4388 = vrot.lane.b32.xlu0 %v8023_v19, %s6169_s21  ;;  %v8027_v61 = vpack.i.bf16 %v4330_v33, %v4330_v33 }
 0x7c2   :  { %4394 = vrot.lane.b32.xlu1 %v8027_v61, %s6169_s21 }
 0x80b   :  { %v4341_v16 = vpop.permute.xlu0 %4340 }
 0x80c   :  { %v4351_v48 = vpop.permute.xlu1 %4350  ;;  %v4364_v15 = vmax.bf16 %v4341_v16, %v7930_v0 }
 0x80d   :  { %v4369_v40 = vmax.bf16 %v4351_v48, %v7932_v39 }
 0x80e   :  { %v4420_v50 = vunpack.c.l.b16 %v4364_v15 }
 0x80f   :  { %v4349_v34 = vpop.permute.xlu0 %4348  ;;  %v4425_v44 = vunpack.c.l.b16 %v4369_v40 }
 0x810   :  { %v4353_v53 = vpop.permute.xlu1 %4352 }
 0x811   :  { %v4370_v59 = vmax.bf16 %v4353_v53, %v7938_v37  ;;  %v4434_v56 = vrot.slane %v4425_v44, 7 }
 0x813   :  { %v4343_v7 = vpop.permute.xlu0 %4342  ;;  %v4426_v45 = vunpack.c.l.b16 %v4370_v59 }
 0x814   :  { %v4365_v6 = vmax.bf16 %v4343_v7, %v7944_v41  ;;  %v4391_v58 = vpop.permute.xlu1 %4390 }
 0x815   :  { %v4436_v37 = vrot.slane %v4426_v45, 6 }
 0x816   :  { %v4421_v13 = vunpack.c.l.b16 %v4365_v6 }
 0x817   :  { %v4345_v25 = vpop.permute.xlu0 %4344 }
 0x818   :  { %v4366_v23 = vmax.bf16 %v4345_v25, %v7964_v2  ;;  %v4428_v42 = vrot.slane %v4421_v13, 7  ;;  %v4368_v2 = vmax.bf16 %v4349_v34, %v7934_v22 }
 0x81a   :  { %v4422_v28 = vunpack.c.l.b16 %v4366_v23  ;;  %v4347_v55 = vpop.permute.xlu1 %4346  ;;  %v4429_v41 = vsel %vm2380_vm7, %v4428_v42, %v4420_v50  ;;  %v4424_v39 = vunpack.c.l.b16 %v4368_v2 }
 0x81b   :  { %v4367_v63 = vmax.bf16 %v4347_v55, %v7987_v52 }
 0x81c   :  { %v4430_v10 = vrot.slane %v4422_v28, 6  ;;  %v4435_v22 = vsel %vm2380_vm7, %v4434_v56, %v4424_v39  ;;  %v6098_v56 = vld [vmem:[%s8485_s7 + $0x50] sm:$0xff]  }
 0x81d   :  { %v4423_v11 = vunpack.c.l.b16 %v4367_v63  ;;  %v4437_v49 = vsel %vm2383_vm6, %v4436_v37, %v4435_v22  ;;  %v6099_v39 = vld [vmem:[%s8485_s7 + $0x10] sm:$0xff]   ;;  %v6101_v37 = vld [vmem:[%s8485_s7 + $0x18] sm:$0xff]  }
 0x81e   :  { %v4431_v4 = vsel %vm2383_vm6, %v4430_v10, %v4429_v41 }
 0x81f   :  { %v4432_v0 = vrot.slane %v4423_v11, 5 }
 0x821   :  { %v4433_v36 = vsel %vm2386_vm8, %v4432_v0, %v4431_v4 }
 0x822   :  { %v4440_v5 = vpack.c.b16 %v4433_v36, %v4433_v36  ;;  %v4381_v30 = vpop.permute.xlu0 %4380  ;;  %v6094_v36 = vld [vmem:[%s8485_s7 + $0x40] sm:$0xff]  }
 0x823   :  { %v4355_v52 = vpop.permute.xlu1 %4354  ;;  %v4404_v54 = vmax.bf16 %v4381_v30, %v7999_v57  ;;  %v6096_v30 = vld [vmem:[%s8485_s7 + $0x48] sm:$0xff]   ;;  %5653 = vmatprep.subr.bf16.mxu1 %v6094_v36 }
 0x824   :  { %v4371_v35 = vmax.bf16 %v4355_v52, %v8001_v29  ;;  %4442 = vrot.lane.b32.xlu0 %v4440_v5, %s6169_s21  ;;  %v6097_v52 = vld [vmem:[%s8485_s7 + $0x8] sm:$0xff]  }
 0x825   :  { %v4454_v31 = vunpack.c.l.b16 %v4404_v54 }
 0x826   :  { %v4427_v1 = vunpack.c.l.b16 %v4371_v35  ;;  %v4383_v26 = vpop.permute.xlu0 %4382  ;;  %v6100_v35 = vld [vmem:[%s8485_s7 + $0x58] sm:$0xff]  }
 0x827   :  { %v4405_v43 = vmax.bf16 %v4383_v26, %v8007_v18  ;;  %v4393_v46 = vpop.permute.xlu1 %4392  ;;  %v4409_v18 = vmax.bf16 %v4391_v58, %v7971_v27 }
 0x828   :  { %v4438_v38 = vrot.slane %v4427_v1, 5  ;;  %v4410_v16 = vmax.bf16 %v4393_v46, %v8009_v24  ;;  %v6102_v1 = vld [vmem:[%s8485_s7 + $0x60] sm:$0xff]  }
 0x829   :  { %v4455_v51 = vunpack.c.l.b16 %v4405_v43  ;;  %v4459_v34 = vunpack.c.l.b16 %v4409_v18  ;;  %v6104_v18 = vld [vmem:[%s8485_s7 + $0x68] sm:$0xff]  }
 0x82a   :  { %v4439_v60 = vsel %vm2386_vm8, %v4438_v38, %v4437_v49  ;;  %v4385_v20 = vpop.permute.xlu0 %4384  ;;  %v4460_v6 = vunpack.c.l.b16 %v4410_v16 }
 0x82b   :  { %v4441_v29 = vpack.c.b16 %v4439_v60, %v4439_v60  ;;  %v4406_v8 = vmax.bf16 %v4385_v20, %v8015_v17  ;;  %v4387_v14 = vpop.permute.xlu1 %4386  ;;  %v4462_v12 = vrot.slane %v4455_v51, 7  ;;  %v4468_v13 = vrot.slane %v4459_v34, 7 }
 0x82c   :  { %v4407_v47 = vmax.bf16 %v4387_v14, %v8017_v21  ;;  %v4470_v42 = vrot.slane %v4460_v6, 6 }
 0x82d   :  { %v4456_v9 = vunpack.c.l.b16 %v4406_v8  ;;  %4444 = vrot.lane.b32.xlu1 %v4441_v29, %s6169_s21  ;;  %v4463_v57 = vsel %vm2380_vm7, %v4462_v12, %v4454_v31 }
 0x82e   :  { %v4457_v3 = vunpack.c.l.b16 %v4407_v47  ;;  %v6103_v47 = vld [vmem:[%s8485_s7 + $0x20] sm:$0xff]  }
 0x82f   :  { %v4464_v33 = vrot.slane %v4456_v9, 6 }
 0x830   :  { %v4466_v48 = vrot.slane %v4457_v3, 5 }
 0x831   :  { %v4465_v17 = vsel %vm2383_vm6, %v4464_v33, %v4463_v57 }
 0x832   :  { %v4467_v53 = vsel %vm2386_vm8, %v4466_v48, %v4465_v17  ;;  %v4389_v7 = vpop.permute.xlu0 %4388 }
 0x833   :  { %v4474_v21 = vpack.c.b16 %v4467_v53, %v4467_v53  ;;  %v4408_v27 = vmax.bf16 %v4389_v7, %v8023_v19 }
 0x834   :  { %v4395_v58 = vpop.permute.xlu1 %4394 }
 0x835   :  { %v4458_v15 = vunpack.c.l.b16 %v4408_v27  ;;  %v4411_v25 = vmax.bf16 %v4395_v58, %v8027_v61  ;;  %4476 = vrot.lane.b32.xlu0 %v4474_v21, %s6170_s22 }
 0x837   :  { %v4469_v24 = vsel %vm2380_vm7, %v4468_v13, %v4458_v15  ;;  %v4461_v23 = vunpack.c.l.b16 %v4411_v25 }
 0x838   :  { %v4471_v55 = vsel %vm2383_vm6, %v4470_v42, %v4469_v24  ;;  %vm8103_vm6 = vmand %vm236_vm0, %vm4543_vm5  ;;  %vm6174_vm0 = vmmov 0  }
 0x839   :  { %v4472_v28 = vrot.slane %v4461_v23, 5  ;;  %4480 = vrot.lane.b32.xlu0 %v4474_v21, %s6168_s0 }
 0x83b   :  { %v4473_v50 = vsel %vm2386_vm8, %v4472_v28, %v4471_v55  ;;  %v6105_v28 = vld [vmem:[%s8485_s7 + $0x28] sm:$0xff]   ;;  %v6106_v55 = vld [vmem:[%s8485_s7 + $0x70] sm:$0xff]  }
 0x83c   :  { %v4475_v19 = vpack.c.b16 %v4473_v50, %v4473_v50 }
 0x83e   :  { %4478 = vrot.lane.b32.xlu1 %v4475_v19, %s6170_s22 }
 0x842   :  { %4482 = vrot.lane.b32.xlu1 %v4475_v19, %s6168_s0 }
 0x896   :  { %v4443_v63 = vpop.permute.xlu0 %4442 }
 0x897   :  { %v4486_v40 = vsel %vm578_vm2, %v4440_v5, %v4443_v63  ;;  %v6095_v5 = vld [vmem:[%s8485_s7] sm:$0xff]  }
 0x898   :  { %5654 = vmatpush3.bf16.msra.mxu1 %v6095_v5 }
 0x899   :  { %5655 = vmatprep.subr.bf16.mxu1 %v6096_v30  ;;  %v6172_v30 = vmov 1983009808  }
 0x89c   :  { %5656 = vmatpush3.bf16.msra.mxu1 %v6097_v52  ;;  %v4604_v52 = vunpack.c.l.s4 %v6172_v30 }
 0x89d   :  { %5657 = vmatprep.subr.bf16.mxu1 %v6098_v56 }
 0x89f   :  { %v4445_v41 = vpop.permute.xlu1 %4444 }
 0x8a0   :  { %v4489_v0 = vsel %vm578_vm2, %v4441_v29, %v4445_v41  ;;  %5658 = vmatpush3.bf16.msra.mxu1 %v6099_v39  ;;  %v6107_v41 = vld [vmem:[%s8485_s7 + $0x30] sm:$0xff]   ;;  %v4605_v39 = vunpack.c.0.s8 %v4604_v52 }
 0x8a1   :  { %5659 = vmatprep.subr.bf16.mxu1 %v6100_v35 }
 0x8a4   :  { %5660 = vmatpush3.bf16.msra.mxu1 %v6101_v37 }
 0x8a5   :  { %5661 = vmatprep.subr.bf16.mxu1 %v6102_v1 }
 0x8a7   :  { %v4477_v61 = vpop.permute.xlu0 %4476 }
 0x8a8   :  { %v4491_v10 = vsel %vm580_vm3, %v4486_v40, %v4477_v61  ;;  %5662 = vmatpush3.bf16.msra.mxu1 %v6103_v47 }
 0x8a9   :  { %5663 = vmatprep.subr.bf16.mxu1 %v6104_v18 }
 0x8ab   :  { %v4481_v59 = vpop.permute.xlu0 %4480 }
 0x8ac   :  { %v4495_v11 = vsel %vm582_vm4, %v4491_v10, %v4481_v59  ;;  %5664 = vmatpush3.bf16.msra.mxu1 %v6105_v28  ;;  %v6126_v28 = vld [vmem:[%s8485_s7 + $0x100] sm:$0xff]  }
 0x8ad   :  { %4500 = vrot.lane.b32.xlu0 %v4495_v11, %s6168_s0  ;;  %5665 = vmatprep.subr.bf16.mxu1 %v6106_v55  ;;  %v6108_v11 = vld [vmem:[%s8485_s7 + $0x78] sm:$0xff]   ;;  %v6173_v55 = vmov 0.0  }
 0x8b0   :  { %v4479_v4 = vpop.permute.xlu1 %4478  ;;  %5666 = vmatpush3.bf16.msra.mxu1 %v6107_v41 }
 0x8b1   :  { %v4493_v44 = vsel %vm580_vm3, %v4489_v0, %v4479_v4  ;;  %5667 = vmatprep.subr.bf16.mxu1 %v6108_v11 }
 0x8b4   :  { %v4483_v2 = vpop.permute.xlu1 %4482 }
 0x8b5   :  { %v4497_v45 = vsel %vm582_vm4, %v4493_v44, %v4483_v2  ;;  %v6109_v44 = vld [vmem:[%s8485_s7 + $0x38] sm:$0xff]   ;;  %v6110_v2 = vld [vmem:[%s8485_s7 + $0xc0] sm:$0xff]  }
 0x8b6   :  { %4502 = vrot.lane.b32.xlu1 %v4497_v45, %s6168_s0  ;;  %5668 = vmatpush3.bf16.msra.mxu1 %v6109_v44 }
 0x8b7   :  { %5675 = vmatprep.subr.bf16.mxu1 %v6110_v2 }
 0x91f   :  { %v4501_v26 = vpop.permute.xlu0 %4500 }
 0x920   :  { %v4505_v43 = vsel %vm578_vm2, 0, %v4501_v26  ;;  %v4508_v46 = vsel %vm578_vm2, %v4501_v26, 0 }
 0x921   :  { %v4510_v22 = vshrl.u32 %v4505_v43, 16  ;;  %v4516_v38 = vshrl.u32 %v4508_v46, 16  ;;  %v4513_v51 = vshll.u32 %v4505_v43, 16  ;;  %v4519_v60 = vshll.u32 %v4508_v46, 16  ;;  %v8621_v46 = vld [vmem:[#allocation6_spill] sm:$0xff] }
 0x923   :  { %v4512_v49 = vrot.slane %v4510_v22, 7  ;;  %v4518_v54 = vrot.slane %v4516_v38, 7  ;;  %v8172_v22 = vsub.s32 %v4605_v39, %v8621_v46 }
 0x925   :  { %v4515_v29 = vor.u32 %v4513_v51, %v4512_v49  ;;  %v4521_v8 = vor.u32 %v4519_v60, %v4518_v54 }
 0x927   :  { %v4538_v14 = vsel %vm7548_vm1, 0, %v4515_v29  ;;  %v4539_v12 = vsel %vm7548_vm1, 0, %v4521_v8 }
 0x928   :  { %v8119_v9 = vsel %vm8103_vm6, %v4538_v14, 0  ;;  %v8123_v31 = vsel %vm8103_vm6, %v4539_v12, 0  ;;  %v4503_v3 = vpop.permute.xlu1 %4502 }
 0x929   :  { %v4507_v33 = vsel %vm578_vm2, 0, %v4503_v3  ;;  %v4509_v57 = vsel %vm578_vm2, %v4503_v3, 0  ;;  %v4552_v34 = vshll.u32 %v8119_v9, 16  ;;  %v4559_v17 = vshll.u32 %v8123_v31, 16 }
 0x92a   :  { %v4522_v16 = vshrl.u32 %v4507_v33, 16  ;;  %v4528_v48 = vshrl.u32 %v4509_v57, 16  ;;  %v4525_v7 = vshll.u32 %v4507_v33, 16  ;;  %v4531_v27 = vshll.u32 %v4509_v57, 16  ;;  %v6111_v57 = vld [vmem:[%s8485_s7 + $0x80] sm:$0xff]  }
 0x92b   :  { %v4550_v6 = vshrl.u32 %v8119_v9, 16  ;;  %v4554_v58 = vrot.slane %v4552_v34, 1  ;;  %v4561_v24 = vrot.slane %v4559_v17, 1  ;;  %v4557_v62 = vshrl.u32 %v8123_v31, 16  ;;  %v6113_v17 = vld [vmem:[%s8485_s7 + $0x88] sm:$0xff]  }
 0x92c   :  { %v4524_v53 = vrot.slane %v4522_v16, 7  ;;  %v4530_v21 = vrot.slane %v4528_v48, 7  ;;  %v4591_v38 = vrot.slane %v8119_v9, 1  ;;  %v6112_v16 = vld [vmem:[%s8485_s7 + $0xc8] sm:$0xff]  }
 0x92d   :  { %v4555_v25 = vor.u32 %v4554_v58, %v4550_v6  ;;  %v4562_v61 = vor.u32 %v4561_v24, %v4557_v62  ;;  %v6118_v6 = vld [vmem:[%s8485_s7 + $0xe0] sm:$0xff]   ;;  %v6123_v24 = vld [vmem:[%s8485_s7 + $0xb0] sm:$0xff]  }
 0x92e   :  { %v4527_v13 = vor.u32 %v4525_v7, %v4524_v53  ;;  %v4533_v15 = vor.u32 %v4531_v27, %v4530_v21  ;;  %v6114_v53 = vld [vmem:[%s8485_s7 + $0xd0] sm:$0xff]   ;;  %v6116_v21 = vld [vmem:[%s8485_s7 + $0xd8] sm:$0xff]   ;;  %v6119_v58 = vld [vmem:[%s8485_s7 + $0xa0] sm:$0xff]  }
 0x92f   :  { %4577 = vrot.lane.b32.xlu0 %v4555_v25, %s6170_s22  ;;  %v6115_v7 = vld [vmem:[%s8485_s7 + $0x90] sm:$0xff]   ;;  %v6117_v27 = vld [vmem:[%s8485_s7 + $0x98] sm:$0xff]  }
 0x930   :  { %v4540_v23 = vsel %vm7548_vm1, 0, %v4527_v13  ;;  %v4541_v42 = vsel %vm7548_vm1, 0, %v4533_v15  ;;  %v6120_v13 = vld [vmem:[%s8485_s7 + $0xe8] sm:$0xff]   ;;  %v6122_v25 = vld [vmem:[%s8485_s7 + $0xf0] sm:$0xff]  }
 0x931   :  { %v4547_v50 = vsel %vm8103_vm6, %v4540_v23, 0  ;;  %v8144_v19 = vsel %vm8103_vm6, %v4541_v42, 0  ;;  %v6121_v15 = vld [vmem:[%s8485_s7 + $0xa8] sm:$0xff]   ;;  %v6124_v23 = vld [vmem:[%s8485_s7 + $0xf8] sm:$0xff]  }
 0x932   :  { %v4566_v63 = vshll.u32 %v4547_v50, 16  ;;  %v4573_v40 = vshll.u32 %v8144_v19, 16  ;;  %v4564_v10 = vshrl.u32 %v4547_v50, 16  ;;  %v4571_v45 = vshrl.u32 %v8144_v19, 16  ;;  %v6125_v42 = vld [vmem:[%s8485_s7 + $0xb8] sm:$0xff]  }
 0x933   :  { %4579 = vrot.lane.b32.xlu0 %v4562_v61, %s6170_s22  ;;  %v4593_v20 = vrot.slane %v4547_v50, 1  ;;  %v4594_v62 = vrot.slane %v8144_v19, 1  ;;  %v6128_v61 = vld [vmem:[%s8485_s7 + $0x110] sm:$0xff]  }
 0x934   :  { %v4568_v59 = vrot.slane %v4566_v63, 1  ;;  %v4575_v0 = vrot.slane %v4573_v40, 1  ;;  %v4592_v63 = vrot.slane %v8123_v31, 1 }
 0x935   :  { %v4648_v40 = vrot.slane %v4594_v62, %v8172_v22 }
 0x936   :  { %v4569_v4 = vor.u32 %v4568_v59, %v4564_v10  ;;  %v4576_v36 = vor.u32 %v4575_v0, %v4571_v45  ;;  %v4624_v10 = vrot.slane %v4592_v63, %v8172_v22  ;;  %v6129_v59 = vld [vmem:[%s8485_s7 + $0x118] sm:$0xff]  }
 0x938   :  { %4581 = vrot.lane.b32.xlu1 %v4569_v4, %s6170_s22 }
 0x93c   :  { %4583 = vrot.lane.b32.xlu1 %v4576_v36, %s6170_s22 }
 0x9a1   :  { %v4578_v5 = vpop.permute.xlu0 %4577 }
 0x9a2   :  { %v4596_v56 = vsel %vm580_vm3, %v8123_v31, %v4578_v5 }
 0x9a3   :  { %v4601_v37 = vcombine.low %v8119_v9, %v4596_v56 }
 0x9a5   :  { %v4580_v35 = vpop.permute.xlu0 %4579  ;;  %v4609_v51 = vrot.slane %v4601_v37, %v8172_v22 }
 0x9a6   :  { %v4585_v26 = vsel %vm580_vm3, %v4578_v5, %v4580_v35 }
 0x9a7   :  { %v4602_v54 = vcombine.low %v4585_v26, %v4591_v38 }
 0x9a9   :  { %v4616_v47 = vrot.slane %v4602_v54, %v8172_v22 }
 0x9aa   :  { %v4582_v1 = vpop.permute.xlu1 %4581 }
 0x9ab   :  { %v4598_v43 = vsel %vm580_vm3, %v8144_v19, %v4582_v1  ;;  %v4739_v19 = vcombine.low %v4624_v10, %v4648_v40 }
 0x9ac   :  { %v4625_v49 = vcombine.low %v4547_v50, %v4598_v43  ;;  %v6127_v50 = vld [vmem:[%s8485_s7 + $0x108] sm:$0xff]  }
 0x9ad   :  { %v4746_v31 = vrot.slane %v4739_v19, %v8172_v22 }
 0x9ae   :  { %v4633_v60 = vrot.slane %v4625_v49, %v8172_v22  ;;  %v4584_v29 = vpop.permute.xlu1 %4583 }
 0x9af   :  { %v4586_v8 = vsel %vm580_vm3, %v4582_v1, %v4584_v29 }
 0x9b0   :  { %v5613_v14 = vcombine.low %v4609_v51, %v4633_v60  ;;  %v4626_v12 = vcombine.low %v4586_v8, %v4593_v20 }
 0x9b2   :  { %v4640_v18 = vrot.slane %v4626_v12, %v8172_v22  ;;  %v4729_v3 = vrot.slane %v5613_v14, %v8172_v22 }
 0x9b4   :  { %v5614_v33 = vcombine.low %v4616_v47, %v4640_v18  ;;  %v4737_v9 = vcombine.high %v4729_v3, %v4729_v3  ;;  %v5208_v18 = vld [vmem:[%s8488_s10 + $0x80] sm:$0xff] }
 0x9b6   :  { %5002 = vmatprep.mubr.bf16.mxu1 %v4737_v9  ;;  %v4736_v48 = vrot.slane %v5614_v33, %v8172_v22  ;;  %v5192_v33 = vld [vmem:[%s8488_s10] sm:$0xff] }
 0x9b7   :  { %5003 = vmatmul.mubr.bf16.vlgmr.msra.gmra.mrb[12].mxu1 %v4729_v3  ;;  %v5209_v3 = vld [vmem:[%s8488_s10 + $0x88] sm:$0xff] }
 0x9b8   :  { %5676 = vmatpush3.bf16.msra.mxu1 %v6111_v57  ;;  %v4738_v34 = vcombine.high %v4736_v48, %v4736_v48  ;;  %v5784_v9 = vpack.c.bf16 %v5209_v3, %v5208_v18  ;;  %v5193_v57 = vld [vmem:[%s8488_s10 + $0x8] sm:$0xff]  ;;  %v5220_v18 = vld [vmem:[%s8488_s10 + $0xe0] sm:$0xff] }
 0x9b9   :  { %5677 = vmatprep.subr.bf16.mxu1 %v6112_v16  ;;  %v5210_v16 = vld [vmem:[%s8488_s10 + $0x90] sm:$0xff] }
 0x9ba   :  { %5042 = vmatprep.mubr.bf16.mxu1 %v4738_v34  ;;  %v5786_v34 = vpack.c.bf16 %v5193_v57, %v5192_v33  ;;  %v5221_v33 = vld [vmem:[%s8488_s10 + $0xe8] sm:$0xff] }
 0x9bb   :  { %v5205_v57 = vld [vmem:[%s8488_s10 + $0x68] sm:$0xff] }
 0x9bc   :  { %5678 = vmatpush3.bf16.msra.mxu1 %v6113_v17 }
 0x9bd   :  { %5679 = vmatprep.subr.bf16.mxu1 %v6114_v53  ;;  %v5194_v53 = vld [vmem:[%s8488_s10 + $0x10] sm:$0xff] }
 0x9c0   :  { %5680 = vmatpush3.bf16.msra.mxu1 %v6115_v7  ;;  %v5195_v7 = vld [vmem:[%s8488_s10 + $0x18] sm:$0xff] }
 0x9c1   :  { %5681 = vmatprep.subr.bf16.mxu1 %v6116_v21  ;;  %v5212_v21 = vld [vmem:[%s8488_s10 + $0xa0] sm:$0xff] }
 0x9c4   :  { %5682 = vmatpush3.bf16.msra.mxu1 %v6117_v27  ;;  %v5213_v27 = vld [vmem:[%s8488_s10 + $0xa8] sm:$0xff] }
 0x9c5   :  { %5683 = vmatprep.subr.bf16.mxu1 %v6118_v6  ;;  %v5790_v6 = vpack.c.bf16 %v5195_v7, %v5194_v53  ;;  %v5206_v7 = vld [vmem:[%s8488_s10 + $0x70] sm:$0xff] }
 0x9c8   :  { %5684 = vmatpush3.bf16.msra.mxu1 %v6119_v58  ;;  %v5792_v58 = vpack.c.bf16 %v5213_v27, %v5212_v21  ;;  %v5207_v21 = vld [vmem:[%s8488_s10 + $0x78] sm:$0xff]  ;;  %v5240_v27 = vld [vmem:[%s8488_s10 + $0x180] sm:$0xff] }
 0x9c9   :  { %5685 = vmatprep.subr.bf16.mxu1 %v6120_v13  ;;  %v5196_v13 = vld [vmem:[%s8488_s10 + $0x20] sm:$0xff] }
 0x9cc   :  { %5686 = vmatpush3.bf16.msra.mxu1 %v6121_v15  ;;  %v5197_v15 = vld [vmem:[%s8488_s10 + $0x28] sm:$0xff] }
 0x9cd   :  { %5687 = vmatprep.subr.bf16.mxu1 %v6122_v25  ;;  %v5794_v25 = vpack.c.bf16 %v5197_v15, %v5196_v13 }
 0x9d0   :  { %5688 = vmatpush3.bf16.msra.mxu1 %v6123_v24 }
 0x9d1   :  { %5689 = vmatprep.subr.bf16.mxu1 %v6124_v23 }
 0x9d4   :  { %5690 = vmatpush3.bf16.msra.mxu1 %v6125_v42 }
 0x9d5   :  { %5772 = vmatprep.subr.bf16.mxu1 %v6173_v55 }
 0x9d7   :  { %5043 = vmatmul.mubr.bf16.vlgmr.msra.gmra.mrb[16].mxu1 %v4736_v48  ;;  %v5211_v48 = vld [vmem:[%s8488_s10 + $0x98] sm:$0xff] }
 0x9d8   :  { %5773 = vmatpush3.bf16.msra.mxu1 %v6126_v28  ;;  %5780 = vmatprep.mubr.msk.bf16.mxu1 %vm6174_vm0, %v6173_v55  ;;  %v5788_v17 = vpack.c.bf16 %v5211_v48, %v5210_v16  ;;  %v5808_v16 = vpack.c.bf16 %v5221_v33, %v5220_v18  ;;  %v5222_v48 = vld [vmem:[%s8488_s10 + $0xf0] sm:$0xff]  ;;  %v5249_v18 = vld [vmem:[%s8488_s10 + $0x1c8] sm:$0xff] }
 0x9d9   :  { %5774 = vmatprep.subr.bf16.mxu1 %v6173_v55 }
 0x9dc   :  { %5775 = vmatpush3.bf16.msra.mxu1 %v6127_v50 }
 0x9dd   :  { %5776 = vmatprep.subr.bf16.mxu1 %v6173_v55 }
 0x9e0   :  { %5777 = vmatpush3.bf16.msra.mxu1 %v6128_v61 }
 0x9e1   :  { %5778 = vmatprep.subr.bf16.mxu1 %v6173_v55 }
 0x9e4   :  { %5779 = vmatpush3.bf16.msra.mxu1 %v6129_v59 }
 0x9e5   :  { %5785 = vmatprep.subr.bf16.mxu1 %v5784_v9  ;;  %v5204_v9 = vld [vmem:[%s8488_s10 + $0x60] sm:$0xff] }
 0x9e7   :  { %5781 = vmatmul.mubr.msk.bf16.vlgmr.msra.gmra.mrb[20].mxu1 %vm580_vm3, %v4746_v31 }
 0x9e8   :  { %5787 = vmatpush3.bf16.msra.mxu1 %v5786_v34  ;;  %v5223_v34 = vld [vmem:[%s8488_s10 + $0xf8] sm:$0xff] }
 0x9e9   :  { %5789 = vmatprep.subr.bf16.mxu1 %v5788_v17  ;;  %v5810_v17 = vpack.c.bf16 %v5205_v57, %v5204_v9  ;;  %v5812_v53 = vpack.c.bf16 %v5223_v34, %v5222_v48  ;;  %v5232_v9 = vld [vmem:[%s8488_s10 + $0x140] sm:$0xff]  ;;  %v5233_v57 = vld [vmem:[%s8488_s10 + $0x148] sm:$0xff]  ;;  %v5251_v48 = vld [vmem:[%s8488_s10 + $0x1d8] sm:$0xff] }
 0x9ea   :  { %v5834_v34 = vpack.c.bf16 %v5233_v57, %v5232_v9 }
 0x9ec   :  { %5791 = vmatpush3.bf16.msra.mxu1 %v5790_v6  ;;  %v5241_v6 = vld [vmem:[%s8488_s10 + $0x188] sm:$0xff] }
 0x9ed   :  { %5793 = vmatprep.subr.bf16.mxu1 %v5792_v58  ;;  %v5814_v58 = vpack.c.bf16 %v5207_v21, %v5206_v7  ;;  %v5816_v13 = vpack.c.bf16 %v5241_v6, %v5240_v27  ;;  %v5235_v7 = vld [vmem:[%s8488_s10 + $0x158] sm:$0xff]  ;;  %v5252_v21 = vld [vmem:[%s8488_s10 + $0x1e0] sm:$0xff]  ;;  %v5253_v27 = vld [vmem:[%s8488_s10 + $0x1e8] sm:$0xff] }
 0x9f0   :  { %5795 = vmatpush3.bf16.msra.mxu1 %v5794_v25 }
 0xa8a   :  { %v5669_v41 = vpop.f32.mrb[12].mxu1 }
 0xa8b   :  { %v5670_v11 = vpop.f32.mrb[13].mxu1 }
 0xa8c   :  { %v5671_v4 = vadd.f32 %v5670_v11, %v5669_v41  ;;  %v5672_v0 = vpop.f32.mrb[14].mxu1 }
 0xa8d   :  { %v5673_v44 = vpop.f32.mrb[15].mxu1  ;;  %v5214_v0 = vld [vmem:[%s8488_s10 + $0xb0] sm:$0xff] }
 0xa8e   :  { %v5215_v44 = vld [vmem:[%s8488_s10 + $0xb8] sm:$0xff] }
 0xaaa   :  { %v5691_v2 = vpop.f32.mrb[16].mxu1 }
 0xaab   :  { %v5692_v45 = vpop.f32.mrb[17].mxu1 }
 0xaac   :  { %v5693_v36 = vadd.f32 %v5692_v45, %v5691_v2  ;;  %v5694_v5 = vpop.f32.mrb[18].mxu1  ;;  %v5198_v2 = vld [vmem:[%s8488_s10 + $0x30] sm:$0xff]  ;;  %v5796_v45 = vpack.c.bf16 %v5215_v44, %v5214_v0 }
 0xaad   :  { %v5695_v30 = vpop.f32.mrb[19].mxu1 }
 0xaae   :  { %v5045_v52 = vadd.f32 %v5693_v36, %v5671_v4  ;;  %v5199_v36 = vld [vmem:[%s8488_s10 + $0x38] sm:$0xff]  ;;  %5797 = vmatprep.subr.bf16.mxu1 %v5796_v45  ;;  %v5090_v30 = vld [vmem:[%s8486_s8] sm:$0x1] }
 0xaaf   :  { %v5798_v5 = vpack.c.bf16 %v5199_v36, %v5198_v2  ;;  %v5224_v45 = vld [vmem:[%s8488_s10 + $0x100] sm:$0xff]  ;;  %v5225_v36 = vld [vmem:[%s8488_s10 + $0x108] sm:$0xff] }
 0xab1   :  { %5799 = vmatpush3.bf16.msra.mxu1 %v5798_v5 }
 0xaba   :  { %v5084_v56 = vpop.f32.mrb[20].mxu1 }
 0xabb   :  { %v8245_v39 = vadd.f32 %v5084_v56, %v5045_v52  ;;  %v5782_v35 = vpop.f32.mrb[21].mxu1  ;;  %v5216_v52 = vld [vmem:[%s8488_s10 + $0xc0] sm:$0xff]  ;;  %v5217_v56 = vld [vmem:[%s8488_s10 + $0xc8] sm:$0xff] }
 0xabc   :  { %v5087_v37 = vpop.f32.mrb[22].mxu1  ;;  %v5200_v35 = vld [vmem:[%s8488_s10 + $0x40] sm:$0xff] }
 0xabd   :  { %v5092_v1 = vmul.f32 %v8245_v39, %v8245_v39  ;;  %v5093_v26 = vrot.slane %v8245_v39, 4  ;;  %v5783_v43 = vpop.f32.mrb[23].mxu1 }
 0xabf   :  { %v5094_v38 = vadd.f32 %v5093_v26, %v8245_v39  ;;  %v5099_v49 = vrot.slane %v5092_v1, 4  ;;  %v5201_v26 = vld [vmem:[%s8488_s10 + $0x48] sm:$0xff] }
 0xac1   :  { %v5095_v51 = vrot.slane %v5094_v38, 2  ;;  %v5100_v54 = vadd.f32 %v5099_v49, %v5092_v1  ;;  %v5800_v1 = vpack.c.bf16 %v5217_v56, %v5216_v52  ;;  %v5091_v49 = vld [vmem:[%s8487_s9] sm:$0x1]  ;;  %v5818_v52 = vpack.c.bf16 %v5225_v36, %v5224_v45 }
 0xac3   :  { %v5096_v60 = vadd.f32 %v5095_v51, %v5094_v38  ;;  %v5101_v20 = vrot.slane %v5100_v54, 2  ;;  %v5802_v38 = vpack.c.bf16 %v5201_v26, %v5200_v35  ;;  %5801 = vmatprep.subr.bf16.mxu1 %v5800_v1  ;;  %v5227_v1 = vld [vmem:[%s8488_s10 + $0x118] sm:$0xff] }
 0xac5   :  { %v5097_v29 = vrot.slane %v5096_v60, 1  ;;  %v5102_v8 = vadd.f32 %v5101_v20, %v5100_v54  ;;  %5803 = vmatpush3.bf16.msra.mxu1 %v5802_v38  ;;  %v5245_v38 = vld [vmem:[%s8488_s10 + $0x1a8] sm:$0xff] }
 0xac7   :  { %v5098_v14 = vadd.f32 %v5097_v29, %v5096_v60  ;;  %v5103_v12 = vrot.slane %v5102_v8, 1  ;;  %v5218_v29 = vld [vmem:[%s8488_s10 + $0xd0] sm:$0xff] }
 0xac9   :  { %5110 = vrot.lane.b32.xlu1 %v5098_v14, %s6170_s22  ;;  %5106 = vrot.lane.b32.xlu0 %v5098_v14, %s6169_s21  ;;  %v5104_v47 = vadd.f32 %v5103_v12, %v5102_v8  ;;  %v5219_v8 = vld [vmem:[%s8488_s10 + $0xd8] sm:$0xff] }
 0xaca   :  { %v5804_v12 = vpack.c.bf16 %v5219_v8, %v5218_v29 }
 0xacc   :  { %5805 = vmatprep.subr.bf16.mxu1 %v5804_v12  ;;  %v5231_v12 = vld [vmem:[%s8488_s10 + $0x138] sm:$0xff] }
 0xacd   :  { %5114 = vrot.lane.b32.xlu1 %v5098_v14, %s6168_s0  ;;  %5120 = vrot.lane.b32.xlu0 %v5104_v47, %s6169_s21 }
 0xad1   :  { %5128 = vrot.lane.b32.xlu1 %v5104_v47, %s6168_s0  ;;  %5124 = vrot.lane.b32.xlu0 %v5104_v47, %s6170_s22 }
 0xb3b   :  { %v5111_v24 = vpop.permute.xlu1 %5110  ;;  %v5107_v23 = vpop.permute.xlu0 %5106 }
 0xb3c   :  { %v5109_v42 = vadd.f32 %v5107_v23, %v5098_v14  ;;  %v5202_v14 = vld [vmem:[%s8488_s10 + $0x50] sm:$0xff] }
 0xb3e   :  { %v5113_v28 = vadd.f32 %v5111_v24, %v5109_v42 }
 0xb3f   :  { %v5115_v55 = vpop.permute.xlu1 %5114  ;;  %v5121_v50 = vpop.permute.xlu0 %5120 }
 0xb40   :  { %v5117_v62 = vadd.f32 %v5115_v55, %v5113_v28  ;;  %v5123_v63 = vadd.f32 %v5121_v50, %v5104_v47  ;;  %v5203_v47 = vld [vmem:[%s8488_s10 + $0x58] sm:$0xff]  ;;  %v6175_v50 = vmov 1935823168  }
 0xb41   :  { %v5806_v3 = vpack.c.bf16 %v5203_v47, %v5202_v14  ;;  %v5230_v14 = vld [vmem:[%s8488_s10 + $0x130] sm:$0xff]  ;;  %v5248_v47 = vld [vmem:[%s8488_s10 + $0x1c0] sm:$0xff] }
 0xb42   :  { %v5118_v40 = vmul.f32 0.03125, %v5117_v62  ;;  %v5186_v62 = vunpack.c.l.s4 %v6175_v50  ;;  %v5832_v33 = vpack.c.bf16 %v5249_v18, %v5248_v47 }
 0xb43   :  { %v5125_v61 = vpop.permute.xlu0 %5124  ;;  %v5129_v59 = vpop.permute.xlu1 %5128  ;;  %5807 = vmatpush3.bf16.msra.mxu1 %v5806_v3  ;;  %v5830_v3 = vpack.c.bf16 %v5231_v12, %v5230_v14 }
 0xb44   :  { %v5127_v10 = vadd.f32 %v5125_v61, %v5123_v63  ;;  %v5133_v31 = vmul.f32 %v5118_v40, %v5118_v40  ;;  %5809 = vmatprep.subr.bf16.mxu1 %v5808_v16  ;;  %v5250_v16 = vld [vmem:[%s8488_s10 + $0x1d0] sm:$0xff] }
 0xb46   :  { %v5131_v19 = vadd.f32 %v5129_v59, %v5127_v10 }
 0xb47   :  { %5811 = vmatpush3.bf16.msra.mxu1 %v5810_v17  ;;  %v5836_v17 = vpack.c.bf16 %v5251_v48, %v5250_v16 }
 0xb48   :  { %v5132_v41 = vmul.f32 0.03125, %v5131_v19  ;;  %5813 = vmatprep.subr.bf16.mxu1 %v5812_v53  ;;  %v5187_v19 = vunpack.c.0.s8 %v5186_v62  ;;  %v5234_v53 = vld [vmem:[%s8488_s10 + $0x150] sm:$0xff] }
 0xb49   :  { %v5838_v6 = vpack.c.bf16 %v5235_v7, %v5234_v53 }
 0xb4a   :  { %v5134_v11 = vsub.f32 %v5132_v41, %v5133_v31 }
 0xb4b   :  { %5815 = vmatpush3.bf16.msra.mxu1 %v5814_v58  ;;  %v5840_v58 = vpack.c.bf16 %v5253_v27, %v5252_v21 }
 0xb4c   :  { %v5135_v4 = vadd.f32 1e-05, %v5134_v11  ;;  %5817 = vmatprep.subr.bf16.mxu1 %v5816_v13  ;;  %v5236_v13 = vld [vmem:[%s8488_s10 + $0x160] sm:$0xff] }
 0xb4e   :  { %6134 = vrsqrt.f32 %v5135_v4  ;;  %v5190_v4 = vsub.s32 %v5187_v19, %v8621_v46  ;;  %v5243_v46 = vld [vmem:[%s8488_s10 + $0x198] sm:$0xff] }
 0xb58   :  { %v6135_v37 = vpop.eup %6134 }
 0xb59   :  { %v5137_v43 = vmul.f32 %v6135_v37, %v5090_v30  ;;  %v5226_v37 = vld [vmem:[%s8488_s10 + $0x110] sm:$0xff] }
 0xb5b   :  { %v5144_v51 = vrot.slane %v5137_v43, %v8617_v32  ;;  %v5138_v54 = vmul.f32 %v5137_v43, %v5118_v40 }
 0xb5d   :  { %5148 = vrot.lane.b32.xlu1 %v5144_v51, %s6170_s22  ;;  %5145 = vrot.lane.b32.xlu0 %v5144_v51, %s6168_s0  ;;  %v5139_v60 = vsub.f32 %v5091_v49, %v5138_v54  ;;  %v5229_v54 = vld [vmem:[%s8488_s10 + $0x128] sm:$0xff] }
 0xb5f   :  { %v5161_v20 = vrot.slane %v5139_v60, %v8617_v32 }
 0xb61   :  { %5151 = vrot.lane.b32.xlu0 %v5144_v51, %s6169_s21  ;;  %5162 = vrot.lane.b32.xlu1 %v5161_v20, %s6168_s0  ;;  %v5228_v51 = vld [vmem:[%s8488_s10 + $0x120] sm:$0xff] }
 0xb62   :  { %v5826_v29 = vpack.c.bf16 %v5229_v54, %v5228_v51 }
 0xb65   :  { %5165 = vrot.lane.b32.xlu0 %v5161_v20, %s6170_s22  ;;  %5168 = vrot.lane.b32.xlu1 %v5161_v20, %s6169_s21  ;;  %v5247_v20 = vld [vmem:[%s8488_s10 + $0x1b8] sm:$0xff] }
 0xbcf   :  { %v5149_v15 = vpop.permute.xlu1 %5148  ;;  %v5146_v25 = vpop.permute.xlu0 %5145 }
 0xbd0   :  { %v5154_v24 = vsel %vm578_vm2, %v5137_v43, %v5146_v25  ;;  %v5244_v43 = vld [vmem:[%s8488_s10 + $0x1a0] sm:$0xff]  ;;  %v5254_v25 = vld [vmem:[%s8488_s10 + $0x1f0] sm:$0xff] }
 0xbd1   :  { %v5155_v23 = vsel %vm580_vm3, %v5154_v24, %v5149_v15  ;;  %v5824_v49 = vpack.c.bf16 %v5245_v38, %v5244_v43  ;;  %v5237_v15 = vld [vmem:[%s8488_s10 + $0x168] sm:$0xff]  ;;  %v5255_v24 = vld [vmem:[%s8488_s10 + $0x1f8] sm:$0xff] }
 0xbd3   :  { %v5152_v42 = vpop.permute.xlu0 %5151  ;;  %v5163_v28 = vpop.permute.xlu1 %5162 }
 0xbd4   :  { %v5156_v55 = vsel %vm582_vm4, %v5155_v23, %v5152_v42  ;;  %v5171_v61 = vsel %vm578_vm2, %v5139_v60, %v5163_v28  ;;  %v5246_v60 = vld [vmem:[%s8488_s10 + $0x1b0] sm:$0xff]  ;;  %v5842_v23 = vpack.c.bf16 %v5237_v15, %v5236_v13  ;;  %v5844_v42 = vpack.c.bf16 %v5255_v24, %v5254_v25 }
 0xbd5   :  { %v5177_v63 = vrot.slane %v5156_v55, %v8617_v32  ;;  %v5828_v8 = vpack.c.bf16 %v5247_v20, %v5246_v60  ;;  %v5238_v28 = vld [vmem:[%s8488_s10 + $0x170] sm:$0xff]  ;;  %v5239_v55 = vld [vmem:[%s8488_s10 + $0x178] sm:$0xff]  ;;  %vm5431_vm2 = vcmask 1024  }
 0xbd6   :  { %v5846_v50 = vpack.c.bf16 %v5239_v55, %v5238_v28 }
 0xbd7   :  { %v5166_v40 = vpop.permute.xlu0 %5165  ;;  %v5169_v10 = vpop.permute.xlu1 %5168  ;;  %v5178_v41 = vmul.f32 %v5177_v63, %v8245_v39 }
 0xbd8   :  { %v5172_v59 = vsel %vm580_vm3, %v5171_v61, %v5166_v40  ;;  %v5652_v40 = vld [vmem:[#allocation2] ss:$0 sm:$0xff] }
 0xbd9   :  { %v5173_v31 = vsel %vm582_vm4, %v5172_v59, %v5169_v10 }
 0xbda   :  { %v5182_v11 = vrot.slane %v5173_v31, %v8617_v32  ;;  %v5242_v32 = vld [vmem:[%s8488_s10 + $0x190] sm:$0xff] }
 0xbdb   :  { %v5820_v35 = vpack.c.bf16 %v5243_v46, %v5242_v32 }
 0xbdc   :  { %v5183_v0 = vadd.f32 %v5182_v11, %v5178_v41 }
 0xbde   :  { %v5184_v44 = vmax.f32 %v5183_v0, 0.0 }
 0xbe0   :  { %v5191_v2 = vrot.slane %v5184_v44, %v5190_v4 }
 0xbe2   :  { %v5271_v5 = vrot.slane %v5191_v2, %v8172_v22  ;;  %v5264_v30 = vcombine.high %v5191_v2, %v5191_v2 }
 0xbe4   :  { %v5279_v39 = vcombine.high %v5271_v5, %v5271_v5  ;;  %v5278_v56 = vrot.slane %v5264_v30, %v8172_v22  ;;  %v5822_v22 = vpack.c.bf16 %v5227_v1, %v5226_v37 }
 0xbe6   :  { %5349 = vmatprep.mubr.f32.mxu1 %v5279_v39  ;;  %v5280_v26 = vcombine.high %v5278_v56, %v5278_v56 }
 0xbe7   :  { %5350 = vmatmul.mubr.f32.vlgmr.msra.gmra.mrb[24].mxu1 %v5271_v5 }
 0xbe8   :  { %5819 = vmatpush3.bf16.msra.mxu1 %v5818_v52  ;;  %5419 = vmatprep.mubr.f32.mxu1 %v5280_v26 }
 0xbe9   :  { %5821 = vmatprep.subr.bf16.mxu1 %v5820_v35 }
 0xbec   :  { %5823 = vmatpush3.bf16.msra.mxu1 %v5822_v22 }
 0xbed   :  { %5825 = vmatprep.subr.bf16.mxu1 %v5824_v49 }
 0xbf0   :  { %5827 = vmatpush3.bf16.msra.mxu1 %v5826_v29 }
 0xbf1   :  { %5829 = vmatprep.subr.bf16.mxu1 %v5828_v8 }
 0xbf4   :  { %5831 = vmatpush3.bf16.msra.mxu1 %v5830_v3 }
 0xbf5   :  { %5833 = vmatprep.subr.bf16.mxu1 %v5832_v33 }
 0xbf8   :  { %5835 = vmatpush3.bf16.msra.mxu1 %v5834_v34 }
 0xbf9   :  { %5837 = vmatprep.subr.bf16.mxu1 %v5836_v17 }
 0xbfc   :  { %5839 = vmatpush3.bf16.msra.mxu1 %v5838_v6 }
 0xbfd   :  { %5841 = vmatprep.subr.bf16.mxu1 %v5840_v58 }
 0xc00   :  { %5843 = vmatpush3.bf16.msra.mxu1 %v5842_v23 }
 0xc01   :  { %5845 = vmatprep.subr.bf16.mxu1 %v5844_v42 }
 0xc04   :  { %5847 = vmatpush3.bf16.msra.mxu1 %v5846_v50 }
 0xc07   :  { %5420 = vmatmul.mubr.f32.vlgmr.msra.gmra.mrb[26].mxu1 %v5278_v56 }
 0xcba   :  { %v5734_v62 = vpop.f32.mrb[24].mxu1 }
 0xcbb   :  { %v5735_v63 = vpop.f32.mrb[25].mxu1 }
 0xcbc   :  { %v5736_v61 = vadd.f32 %v5735_v63, %v5734_v62 }
 0xcbe   :  { %v5352_v19 = vadd.f32 %v5736_v61, %v5652_v40 }
 0xcda   :  { %v5769_v10 = vpop.f32.mrb[26].mxu1 }
 0xcdb   :  { %v5770_v59 = vpop.f32.mrb[27].mxu1 }
 0xcdc   :  { %v5771_v31 = vadd.f32 %v5770_v59, %v5769_v10 }
 0xcde   :  { %v5422_v41 = vadd.f32 %v5771_v31, %v5352_v19 }
 0xce0   :  { %v5425_v11 = vsub.f32 0.0, %v5422_v41 }
 0xce2   :  { %v5426_v4 = vmul.f32 1.442695, %v5425_v11 }
 0xce4   :  { %6136 = vpow2.f32 %v5426_v4 }
 0xcee   :  { %v6137_v0 = vpop.eup %6136 }
 0xcef   :  { %v5428_v44 = vadd.f32 1.0, %v6137_v0 }
 0xcf1   :  { %6138 = vrcp.f32 %v5428_v44 }
 0xcfb   :  { %v6139_v2 = vpop.eup %6138 }
 0xcfc   :  { %5432 = vst.msk [vmem:[%s8490_s12] sm:$0x3] %vm5431_vm2, %v6139_v2 }
 0xcfd   :  { %5437 = vsyncpa [#allocation4], 1 }

</bundles_post_ra>
